<compile_context>
chip_gen: v5e
topology: v5e:2x2
jax: 0.10.0
libtpu: 0.0.40
codegen_flags: <defaults>
</compile_context>

<pallas_src>
import jax
import jax.numpy as jnp
from jax.experimental import pallas as pl
from jax.experimental.pallas import tpu as pltpu  # noqa: F401  (kept for TPU-specific tuning hooks)


def _sigmoid_mul_conv1x1_kernel(s_ref, x_ref, w_ref, o_ref):
    # s_ref: (1, Cin)     -- pre-sigmoid per-channel gate
    # x_ref: (Cin, M)     -- channel-major activations (M = H*W)
    # w_ref: (Cout, Cin)  -- 1x1 conv weight, native OI layout
    # o_ref: (Cout, M)
    gate = jax.nn.sigmoid(s_ref[...])                       # (1, Cin)    EUP
    # Fold the gate into the weight (Cout x Cin broadcast over rows), then cast
    # both MXU operands to bf16 for a single MXU pass; accumulate in f32.
    wg = (w_ref[...] * gate).astype(jnp.bfloat16)           # (Cout, Cin) VPU + cast
    x_bf = x_ref[...].astype(jnp.bfloat16)                  # (Cin, M)
    o_ref[...] = jnp.dot(
        wg, x_bf, preferred_element_type=jnp.float32
    ).astype(o_ref.dtype)                                   # MXU: (Cout,Cin)@(Cin,M) == 1x1 conv


def sigmoid_mul_conv1x1(s_nc11, x_nchw, weight_oi11):
    """s_nc11: (1, Cin, 1, 1); x_nchw: (1, Cin, H, W); weight: (Cout, Cin, 1, 1)."""
    N, Cin, H, W = x_nchw.shape
    Cout = weight_oi11.shape[0]
    assert N == 1, "gate broadcast implemented for N == 1 (as in the reference module)"
    M = H * W

    # All reshapes below are layout-preserving (no data movement / no transposes).
    x2d = x_nchw.reshape(Cin, M)            # (Cin, M)
    s2d = s_nc11.reshape(1, Cin)            # (1, Cin)
    w2d = weight_oi11.reshape(Cout, Cin)    # (Cout, Cin)

    itemsize = jnp.dtype(x_nchw.dtype).itemsize
    cost = pl.CostEstimate(
        flops=2 * Cout * Cin * M,                                   # ~94.08 MFLOP
        bytes_accessed=(Cin * M + Cout * Cin + Cin + Cout * M) * itemsize,
        transcendentals=Cin,                                        # sigmoid
    )

    out2d = pl.pallas_call(
        _sigmoid_mul_conv1x1_kernel,
        out_shape=jax.ShapeDtypeStruct((Cout, M), x_nchw.dtype),
        # Single grid point; blocks cover the full arrays, so the (8,128)
        # divisibility rule does not apply. Total VMEM ~2 MiB (x 0.9 MiB +
        # w 0.96 MiB + out 0.16 MiB, double-buffered) -> well within scoped
        # limits on every generation including v7x (32 MiB scoped default).
        in_specs=[
            pl.BlockSpec((1, Cin), lambda: (0, 0)),
            pl.BlockSpec((Cin, M), lambda: (0, 0)),
            pl.BlockSpec((Cout, Cin), lambda: (0, 0)),
        ],
        out_specs=pl.BlockSpec((Cout, M), lambda: (0, 0)),
        cost_estimate=cost,
    )(s2d, x2d, w2d)

    # (Cout, M) -> (1, Cout, H, W): plain reshape, no transpose.
    return out2d.reshape(N, Cout, H, W)


def _reference(s_nc11, x_nchw, weight_oi11):
    # Pure-JAX reference for correctness checking (matches the PyTorch module).
    gate = jax.nn.sigmoid(s_nc11)
    xg = x_nchw * gate
    return jax.lax.conv_general_dilated(
        xg, weight_oi11, window_strides=(1, 1), padding="VALID",
        dimension_numbers=("NCHW", "OIHW", "NCHW"),
    )


if __name__ == "__main__":
    key = jax.random.PRNGKey(0)
    k1, k2, k3 = jax.random.split(key, 3)

    # Shapes implied by the module: Conv2d(1200, 200, 1) on a (1, 1200, 14, 14) map.
    N, Cin, H, W, Cout = 1, 1200, 14, 14, 200

    x418 = jax.random.normal(k1, (N, Cin, H, W), dtype=jnp.float32)
    x422 = jax.random.normal(k2, (N, Cin, 1, 1), dtype=jnp.float32)
    # Deterministic synthetic conv weight (Conv2d(1200, 200, 1, bias=False)).
    conv_w = jax.random.normal(k3, (Cout, Cin, 1, 1), dtype=jnp.float32) * 0.02

    out = sigmoid_mul_conv1x1(x422, x418, conv_w)
    out = jax.block_until_ready(out)

    ref = jax.block_until_ready(_reference(x422, x418, conv_w))
    assert out.shape == (N, Cout, H, W), out.shape
    # bf16 MXU operands with f32 accumulation over K=1200 -> bf16-level tolerance.
    assert jnp.allclose(out, ref, atol=2e-2, rtol=2e-2), float(
        jnp.max(jnp.abs(out - ref))
    )

    print("KERNEL_OK")
</pallas_src>

<mosaic_0001>
module attributes {stable_mosaic.version = 11 : i64} {
  func.func @_sigmoid_mul_conv1x1_kernel(%arg0: memref<1x1200xf32, #tpu.memory_space<vmem>>, %arg1: memref<1200x196xf32, #tpu.memory_space<vmem>>, %arg2: memref<200x1200xf32, #tpu.memory_space<vmem>>, %arg3: memref<200x196xf32, #tpu.memory_space<vmem>>) attributes {dimension_semantics = [], scalar_prefetch = 0 : i64, scratch_operands = 0 : i64, tpu.core_type = #tpu.core_type<tc>} {
    %c0 = arith.constant 0 : index
    %c0_0 = arith.constant 0 : index
    %0 = vector.load %arg0[%c0, %c0_0] : memref<1x1200xf32, #tpu.memory_space<vmem>>, vector<1x1200xf32>
    %1 = arith.negf %0 : vector<1x1200xf32>
    %2 = math.exp %1 : vector<1x1200xf32>
    %cst = arith.constant 1.000000e+00 : f32
    %3 = vector.broadcast %cst : f32 to vector<1x1200xf32>
    %4 = arith.addf %3, %2 : vector<1x1200xf32>
    %5 = arith.divf %3, %4 : vector<1x1200xf32>
    %c0_1 = arith.constant 0 : index
    %c0_2 = arith.constant 0 : index
    %6 = vector.load %arg2[%c0_1, %c0_2] : memref<200x1200xf32, #tpu.memory_space<vmem>>, vector<200x1200xf32>
    %7 = vector.broadcast %5 : vector<1x1200xf32> to vector<200x1200xf32>
    %8 = arith.mulf %6, %7 : vector<200x1200xf32>
    %9 = arith.truncf %8 : vector<200x1200xf32> to vector<200x1200xbf16>
    %c0_3 = arith.constant 0 : index
    %c0_4 = arith.constant 0 : index
    %10 = vector.load %arg1[%c0_3, %c0_4] : memref<1200x196xf32, #tpu.memory_space<vmem>>, vector<1200x196xf32>
    %11 = arith.truncf %10 : vector<1200x196xf32> to vector<1200x196xbf16>
    %cst_5 = arith.constant dense<0.000000e+00> : vector<200x196xf32>
    %12 = tpu.matmul %9, %11, %cst_5 {dimension_numbers = #tpu.dot_dimension_numbers<[1], [0], [0], [1], [0, 0, 1, 1], [], []>} : vector<200x1200xbf16>, vector<1200x196xbf16>, vector<200x196xf32> -> vector<200x196xf32>
    %c0_6 = arith.constant 0 : index
    %c0_7 = arith.constant 0 : index
    %13 = vector.load %arg3[%c0_6, %c0_7] : memref<200x196xf32, #tpu.memory_space<vmem>>, vector<200x196xf32>
    tpu.vector_store %arg3[%c0_6, %c0_7], %12 {strides = array<i32>} : memref<200x196xf32, #tpu.memory_space<vmem>>, vector<200x196xf32>,
    return
  }
}

</mosaic_0001>

<bundles_post_ra>
// kernel: tpu_custom_call.1
= control target key start
LH: loop header
LB: loop body
LE: loop exit
PB: predicated region body
PF: predicated region fallthrough
CT: control target
= control target key end

     0   :  { %s5646_s0 = inlined_call_operand.vmem [shape: f32[1,1200], index: 0, kind: input, shape index: {}]   ;;  %s5647_s1 = inlined_call_operand.vmem [shape: f32[1200,196], index: 1, kind: input, shape index: {}]   ;;  %s5648_s2 = inlined_call_operand.vmem [shape: f32[200,1200], index: 2, kind: input, shape index: {}]   ;;  %s5649_s3 = inlined_call_operand.hbm [shape: f32[200,196], index: 3, kind: output, shape index: {}]  }
   0x1   :  { %v736_v0 = vld [vmem:[%s5647_s1 + $0xe0] sm:$0xff]  ;;  %v738_v1 = vld [vmem:[%s5647_s1 + $0xf0] sm:$0xff] }
   0x2   :  { %v768_v2 = vld [vmem:[%s5647_s1 + $0x1e0] sm:$0xff]  ;;  %v1022_v3 = vpack.c.bf16 %v738_v1, %v736_v0  ;;  %v770_v4 = vld [vmem:[%s5647_s1 + $0x1f0] sm:$0xff] }
   0x3   :  { %v800_v5 = vld [vmem:[%s5647_s1 + $0x2e0] sm:$0xff]  ;;  %v802_v6 = vld [vmem:[%s5647_s1 + $0x2f0] sm:$0xff]  ;;  %v1038_v7 = vpack.c.bf16 %v770_v4, %v768_v2 }
   0x4   :  { %v1054_v8 = vpack.c.bf16 %v802_v6, %v800_v5  ;;  %v832_v9 = vld [vmem:[%s5647_s1 + $0x3e0] sm:$0xff]  ;;  %v834_v10 = vld [vmem:[%s5647_s1 + $0x3f0] sm:$0xff]  ;;  %1198 = vmatpush.bf16.msra.mxu0 %v1022_v3 }
   0x5   :  { %v732_v11 = vld [vmem:[%s5647_s1 + $0xc0] sm:$0xff]  ;;  %v1070_v12 = vpack.c.bf16 %v834_v10, %v832_v9  ;;  %v734_v13 = vld [vmem:[%s5647_s1 + $0xd0] sm:$0xff]  ;;  %1271 = vmatpush.bf16.msra.mxu1 %v1038_v7 }
   0x6   :  { %v764_v14 = vld [vmem:[%s5647_s1 + $0x1c0] sm:$0xff]  ;;  %v766_v15 = vld [vmem:[%s5647_s1 + $0x1d0] sm:$0xff]  ;;  %1344 = vmatpush.bf16.msra.mxu2 %v1054_v8  ;;  %v1020_v16 = vpack.c.bf16 %v734_v13, %v732_v11 }
   0x7   :  { %v1036_v17 = vpack.c.bf16 %v766_v15, %v764_v14  ;;  %v796_v18 = vld [vmem:[%s5647_s1 + $0x2c0] sm:$0xff]  ;;  %v798_v19 = vld [vmem:[%s5647_s1 + $0x2d0] sm:$0xff]  ;;  %1417 = vmatpush.bf16.msra.mxu3 %v1070_v12 }
   0x8   :  { %v828_v20 = vld [vmem:[%s5647_s1 + $0x3c0] sm:$0xff]  ;;  %v1052_v21 = vpack.c.bf16 %v798_v19, %v796_v18  ;;  %v830_v22 = vld [vmem:[%s5647_s1 + $0x3d0] sm:$0xff]  ;;  %1199 = vmatpush.bf16.msra.mxu0 %v1020_v16 }
   0x9   :  { %v728_v23 = vld [vmem:[%s5647_s1 + $0xa0] sm:$0xff]  ;;  %v730_v24 = vld [vmem:[%s5647_s1 + $0xb0] sm:$0xff]  ;;  %v1068_v25 = vpack.c.bf16 %v830_v22, %v828_v20  ;;  %1272 = vmatpush.bf16.msra.mxu1 %v1036_v17 }
   0xa   :  { %v760_v26 = vld [vmem:[%s5647_s1 + $0x1a0] sm:$0xff]  ;;  %v762_v27 = vld [vmem:[%s5647_s1 + $0x1b0] sm:$0xff]  ;;  %v1018_v29 = vpack.c.bf16 %v730_v24, %v728_v23  ;;  %1345 = vmatpush.bf16.msra.mxu2 %v1052_v21 }
   0xb   :  { %v792_v28 = vld [vmem:[%s5647_s1 + $0x2a0] sm:$0xff]  ;;  %v794_v30 = vld [vmem:[%s5647_s1 + $0x2b0] sm:$0xff]  ;;  %v1034_v33 = vpack.c.bf16 %v762_v27, %v760_v26  ;;  %1418 = vmatpush.bf16.msra.mxu3 %v1068_v25 }
   0xc   :  { %v824_v31 = vld [vmem:[%s5647_s1 + $0x3a0] sm:$0xff]  ;;  %v826_v32 = vld [vmem:[%s5647_s1 + $0x3b0] sm:$0xff]  ;;  %v1050_v34 = vpack.c.bf16 %v794_v30, %v792_v28  ;;  %1200 = vmatpush.bf16.msra.mxu0 %v1018_v29 }
   0xd   :  { %v724_v35 = vld [vmem:[%s5647_s1 + $0x80] sm:$0xff]  ;;  %v726_v36 = vld [vmem:[%s5647_s1 + $0x90] sm:$0xff]  ;;  %v1066_v38 = vpack.c.bf16 %v826_v32, %v824_v31  ;;  %1273 = vmatpush.bf16.msra.mxu1 %v1034_v33 }
   0xe   :  { %v756_v37 = vld [vmem:[%s5647_s1 + $0x180] sm:$0xff]  ;;  %v758_v39 = vld [vmem:[%s5647_s1 + $0x190] sm:$0xff]  ;;  %v1016_v44 = vpack.c.bf16 %v726_v36, %v724_v35  ;;  %1346 = vmatpush.bf16.msra.mxu2 %v1050_v34 }
   0xf   :  { %v788_v40 = vld [vmem:[%s5647_s1 + $0x280] sm:$0xff]  ;;  %v790_v41 = vld [vmem:[%s5647_s1 + $0x290] sm:$0xff]  ;;  %v1032_v45 = vpack.c.bf16 %v758_v39, %v756_v37  ;;  %1419 = vmatpush.bf16.msra.mxu3 %v1066_v38 }
  0x10   :  { %v820_v42 = vld [vmem:[%s5647_s1 + $0x380] sm:$0xff]  ;;  %v822_v43 = vld [vmem:[%s5647_s1 + $0x390] sm:$0xff]  ;;  %v1048_v46 = vpack.c.bf16 %v790_v41, %v788_v40  ;;  %1201 = vmatpush.bf16.msra.mxu0 %v1016_v44 }
  0x11   :  { %v720_v47 = vld [vmem:[%s5647_s1 + $0x60] sm:$0xff]  ;;  %v722_v48 = vld [vmem:[%s5647_s1 + $0x70] sm:$0xff]  ;;  %v1064_v50 = vpack.c.bf16 %v822_v43, %v820_v42  ;;  %1274 = vmatpush.bf16.msra.mxu1 %v1032_v45 }
  0x12   :  { %v752_v49 = vld [vmem:[%s5647_s1 + $0x160] sm:$0xff]  ;;  %v754_v51 = vld [vmem:[%s5647_s1 + $0x170] sm:$0xff]  ;;  %v1014_v56 = vpack.c.bf16 %v722_v48, %v720_v47  ;;  %1347 = vmatpush.bf16.msra.mxu2 %v1048_v46 }
  0x13   :  { %v784_v52 = vld [vmem:[%s5647_s1 + $0x260] sm:$0xff]  ;;  %v786_v53 = vld [vmem:[%s5647_s1 + $0x270] sm:$0xff]  ;;  %v1030_v57 = vpack.c.bf16 %v754_v51, %v752_v49  ;;  %1420 = vmatpush.bf16.msra.mxu3 %v1064_v50 }
  0x14   :  { %v816_v54 = vld [vmem:[%s5647_s1 + $0x360] sm:$0xff]  ;;  %v818_v55 = vld [vmem:[%s5647_s1 + $0x370] sm:$0xff]  ;;  %v1046_v58 = vpack.c.bf16 %v786_v53, %v784_v52  ;;  %1202 = vmatpush.bf16.msra.mxu0 %v1014_v56 }
  0x15   :  { %v716_v59 = vld [vmem:[%s5647_s1 + $0x40] sm:$0xff]  ;;  %v718_v60 = vld [vmem:[%s5647_s1 + $0x50] sm:$0xff]  ;;  %v1062_v62 = vpack.c.bf16 %v818_v55, %v816_v54  ;;  %1275 = vmatpush.bf16.msra.mxu1 %v1030_v57 }
  0x16   :  { %v748_v61 = vld [vmem:[%s5647_s1 + $0x140] sm:$0xff]  ;;  %v750_v63 = vld [vmem:[%s5647_s1 + $0x150] sm:$0xff]  ;;  %v1012_v4 = vpack.c.bf16 %v718_v60, %v716_v59  ;;  %1348 = vmatpush.bf16.msra.mxu2 %v1046_v58 }
  0x17   :  { %v780_v0 = vld [vmem:[%s5647_s1 + $0x240] sm:$0xff]  ;;  %v782_v1 = vld [vmem:[%s5647_s1 + $0x250] sm:$0xff]  ;;  %v1028_v6 = vpack.c.bf16 %v750_v63, %v748_v61  ;;  %1421 = vmatpush.bf16.msra.mxu3 %v1062_v62 }
  0x18   :  { %v812_v2 = vld [vmem:[%s5647_s1 + $0x340] sm:$0xff]  ;;  %v814_v3 = vld [vmem:[%s5647_s1 + $0x350] sm:$0xff]  ;;  %v1044_v7 = vpack.c.bf16 %v782_v1, %v780_v0  ;;  %1203 = vmatpush.bf16.msra.mxu0 %v1012_v4 }
  0x19   :  { %v712_v5 = vld [vmem:[%s5647_s1 + $0x20] sm:$0xff]  ;;  %v714_v8 = vld [vmem:[%s5647_s1 + $0x30] sm:$0xff]  ;;  %v1060_v11 = vpack.c.bf16 %v814_v3, %v812_v2  ;;  %1276 = vmatpush.bf16.msra.mxu1 %v1028_v6 }
  0x1a   :  { %v744_v9 = vld [vmem:[%s5647_s1 + $0x120] sm:$0xff]  ;;  %v746_v10 = vld [vmem:[%s5647_s1 + $0x130] sm:$0xff]  ;;  %v1010_v18 = vpack.c.bf16 %v714_v8, %v712_v5  ;;  %1349 = vmatpush.bf16.msra.mxu2 %v1044_v7 }
  0x1b   :  { %v776_v12 = vld [vmem:[%s5647_s1 + $0x220] sm:$0xff]  ;;  %v778_v13 = vld [vmem:[%s5647_s1 + $0x230] sm:$0xff]  ;;  %v1026_v22 = vpack.c.bf16 %v746_v10, %v744_v9 }
  0x1c   :  { %v16_v14 = vld [vmem:[%s5646_s0] sm:$0xff]  ;;  %v810_v16 = vld [vmem:[%s5647_s1 + $0x330] sm:$0xff]  ;;  %v1042_v23 = vpack.c.bf16 %v778_v13, %v776_v12 }
  0x1d   :  { %v808_v15 = vld [vmem:[%s5647_s1 + $0x320] sm:$0xff]  ;;  %v2727_v17 = vmul.f32 -1.442695, %v16_v14  ;;  %v710_v20 = vld [vmem:[%s5647_s1 + $0x10] sm:$0xff] }
  0x1e   :  { %v708_v19 = vld [vmem:[%s5647_s1] sm:$0xff]  ;;  %v742_v24 = vld [vmem:[%s5647_s1 + $0x110] sm:$0xff] }
  0x1f   :  { %v740_v21 = vld [vmem:[%s5647_s1 + $0x100] sm:$0xff]  ;;  %2758 = vpow2.f32 %v2727_v17 }
  0x20   :  { %v772_v25 = vld [vmem:[%s5647_s1 + $0x200] sm:$0xff] }
  0x21   :  { %8 = vsyncpa [#allocation3], 0  ;;  %1422 = vmatpush.bf16.msra.mxu3 %v1060_v11  ;;  %v1058_v26 = vpack.c.bf16 %v810_v16, %v808_v15  ;;  %v774_v27 = vld [vmem:[%s5647_s1 + $0x210] sm:$0xff]  ;;  %v804_v28 = vld [vmem:[%s5647_s1 + $0x300] sm:$0xff]  ;;  %1204 = vmatpush.bf16.msra.mxu0 %v1010_v18  ;;  %v1008_v33 = vpack.c.bf16 %v710_v20, %v708_v19  ;;  %v1024_v37 = vpack.c.bf16 %v742_v24, %v740_v21  ;;  %vm1158_vm8 = vcmask 392192   ;;  %s2715_s21 = sshll.u32 %s5649_s3, 4  ;;  %s2716_s21 = int_to_ptr.hbm [resolvable:$true] %s2715_s21 }
  0x22   :  { %v806_v29 = vld [vmem:[%s5647_s1 + $0x310] sm:$0xff]  ;;  %v928_v30 = vld [vmem:[%s5647_s1 + $0x6e0] sm:$0xff]  ;;  %1277 = vmatpush.bf16.msra.mxu1 %v1026_v22  ;;  %1350 = vmatpush.bf16.msra.mxu2 %v1042_v23  ;;  %v1040_v38 = vpack.c.bf16 %v774_v27, %v772_v25  ;;  %v57_v4 = vld [vmem:[%s5648_s2 + $0x8] sm:$0xff]  ;;  %vm2659_vm9 = vcmask 556032   ;;  %s2793_s22 = smov 256   ;;  %s2794_s23 = smov 16  }
  0x23   :  { %v930_v31 = vld [vmem:[%s5647_s1 + $0x6f0] sm:$0xff]  ;;  %v960_v32 = vld [vmem:[%s5647_s1 + $0x7e0] sm:$0xff]  ;;  %v1056_v41 = vpack.c.bf16 %v806_v29, %v804_v28  ;;  %v67_v6 = vld [vmem:[%s5648_s2 + $0x58] sm:$0xff] }
  0x24   :  { %v962_v34 = vld [vmem:[%s5647_s1 + $0x7f0] sm:$0xff]  ;;  %v864_v35 = vld [vmem:[%s5647_s1 + $0x4e0] sm:$0xff]  ;;  %v1118_v42 = vpack.c.bf16 %v930_v31, %v928_v30  ;;  %v59_v12 = vld [vmem:[%s5648_s2 + $0x18] sm:$0xff] }
  0x25   :  { %v866_v36 = vld [vmem:[%s5647_s1 + $0x4f0] sm:$0xff]  ;;  %v896_v39 = vld [vmem:[%s5647_s1 + $0x5e0] sm:$0xff]  ;;  %1423 = vmatpush.bf16.msra.mxu3 %v1058_v26  ;;  %v2759_v43 = vpop.eup %2758  ;;  %v1134_v44 = vpack.c.bf16 %v962_v34, %v960_v32  ;;  %1205 = vmatpush.bf16.msra.mxu0 %v1008_v33  ;;  %v69_v13 = vld [vmem:[%s5648_s2 + $0x68] sm:$0xff] }
  0x26   :  { %v898_v40 = vld [vmem:[%s5647_s1 + $0x5f0] sm:$0xff]  ;;  %v1086_v45 = vpack.c.bf16 %v866_v36, %v864_v35  ;;  %v24_v46 = vadd.f32 1.0, %v2759_v43  ;;  %1278 = vmatpush.bf16.msra.mxu1 %v1024_v37  ;;  %1351 = vmatpush.bf16.msra.mxu2 %v1040_v38  ;;  %v924_v51 = vld [vmem:[%s5647_s1 + $0x6c0] sm:$0xff]  ;;  %v77_v32 = vld [vmem:[%s5648_s2 + $0xa8] sm:$0xff] }
  0x27   :  { %v1102_v47 = vpack.c.bf16 %v898_v40, %v896_v39  ;;  %v926_v52 = vld [vmem:[%s5647_s1 + $0x6d0] sm:$0xff]  ;;  %v956_v56 = vld [vmem:[%s5647_s1 + $0x7c0] sm:$0xff]  ;;  %v87_v33 = vld [vmem:[%s5648_s2 + $0xf8] sm:$0xff] }
  0x28   :  { %2760 = vrcp.f32 %v24_v46  ;;  %vm31_vm0 = vweird.f32 %v24_v46  ;;  %v37_v50 = vand.u32 2147483648, %v24_v46  ;;  %v35_v54 = vand.u32 2147483647, %v24_v46  ;;  %v958_v57 = vld [vmem:[%s5647_s1 + $0x7d0] sm:$0xff]  ;;  %v860_v58 = vld [vmem:[%s5647_s1 + $0x4c0] sm:$0xff]  ;;  %v79_v36 = vld [vmem:[%s5648_s2 + $0xb8] sm:$0xff] }
  0x29   :  { %1424 = vmatpush.bf16.msra.mxu3 %v1056_v41  ;;  %1490 = vmatpush.bf16.msrb.mxu0 %v1086_v45  ;;  %v1116_v55 = vpack.c.bf16 %v926_v52, %v924_v51  ;;  %v1132_v59 = vpack.c.bf16 %v958_v57, %v956_v56  ;;  %v862_v60 = vld [vmem:[%s5647_s1 + $0x4d0] sm:$0xff]  ;;  %v56_v2 = vld [vmem:[%s5648_s2] sm:$0xff]  ;;  %v89_v37 = vld [vmem:[%s5648_s2 + $0x108] sm:$0xff] }
  0x2a   :  { %1636 = vmatpush.bf16.msrb.mxu2 %v1118_v42  ;;  %1563 = vmatpush.bf16.msrb.mxu1 %v1102_v47  ;;  %v1084_v62 = vpack.c.bf16 %v862_v60, %v860_v58  ;;  %v38_v63 = vor.u32 1.1754944e-38, %v37_v50  ;;  %vm36_vm3 = vcmp.eq.f32.partialorder %v35_v54, 8.507059e+37  ;;  %v66_v3 = vld [vmem:[%s5648_s2 + $0x50] sm:$0xff]  ;;  %v68_v8 = vld [vmem:[%s5648_s2 + $0x60] sm:$0xff] }
  0x2b   :  { %v58_v7 = vld [vmem:[%s5648_s2 + $0x10] sm:$0xff]  ;;  %v892_v27 = vld [vmem:[%s5647_s1 + $0x5c0] sm:$0xff] }
  0x2c   :  { %v894_v28 = vld [vmem:[%s5647_s1 + $0x5d0] sm:$0xff]  ;;  %v76_v29 = vld [vmem:[%s5648_s2 + $0xa0] sm:$0xff] }
  0x2d   :  { %1709 = vmatpush.bf16.msrb.mxu3 %v1134_v44  ;;  %1491 = vmatpush.bf16.msrb.mxu0 %v1084_v62  ;;  %v86_v30 = vld [vmem:[%s5648_s2 + $0xf0] sm:$0xff]  ;;  %v1100_v31 = vpack.c.bf16 %v894_v28, %v892_v27  ;;  %v88_v35 = vld [vmem:[%s5648_s2 + $0x100] sm:$0xff] }
  0x2e   :  { %v2761_v48 = vpop.eup %2760  ;;  %1637 = vmatpush.bf16.msrb.mxu2 %v1116_v55  ;;  %v78_v34 = vld [vmem:[%s5648_s2 + $0xb0] sm:$0xff]  ;;  %v920_v50 = vld [vmem:[%s5647_s1 + $0x6a0] sm:$0xff] }
  0x2f   :  { %v27_v49 = vmul.f32 %v2761_v48, %v24_v46  ;;  %vm32_vm1 = vweird.f32 %v2761_v48  ;;  %1564 = vmatpush.bf16.msrb.mxu1 %v1100_v31  ;;  %v922_v51 = vld [vmem:[%s5647_s1 + $0x6b0] sm:$0xff]  ;;  %v952_v52 = vld [vmem:[%s5647_s1 + $0x7a0] sm:$0xff] }
  0x30   :  { %vm33_vm2 = vmor %vm31_vm0, %vm32_vm1  ;;  %v954_v54 = vld [vmem:[%s5647_s1 + $0x7b0] sm:$0xff]  ;;  %v856_v55 = vld [vmem:[%s5647_s1 + $0x4a0] sm:$0xff] }
  0x31   :  { %v28_v53 = vsub.f32 1.0, %v27_v49  ;;  %1710 = vmatpush.bf16.msrb.mxu3 %v1132_v59  ;;  %v858_v56 = vld [vmem:[%s5647_s1 + $0x4b0] sm:$0xff]  ;;  %v1130_v57 = vpack.c.bf16 %v954_v54, %v952_v52  ;;  %v888_v59 = vld [vmem:[%s5647_s1 + $0x5a0] sm:$0xff] }
  0x32   :  { %v1082_v58 = vpack.c.bf16 %v858_v56, %v856_v55  ;;  %v890_v60 = vld [vmem:[%s5647_s1 + $0x5b0] sm:$0xff]  ;;  %v916_v27 = vld [vmem:[%s5647_s1 + $0x680] sm:$0xff] }
  0x33   :  { %v29_v61 = vmul.f32 %v2761_v48, %v28_v53  ;;  %v1114_v53 = vpack.c.bf16 %v922_v51, %v920_v50  ;;  %v106_v62 = vld [vmem:[%s5648_s2 + $0x190] sm:$0xff] }
  0x34   :  { %1492 = vmatpush.bf16.msrb.mxu0 %v1082_v58  ;;  %v918_v28 = vld [vmem:[%s5647_s1 + $0x690] sm:$0xff] }
  0x35   :  { %v30_v0 = vadd.f32 %v2761_v48, %v29_v61  ;;  %v96_v61 = vld [vmem:[%s5648_s2 + $0x140] sm:$0xff]  ;;  %1638 = vmatpush.bf16.msrb.mxu2 %v1114_v53  ;;  %1711 = vmatpush.bf16.msrb.mxu3 %v1130_v57  ;;  %v950_v31 = vld [vmem:[%s5647_s1 + $0x790] sm:$0xff] }
  0x36   :  { %v852_v57 = vld [vmem:[%s5647_s1 + $0x480] sm:$0xff]  ;;  %v854_v58 = vld [vmem:[%s5647_s1 + $0x490] sm:$0xff] }
  0x37   :  { %v34_v1 = vsel %vm33_vm2, %v2761_v48, %v30_v0  ;;  %v97_v0 = vld [vmem:[%s5648_s2 + $0x148] sm:$0xff] }
  0x38   :  { %v3062_v5 = vsel %vm36_vm3, %v38_v63, %v34_v1  ;;  %v1098_v63 = vpack.c.bf16 %v890_v60, %v888_v59  ;;  %v107_v1 = vld [vmem:[%s5648_s2 + $0x198] sm:$0xff]  ;;  %v884_v59 = vld [vmem:[%s5647_s1 + $0x580] sm:$0xff]  ;;  %v1080_v60 = vpack.c.bf16 %v854_v58, %v852_v57 }
  0x39   :  { %v3074_v9 = vperm.slane %v3062_v5, 0  ;;  %v3077_v10 = vperm.slane %v3062_v5, 1  ;;  %v3080_v11 = vperm.slane %v3062_v5, 2  ;;  %v3089_v14 = vperm.slane %v3062_v5, 3  ;;  %v168_v57 = vld [vmem:[%s5648_s2 + $0x380] sm:$0xff]  ;;  %v159_v58 = vld [vmem:[%s5648_s2 + $0x338] sm:$0xff] }
  0x3a   :  { %1565 = vmatpush.bf16.msrb.mxu1 %v1098_v63  ;;  %v136_v63 = vld [vmem:[%s5648_s2 + $0x280] sm:$0xff]  ;;  %1493 = vmatpush.bf16.msrb.mxu0 %v1080_v60 }
  0x3b   :  { %v328_v15 = vmul.f32 %v3074_v9, %v56_v2  ;;  %v338_v16 = vmul.f32 %v3074_v9, %v66_v3  ;;  %v329_v17 = vmul.f32 %v3077_v10, %v57_v4  ;;  %v339_v18 = vmul.f32 %v3077_v10, %v67_v6  ;;  %v98_v2 = vld [vmem:[%s5648_s2 + $0x150] sm:$0xff]  ;;  %v108_v3 = vld [vmem:[%s5648_s2 + $0x1a0] sm:$0xff]  ;;  %v99_v4 = vld [vmem:[%s5648_s2 + $0x158] sm:$0xff] }
  0x3c   :  { %v330_v19 = vmul.f32 %v3080_v11, %v58_v7  ;;  %v340_v20 = vmul.f32 %v3080_v11, %v68_v8  ;;  %v331_v21 = vmul.f32 %v3089_v14, %v59_v12  ;;  %v341_v22 = vmul.f32 %v3089_v14, %v69_v13  ;;  %v109_v6 = vld [vmem:[%s5648_s2 + $0x1a8] sm:$0xff] }
  0x3d   :  { %v3099_v23 = vpack.c.bf16 %v338_v16, %v328_v15  ;;  %v3101_v24 = vpack.c.bf16 %v339_v18, %v329_v17  ;;  %v348_v38 = vmul.f32 %v3074_v9, %v76_v29  ;;  %v358_v39 = vmul.f32 %v3074_v9, %v86_v30  ;;  %v948_v29 = vld [vmem:[%s5647_s1 + $0x780] sm:$0xff] }
  0x3e   :  { %v3103_v25 = vpack.c.bf16 %v340_v20, %v330_v19  ;;  %v3105_v26 = vpack.c.bf16 %v341_v22, %v331_v21  ;;  %v349_v40 = vmul.f32 %v3077_v10, %v77_v32  ;;  %v359_v41 = vmul.f32 %v3077_v10, %v87_v33  ;;  %v116_v33 = vld [vmem:[%s5648_s2 + $0x1e0] sm:$0xff] }
  0x3f   :  { %1206 = vmatmul.bf16.vlgmr.msra.gmra.mxu0 %v3099_v23  ;;  %1279 = vmatmul.bf16.vlgmr.msra.gmra.mxu1 %v3101_v24  ;;  %v350_v42 = vmul.f32 %v3080_v11, %v78_v34  ;;  %v360_v43 = vmul.f32 %v3080_v11, %v88_v35  ;;  %v351_v44 = vmul.f32 %v3089_v14, %v79_v36  ;;  %v126_v34 = vld [vmem:[%s5648_s2 + $0x230] sm:$0xff]  ;;  %v117_v35 = vld [vmem:[%s5648_s2 + $0x1e8] sm:$0xff]  ;;  %v127_v36 = vld [vmem:[%s5648_s2 + $0x238] sm:$0xff] }
  0x40   :  { %5747 = vst [vmem:[#allocation5_spill] sm:$0xff] %v3103_v25  ;;  %1352 = vmatmul.bf16.vlgmr.msra.gmra.mxu2 %v3103_v25  ;;  %1425 = vmatmul.bf16.vlgmr.msra.gmra.mxu3 %v3105_v26  ;;  %v361_v45 = vmul.f32 %v3089_v14, %v89_v37  ;;  %v3149_v46 = vpack.c.bf16 %v358_v39, %v348_v38  ;;  %v118_v37 = vld [vmem:[%s5648_s2 + $0x1f0] sm:$0xff]  ;;  %v128_v38 = vld [vmem:[%s5648_s2 + $0x240] sm:$0xff]  ;;  %v119_v39 = vld [vmem:[%s5648_s2 + $0x1f8] sm:$0xff] }
  0x41   :  { %5748 = vst [vmem:[#allocation6_spill] sm:$0xff] %v3105_v26  ;;  %v3151_v47 = vpack.c.bf16 %v359_v41, %v349_v40  ;;  %v3153_v48 = vpack.c.bf16 %v360_v43, %v350_v42  ;;  %v368_v7 = vmul.f32 %v3074_v9, %v96_v61  ;;  %v378_v8 = vmul.f32 %v3074_v9, %v106_v62  ;;  %v129_v40 = vld [vmem:[%s5648_s2 + $0x248] sm:$0xff]  ;;  %v886_v61 = vld [vmem:[%s5647_s1 + $0x590] sm:$0xff] }
  0x42   :  { %v3155_v49 = vpack.c.bf16 %v361_v45, %v351_v44  ;;  %v369_v12 = vmul.f32 %v3077_v10, %v97_v0  ;;  %v379_v13 = vmul.f32 %v3077_v10, %v107_v1  ;;  %v370_v15 = vmul.f32 %v3080_v11, %v98_v2  ;;  %v146_v0 = vld [vmem:[%s5648_s2 + $0x2d0] sm:$0xff]  ;;  %v137_v1 = vld [vmem:[%s5648_s2 + $0x288] sm:$0xff]  ;;  %v147_v2 = vld [vmem:[%s5648_s2 + $0x2d8] sm:$0xff] }
  0x43   :  { %5749 = vst [vmem:[#allocation7_spill] sm:$0xff] %v3153_v48  ;;  %v380_v16 = vmul.f32 %v3080_v11, %v108_v3  ;;  %v371_v17 = vmul.f32 %v3089_v14, %v99_v4  ;;  %v381_v18 = vmul.f32 %v3089_v14, %v109_v6  ;;  %v3217_v19 = vpack.c.bf16 %v378_v8, %v368_v7  ;;  %v138_v3 = vld [vmem:[%s5648_s2 + $0x290] sm:$0xff]  ;;  %v148_v4 = vld [vmem:[%s5648_s2 + $0x2e0] sm:$0xff]  ;;  %v139_v6 = vld [vmem:[%s5648_s2 + $0x298] sm:$0xff] }
  0x44   :  { %5750 = vst [vmem:[#allocation8_spill] sm:$0xff] %v3155_v49  ;;  %v3219_v20 = vpack.c.bf16 %v379_v13, %v369_v12  ;;  %v1112_v30 = vpack.c.bf16 %v918_v28, %v916_v27  ;;  %v1128_v32 = vpack.c.bf16 %v950_v31, %v948_v29  ;;  %v388_v41 = vmul.f32 %v3074_v9, %v116_v33  ;;  %v149_v7 = vld [vmem:[%s5648_s2 + $0x2e8] sm:$0xff]  ;;  %v914_v33 = vld [vmem:[%s5647_s1 + $0x670] sm:$0xff] }
  0x45   :  { %v3221_v21 = vpack.c.bf16 %v380_v16, %v370_v15  ;;  %v3223_v22 = vpack.c.bf16 %v381_v18, %v371_v17  ;;  %v398_v42 = vmul.f32 %v3074_v9, %v126_v34  ;;  %v389_v43 = vmul.f32 %v3077_v10, %v117_v35  ;;  %v944_v34 = vld [vmem:[%s5647_s1 + $0x760] sm:$0xff] }
  0x46   :  { %1639 = vmatpush.bf16.msrb.mxu2 %v1112_v30  ;;  %1712 = vmatpush.bf16.msrb.mxu3 %v1128_v32  ;;  %v399_v44 = vmul.f32 %v3077_v10, %v127_v36  ;;  %v390_v45 = vmul.f32 %v3080_v11, %v118_v37  ;;  %v400_v50 = vmul.f32 %v3080_v11, %v128_v38  ;;  %v912_v32 = vld [vmem:[%s5647_s1 + $0x660] sm:$0xff]  ;;  %v946_v36 = vld [vmem:[%s5647_s1 + $0x770] sm:$0xff] }
  0x47   :  { %5751 = vst [vmem:[#allocation9_spill] sm:$0xff] %v3221_v21  ;;  %v391_v51 = vmul.f32 %v3089_v14, %v119_v39  ;;  %v401_v52 = vmul.f32 %v3089_v14, %v129_v40  ;;  %v3273_v53 = vpack.c.bf16 %v398_v42, %v388_v41  ;;  %v1096_v62 = vpack.c.bf16 %v886_v61, %v884_v59  ;;  %v848_v37 = vld [vmem:[%s5647_s1 + $0x460] sm:$0xff]  ;;  %v850_v38 = vld [vmem:[%s5647_s1 + $0x470] sm:$0xff]  ;;  %v169_v59 = vld [vmem:[%s5648_s2 + $0x388] sm:$0xff] }
  0x48   :  { %5752 = vst [vmem:[#allocation10_spill] sm:$0xff] %v3223_v22  ;;  %v3275_v54 = vpack.c.bf16 %v399_v44, %v389_v43  ;;  %v3277_v55 = vpack.c.bf16 %v400_v50, %v390_v45  ;;  %v408_v8 = vmul.f32 %v3074_v9, %v136_v63  ;;  %v418_v12 = vmul.f32 %v3074_v9, %v146_v0  ;;  %v880_v41 = vld [vmem:[%s5647_s1 + $0x560] sm:$0xff]  ;;  %v882_v42 = vld [vmem:[%s5647_s1 + $0x570] sm:$0xff]  ;;  %v157_v50 = vld [vmem:[%s5648_s2 + $0x328] sm:$0xff] }
  0x49   :  { %v3279_v56 = vpack.c.bf16 %v401_v52, %v391_v51  ;;  %1566 = vmatpush.bf16.msrb.mxu1 %v1096_v62  ;;  %v409_v13 = vmul.f32 %v3077_v10, %v137_v1  ;;  %v419_v15 = vmul.f32 %v3077_v10, %v147_v2  ;;  %v410_v16 = vmul.f32 %v3080_v11, %v138_v3  ;;  %v156_v43 = vld [vmem:[%s5648_s2 + $0x320] sm:$0xff]  ;;  %v166_v44 = vld [vmem:[%s5648_s2 + $0x370] sm:$0xff]  ;;  %v167_v51 = vld [vmem:[%s5648_s2 + $0x378] sm:$0xff] }
  0x4a   :  { %5753 = vst [vmem:[#allocation11_spill] sm:$0xff] %v3277_v55  ;;  %v420_v17 = vmul.f32 %v3080_v11, %v148_v4  ;;  %v411_v18 = vmul.f32 %v3089_v14, %v139_v6  ;;  %v421_v27 = vmul.f32 %v3089_v14, %v149_v7  ;;  %v3329_v28 = vpack.c.bf16 %v418_v12, %v408_v8  ;;  %v158_v52 = vld [vmem:[%s5648_s2 + $0x330] sm:$0xff]  ;;  %v176_v12 = vld [vmem:[%s5648_s2 + $0x3c0] sm:$0xff] }
  0x4b   :  { %5754 = vst [vmem:[#allocation12_spill] sm:$0xff] %v3279_v56  ;;  %v3331_v29 = vpack.c.bf16 %v419_v15, %v409_v13  ;;  %v1110_v35 = vpack.c.bf16 %v914_v33, %v912_v32  ;;  %v1126_v39 = vpack.c.bf16 %v946_v36, %v944_v34  ;;  %v1078_v40 = vpack.c.bf16 %v850_v38, %v848_v37  ;;  %v186_v13 = vld [vmem:[%s5648_s2 + $0x410] sm:$0xff]  ;;  %v177_v15 = vld [vmem:[%s5648_s2 + $0x3c8] sm:$0xff] }
  0x4c   :  { %v3333_v30 = vpack.c.bf16 %v420_v17, %v410_v16  ;;  %v3335_v31 = vpack.c.bf16 %v421_v27, %v411_v18  ;;  %v1094_v45 = vpack.c.bf16 %v882_v42, %v880_v41  ;;  %v428_v60 = vmul.f32 %v3074_v9, %v156_v43  ;;  %v187_v16 = vld [vmem:[%s5648_s2 + $0x418] sm:$0xff]  ;;  %v178_v17 = vld [vmem:[%s5648_s2 + $0x3d0] sm:$0xff]  ;;  %v188_v18 = vld [vmem:[%s5648_s2 + $0x420] sm:$0xff] }
  0x4d   :  { %1640 = vmatpush.bf16.msrb.mxu2 %v1110_v35  ;;  %1713 = vmatpush.bf16.msrb.mxu3 %v1126_v39  ;;  %v438_v61 = vmul.f32 %v3074_v9, %v166_v44  ;;  %v429_v62 = vmul.f32 %v3077_v10, %v157_v50  ;;  %v439_v63 = vmul.f32 %v3077_v10, %v167_v51  ;;  %v179_v27 = vld [vmem:[%s5648_s2 + $0x3d8] sm:$0xff]  ;;  %v189_v32 = vld [vmem:[%s5648_s2 + $0x428] sm:$0xff]  ;;  %v910_v50 = vld [vmem:[%s5647_s1 + $0x650] sm:$0xff] }
  0x4e   :  { %5755 = vst [vmem:[#allocation13_spill] sm:$0xff] %v3333_v30  ;;  %1494 = vmatpush.bf16.msrb.mxu0 %v1078_v40  ;;  %1567 = vmatpush.bf16.msrb.mxu1 %v1094_v45  ;;  %v430_v0 = vmul.f32 %v3080_v11, %v158_v52  ;;  %v440_v1 = vmul.f32 %v3080_v11, %v168_v57  ;;  %v908_v45 = vld [vmem:[%s5647_s1 + $0x640] sm:$0xff]  ;;  %v942_v57 = vld [vmem:[%s5647_s1 + $0x750] sm:$0xff] }
  0x4f   :  { %1211 = vmatmul.bf16.gmra.mxu0 %v3149_v46  ;;  %1284 = vmatmul.bf16.gmra.mxu1 %v3151_v47  ;;  %5756 = vst [vmem:[#allocation14_spill] sm:$0xff] %v3335_v31  ;;  %v431_v2 = vmul.f32 %v3089_v14, %v159_v58  ;;  %v441_v3 = vmul.f32 %v3089_v14, %v169_v59  ;;  %v940_v51 = vld [vmem:[%s5647_s1 + $0x740] sm:$0xff] }
  0x50   :  { %1357 = vmatmul.bf16.gmra.mxu2 %v3153_v48  ;;  %1430 = vmatmul.bf16.gmra.mxu3 %v3155_v49  ;;  %v3397_v4 = vpack.c.bf16 %v438_v61, %v428_v60  ;;  %v3399_v6 = vpack.c.bf16 %v439_v63, %v429_v62  ;;  %v3401_v7 = vpack.c.bf16 %v440_v1, %v430_v0  ;;  %v196_v59 = vld [vmem:[%s5648_s2 + $0x460] sm:$0xff]  ;;  %v206_v60 = vld [vmem:[%s5648_s2 + $0x4b0] sm:$0xff]  ;;  %v197_v61 = vld [vmem:[%s5648_s2 + $0x468] sm:$0xff] }
  0x51   :  { %v3403_v8 = vpack.c.bf16 %v441_v3, %v431_v2  ;;  %v448_v33 = vmul.f32 %v3074_v9, %v176_v12  ;;  %v458_v34 = vmul.f32 %v3074_v9, %v186_v13  ;;  %v449_v35 = vmul.f32 %v3077_v10, %v177_v15  ;;  %v207_v62 = vld [vmem:[%s5648_s2 + $0x4b8] sm:$0xff]  ;;  %v198_v63 = vld [vmem:[%s5648_s2 + $0x470] sm:$0xff]  ;;  %v208_v0 = vld [vmem:[%s5648_s2 + $0x4c0] sm:$0xff] }
  0x52   :  { %5757 = vst [vmem:[#allocation15_spill] sm:$0xff] %v3401_v7  ;;  %v459_v36 = vmul.f32 %v3077_v10, %v187_v16  ;;  %v450_v37 = vmul.f32 %v3080_v11, %v178_v17  ;;  %v460_v38 = vmul.f32 %v3080_v11, %v188_v18  ;;  %v451_v39 = vmul.f32 %v3089_v14, %v179_v27  ;;  %v199_v1 = vld [vmem:[%s5648_s2 + $0x478] sm:$0xff]  ;;  %v209_v2 = vld [vmem:[%s5648_s2 + $0x4c8] sm:$0xff]  ;;  %v844_v13 = vld [vmem:[%s5647_s1 + $0x440] sm:$0xff] }
  0x53   :  { %5758 = vst [vmem:[#allocation16_spill] sm:$0xff] %v3403_v8  ;;  %v461_v40 = vmul.f32 %v3089_v14, %v189_v32  ;;  %v3441_v41 = vpack.c.bf16 %v458_v34, %v448_v33  ;;  %v1108_v52 = vpack.c.bf16 %v910_v50, %v908_v45  ;;  %v1124_v58 = vpack.c.bf16 %v942_v57, %v940_v51  ;;  %v846_v15 = vld [vmem:[%s5647_s1 + $0x450] sm:$0xff]  ;;  %v876_v16 = vld [vmem:[%s5647_s1 + $0x540] sm:$0xff]  ;;  %v227_v57 = vld [vmem:[%s5648_s2 + $0x558] sm:$0xff] }
  0x54   :  { %v3443_v42 = vpack.c.bf16 %v459_v36, %v449_v35  ;;  %v3445_v43 = vpack.c.bf16 %v460_v38, %v450_v37  ;;  %v468_v3 = vmul.f32 %v3074_v9, %v196_v59  ;;  %v478_v12 = vmul.f32 %v3074_v9, %v206_v60  ;;  %v878_v33 = vld [vmem:[%s5647_s1 + $0x550] sm:$0xff]  ;;  %v216_v50 = vld [vmem:[%s5648_s2 + $0x500] sm:$0xff]  ;;  %v219_v60 = vld [vmem:[%s5648_s2 + $0x518] sm:$0xff] }
  0x55   :  { %5759 = vst [vmem:[#allocation17_spill] sm:$0xff] %v3441_v41  ;;  %v3447_v44 = vpack.c.bf16 %v461_v40, %v451_v39  ;;  %1641 = vmatpush.bf16.msrb.mxu2 %v1108_v52  ;;  %1714 = vmatpush.bf16.msrb.mxu3 %v1124_v58  ;;  %v469_v17 = vmul.f32 %v3077_v10, %v197_v61  ;;  %v226_v51 = vld [vmem:[%s5648_s2 + $0x550] sm:$0xff]  ;;  %v217_v52 = vld [vmem:[%s5648_s2 + $0x508] sm:$0xff]  ;;  %v228_v59 = vld [vmem:[%s5648_s2 + $0x560] sm:$0xff] }
  0x56   :  { %5760 = vst [vmem:[#allocation18_spill] sm:$0xff] %v3443_v42  ;;  %v479_v18 = vmul.f32 %v3077_v10, %v207_v62  ;;  %v470_v27 = vmul.f32 %v3080_v11, %v198_v63  ;;  %v1076_v32 = vpack.c.bf16 %v846_v15, %v844_v13  ;;  %v480_v34 = vmul.f32 %v3080_v11, %v208_v0  ;;  %v218_v58 = vld [vmem:[%s5648_s2 + $0x510] sm:$0xff]  ;;  %v229_v61 = vld [vmem:[%s5648_s2 + $0x568] sm:$0xff] }
  0x57   :  { %5761 = vst [vmem:[#allocation19_spill] sm:$0xff] %v3445_v43  ;;  %v471_v35 = vmul.f32 %v3089_v14, %v199_v1  ;;  %v481_v36 = vmul.f32 %v3089_v14, %v209_v2  ;;  %v1092_v37 = vpack.c.bf16 %v878_v33, %v876_v16  ;;  %v3509_v38 = vpack.c.bf16 %v478_v12, %v468_v3 }
  0x58   :  { %5762 = vst [vmem:[#allocation20_spill] sm:$0xff] %v3447_v44  ;;  %1495 = vmatpush.bf16.msrb.mxu0 %v1076_v32  ;;  %v3511_v39 = vpack.c.bf16 %v479_v18, %v469_v17  ;;  %v3513_v40 = vpack.c.bf16 %v480_v34, %v470_v27  ;;  %v488_v62 = vmul.f32 %v3074_v9, %v216_v50  ;;  %v904_v34 = vld [vmem:[%s5647_s1 + $0x620] sm:$0xff]  ;;  %v938_v50 = vld [vmem:[%s5647_s1 + $0x730] sm:$0xff] }
  0x59   :  { %1568 = vmatpush.bf16.msrb.mxu1 %v1092_v37  ;;  %5763 = vst [vmem:[#allocation21_spill] sm:$0xff] %v3509_v38  ;;  %v3515_v45 = vpack.c.bf16 %v481_v36, %v471_v35  ;;  %v498_v63 = vmul.f32 %v3074_v9, %v226_v51  ;;  %v489_v0 = vmul.f32 %v3077_v10, %v217_v52  ;;  %v906_v35 = vld [vmem:[%s5647_s1 + $0x630] sm:$0xff]  ;;  %v936_v36 = vld [vmem:[%s5647_s1 + $0x720] sm:$0xff] }
  0x5a   :  { %5764 = vst [vmem:[#allocation22_spill] sm:$0xff] %v3511_v39  ;;  %v499_v1 = vmul.f32 %v3077_v10, %v227_v57  ;;  %v490_v2 = vmul.f32 %v3080_v11, %v218_v58  ;;  %v500_v3 = vmul.f32 %v3080_v11, %v228_v59  ;;  %v491_v12 = vmul.f32 %v3089_v14, %v219_v60  ;;  %v840_v52 = vld [vmem:[%s5647_s1 + $0x420] sm:$0xff]  ;;  %v842_v57 = vld [vmem:[%s5647_s1 + $0x430] sm:$0xff] }
  0x5b   :  { %5765 = vst [vmem:[#allocation23_spill] sm:$0xff] %v3513_v40  ;;  %v501_v13 = vmul.f32 %v3089_v14, %v229_v61  ;;  %v3553_v15 = vpack.c.bf16 %v498_v63, %v488_v62  ;;  %v1106_v37 = vpack.c.bf16 %v906_v35, %v904_v34  ;;  %v1122_v51 = vpack.c.bf16 %v938_v50, %v936_v36  ;;  %v872_v58 = vld [vmem:[%s5647_s1 + $0x520] sm:$0xff]  ;;  %v874_v60 = vld [vmem:[%s5647_s1 + $0x530] sm:$0xff]  ;;  %v239_v35 = vld [vmem:[%s5648_s2 + $0x5b8] sm:$0xff] }
  0x5c   :  { %5766 = vst [vmem:[#allocation24_spill] sm:$0xff] %v3515_v45  ;;  %v3555_v16 = vpack.c.bf16 %v499_v1, %v489_v0  ;;  %v3557_v27 = vpack.c.bf16 %v500_v3, %v490_v2  ;;  %v1074_v59 = vpack.c.bf16 %v842_v57, %v840_v52  ;;  %v1090_v61 = vpack.c.bf16 %v874_v60, %v872_v58  ;;  %v236_v0 = vld [vmem:[%s5648_s2 + $0x5a0] sm:$0xff]  ;;  %v246_v1 = vld [vmem:[%s5648_s2 + $0x5f0] sm:$0xff]  ;;  %v249_v36 = vld [vmem:[%s5648_s2 + $0x608] sm:$0xff] }
  0x5d   :  { %5767 = vst [vmem:[#allocation25_spill] sm:$0xff] %v3553_v15  ;;  %v3559_v32 = vpack.c.bf16 %v501_v13, %v491_v12  ;;  %1642 = vmatpush.bf16.msrb.mxu2 %v1106_v37  ;;  %1715 = vmatpush.bf16.msrb.mxu3 %v1122_v51  ;;  %v237_v13 = vld [vmem:[%s5648_s2 + $0x5a8] sm:$0xff]  ;;  %v508_v50 = vmul.f32 %v3074_v9, %v236_v0 }
  0x5e   :  { %5768 = vst [vmem:[#allocation26_spill] sm:$0xff] %v3555_v16  ;;  %1496 = vmatpush.bf16.msrb.mxu0 %v1074_v59  ;;  %1569 = vmatpush.bf16.msrb.mxu1 %v1090_v61  ;;  %v518_v51 = vmul.f32 %v3074_v9, %v246_v1  ;;  %v509_v52 = vmul.f32 %v3077_v10, %v237_v13 }
  0x5f   :  { %1216 = vmatmul.bf16.gmra.mxu0 %v3217_v19  ;;  %1289 = vmatmul.bf16.gmra.mxu1 %v3219_v20  ;;  %5769 = vst [vmem:[#allocation27_spill] sm:$0xff] %v3557_v27  ;;  %v511_v60 = vmul.f32 %v3089_v14, %v239_v35  ;;  %v521_v61 = vmul.f32 %v3089_v14, %v249_v36  ;;  %v266_v36 = vld [vmem:[%s5648_s2 + $0x690] sm:$0xff] }
  0x60   :  { %1362 = vmatmul.bf16.gmra.mxu2 %v3221_v21  ;;  %1435 = vmatmul.bf16.gmra.mxu3 %v3223_v22  ;;  %5770 = vst [vmem:[#allocation28_spill] sm:$0xff] %v3559_v32 }
  0x6f   :  { %1221 = vmatmul.bf16.gmra.mxu0 %v3273_v53  ;;  %1294 = vmatmul.bf16.gmra.mxu1 %v3275_v54 }
  0x70   :  { %1367 = vmatmul.bf16.gmra.mxu2 %v3277_v55  ;;  %1440 = vmatmul.bf16.gmra.mxu3 %v3279_v56 }
  0x7f   :  { %1226 = vmatmul.bf16.gmra.mxu0 %v3329_v28  ;;  %1299 = vmatmul.bf16.gmra.mxu1 %v3331_v29 }
  0x80   :  { %1372 = vmatmul.bf16.gmra.mxu2 %v3333_v30  ;;  %1445 = vmatmul.bf16.gmra.mxu3 %v3335_v31 }
  0x8f   :  { %1231 = vmatmul.bf16.gmra.mxu0 %v3397_v4  ;;  %1304 = vmatmul.bf16.gmra.mxu1 %v3399_v6 }
  0x90   :  { %1377 = vmatmul.bf16.gmra.mxu2 %v3401_v7  ;;  %1450 = vmatmul.bf16.gmra.mxu3 %v3403_v8 }
  0x9f   :  { %1236 = vmatmul.bf16.gmra.mxu0 %v3441_v41  ;;  %1309 = vmatmul.bf16.gmra.mxu1 %v3443_v42 }
  0xa0   :  { %1382 = vmatmul.bf16.gmra.mxu2 %v3445_v43  ;;  %1455 = vmatmul.bf16.gmra.mxu3 %v3447_v44 }
  0xaf   :  { %1241 = vmatmul.bf16.gmra.mxu0 %v3509_v38  ;;  %1314 = vmatmul.bf16.gmra.mxu1 %v3511_v39 }
  0xb0   :  { %1387 = vmatmul.bf16.gmra.mxu2 %v3513_v40  ;;  %1460 = vmatmul.bf16.gmra.mxu3 %v3515_v45 }
  0xbc   :  { %v1207_v17 = vpop.f32.mrf.mxu0  ;;  %v1280_v18 = vpop.f32.mrf.mxu1 }
  0xbd   :  { %v1281_v33 = vadd.f32 %v1280_v18, %v1207_v17  ;;  %v247_v17 = vld [vmem:[%s5648_s2 + $0x5f8] sm:$0xff]  ;;  %v238_v18 = vld [vmem:[%s5648_s2 + $0x5b0] sm:$0xff] }
  0xbe   :  { %v519_v57 = vmul.f32 %v3077_v10, %v247_v17  ;;  %v510_v58 = vmul.f32 %v3080_v11, %v238_v18  ;;  %v3629_v17 = vpack.c.bf16 %v521_v61, %v511_v60  ;;  %v268_v60 = vld [vmem:[%s5648_s2 + $0x6a0] sm:$0xff] }
  0xbf   :  { %1246 = vmatmul.bf16.gmra.mxu0 %v3553_v15  ;;  %1319 = vmatmul.bf16.gmra.mxu1 %v3555_v16 }
  0xc0   :  { %1392 = vmatmul.bf16.gmra.mxu2 %v3557_v27  ;;  %1465 = vmatmul.bf16.gmra.mxu3 %v3559_v32  ;;  %5774 = vst [vmem:[#allocation32_spill] sm:$0xff] %v3629_v17 }
  0xc3   :  { %v1353_v62 = vpop.f32.mrf.mxu2  ;;  %v1426_v63 = vpop.f32.mrf.mxu3 }
  0xc4   :  { %v1354_v2 = vadd.f32 %v1353_v62, %v1281_v33  ;;  %v1209_v3 = vpop.f32.mrf.mxu0  ;;  %v1282_v12 = vpop.f32.mrf.mxu1  ;;  %v248_v33 = vld [vmem:[%s5648_s2 + $0x600] sm:$0xff] }
  0xc5   :  { %v1283_v34 = vadd.f32 %v1282_v12, %v1209_v3  ;;  %v520_v59 = vmul.f32 %v3080_v11, %v248_v33 }
  0xc6   :  { %v3613_v37 = vadd.f32 %v1426_v63, %v1354_v2  ;;  %v3623_v63 = vpack.c.bf16 %v518_v51, %v508_v50  ;;  %v3625_v2 = vpack.c.bf16 %v519_v57, %v509_v52  ;;  %v257_v50 = vld [vmem:[%s5648_s2 + $0x648] sm:$0xff] }
  0xc7   :  { %v3627_v13 = vpack.c.bf16 %v520_v59, %v510_v58  ;;  %v267_v58 = vld [vmem:[%s5648_s2 + $0x698] sm:$0xff]  ;;  %v258_v59 = vld [vmem:[%s5648_s2 + $0x650] sm:$0xff] }
  0xc8   :  { %5771 = vst [vmem:[#allocation29_spill] sm:$0xff] %v3623_v63 }
  0xc9   :  { %5772 = vst [vmem:[#allocation30_spill] sm:$0xff] %v3625_v2 }
  0xca   :  { %5773 = vst [vmem:[#allocation31_spill] sm:$0xff] %v3627_v13 }
  0xcb   :  { %v1355_v62 = vpop.f32.mrf.mxu2  ;;  %v1428_v3 = vpop.f32.mrf.mxu3 }
  0xcc   :  { %v1356_v0 = vadd.f32 %v1355_v62, %v1283_v34  ;;  %v1212_v1 = vpop.f32.mrf.mxu0  ;;  %v1285_v12 = vpop.f32.mrf.mxu1  ;;  %v256_v34 = vld [vmem:[%s5648_s2 + $0x640] sm:$0xff]  ;;  %v259_v62 = vld [vmem:[%s5648_s2 + $0x658] sm:$0xff] }
  0xcd   :  { %v1286_v18 = vadd.f32 %v1285_v12, %v1212_v1  ;;  %v528_v1 = vmul.f32 %v3074_v9, %v256_v34  ;;  %v538_v12 = vmul.f32 %v3074_v9, %v266_v36  ;;  %v530_v34 = vmul.f32 %v3080_v11, %v258_v59 }
  0xce   :  { %v3631_v32 = vadd.f32 %v1428_v3, %v1356_v0  ;;  %v269_v3 = vld [vmem:[%s5648_s2 + $0x6a8] sm:$0xff]  ;;  %v540_v36 = vmul.f32 %v3080_v11, %v268_v60  ;;  %v531_v27 = vmul.f32 %v3089_v14, %v259_v62 }
  0xcf   :  { %1251 = vmatmul.bf16.gmra.mxu0 %v3623_v63  ;;  %1324 = vmatmul.bf16.gmra.mxu1 %v3625_v2 }
  0xd0   :  { %1397 = vmatmul.bf16.gmra.mxu2 %v3627_v13  ;;  %1470 = vmatmul.bf16.gmra.mxu3 %v3629_v17  ;;  %v836_v17 = vld [vmem:[%s5647_s1 + $0x400] sm:$0xff]  ;;  %v838_v13 = vld [vmem:[%s5647_s1 + $0x410] sm:$0xff]  ;;  %v3693_v7 = vpack.c.bf16 %v540_v36, %v530_v34 }
  0xd1   :  { %v1072_v45 = vpack.c.bf16 %v838_v13, %v836_v17  ;;  %v870_v13 = vld [vmem:[%s5647_s1 + $0x510] sm:$0xff]  ;;  %v288_v36 = vld [vmem:[%s5648_s2 + $0x740] sm:$0xff] }
  0xd2   :  { %5777 = vst [vmem:[#allocation35_spill] sm:$0xff] %v3693_v7 }
  0xd3   :  { %v1358_v33 = vpop.f32.mrf.mxu2  ;;  %v1431_v35 = vpop.f32.mrf.mxu3  ;;  %1497 = vmatpush.bf16.msrb.mxu0 %v1072_v45  ;;  %v868_v45 = vld [vmem:[%s5647_s1 + $0x500] sm:$0xff] }
  0xd4   :  { %v1359_v51 = vadd.f32 %v1358_v33, %v1286_v18  ;;  %v1214_v52 = vpop.f32.mrf.mxu0  ;;  %v1287_v57 = vpop.f32.mrf.mxu1  ;;  %v529_v18 = vmul.f32 %v3077_v10, %v257_v50  ;;  %v900_v33 = vld [vmem:[%s5647_s1 + $0x600] sm:$0xff]  ;;  %v934_v50 = vld [vmem:[%s5647_s1 + $0x710] sm:$0xff]  ;;  %v1088_v17 = vpack.c.bf16 %v870_v13, %v868_v45  ;;  %v560_v13 = vmul.f32 %v3080_v11, %v288_v36  ;;  %v739_v36 = vld [vmem:[%s5647_s1 + $0xf8] sm:$0xff] }
  0xd5   :  { %v1288_v61 = vadd.f32 %v1287_v57, %v1214_v52  ;;  %v902_v52 = vld [vmem:[%s5647_s1 + $0x610] sm:$0xff]  ;;  %v932_v57 = vld [vmem:[%s5647_s1 + $0x700] sm:$0xff] }
  0xd6   :  { %v3661_v0 = vadd.f32 %v1431_v35, %v1359_v51  ;;  %v539_v35 = vmul.f32 %v3077_v10, %v267_v58  ;;  %v1104_v51 = vpack.c.bf16 %v902_v52, %v900_v33  ;;  %v541_v58 = vmul.f32 %v3089_v14, %v269_v3  ;;  %1570 = vmatpush.bf16.msrb.mxu1 %v1088_v17 }
  0xd7   :  { %v1120_v59 = vpack.c.bf16 %v934_v50, %v932_v57  ;;  %v3689_v52 = vpack.c.bf16 %v538_v12, %v528_v1  ;;  %v287_v57 = vld [vmem:[%s5648_s2 + $0x738] sm:$0xff]  ;;  %v289_v50 = vld [vmem:[%s5648_s2 + $0x748] sm:$0xff] }
  0xd8   :  { %1643 = vmatpush.bf16.msrb.mxu2 %v1104_v51  ;;  %v3691_v40 = vpack.c.bf16 %v539_v35, %v529_v18  ;;  %v3695_v31 = vpack.c.bf16 %v541_v58, %v531_v27  ;;  %v286_v27 = vld [vmem:[%s5648_s2 + $0x730] sm:$0xff]  ;;  %v277_v18 = vld [vmem:[%s5648_s2 + $0x6e8] sm:$0xff]  ;;  %v279_v51 = vld [vmem:[%s5648_s2 + $0x6f8] sm:$0xff] }
  0xd9   :  { %1716 = vmatpush.bf16.msrb.mxu3 %v1120_v59  ;;  %5775 = vst [vmem:[#allocation33_spill] sm:$0xff] %v3689_v52  ;;  %v278_v35 = vld [vmem:[%s5648_s2 + $0x6f0] sm:$0xff]  ;;  %v551_v17 = vmul.f32 %v3089_v14, %v279_v51 }
  0xda   :  { %5776 = vst [vmem:[#allocation34_spill] sm:$0xff] %v3691_v40  ;;  %v550_v45 = vmul.f32 %v3080_v11, %v278_v35 }
  0xdb   :  { %v1360_v60 = vpop.f32.mrf.mxu2  ;;  %v1433_v33 = vpop.f32.mrf.mxu3  ;;  %5778 = vst [vmem:[#allocation36_spill] sm:$0xff] %v3695_v31 }
  0xdc   :  { %v1361_v44 = vadd.f32 %v1360_v60, %v1288_v61  ;;  %v1217_v43 = vpop.f32.mrf.mxu0  ;;  %v1290_v8 = vpop.f32.mrf.mxu1  ;;  %v558_v60 = vmul.f32 %v3074_v9, %v286_v27 }
  0xdd   :  { %v1291_v62 = vadd.f32 %v1290_v8, %v1217_v43 }
  0xde   :  { %v3697_v3 = vadd.f32 %v1433_v33, %v1361_v44  ;;  %v276_v44 = vld [vmem:[%s5648_s2 + $0x6e0] sm:$0xff]  ;;  %v549_v33 = vmul.f32 %v3077_v10, %v277_v18  ;;  %v3747_v18 = vpack.c.bf16 %v560_v13, %v550_v45 }
  0xdf   :  { %1256 = vmatmul.bf16.gmra.mxu0 %v3689_v52  ;;  %1329 = vmatmul.bf16.gmra.mxu1 %v3691_v40  ;;  %v548_v59 = vmul.f32 %v3074_v9, %v276_v44 }
  0xe0   :  { %1402 = vmatmul.bf16.gmra.mxu2 %v3693_v7  ;;  %1475 = vmatmul.bf16.gmra.mxu3 %v3695_v31  ;;  %5781 = vst [vmem:[#allocation39_spill] sm:$0xff] %v3747_v18 }
  0xe3   :  { %v1363_v8 = vpop.f32.mrf.mxu2  ;;  %v1436_v43 = vpop.f32.mrf.mxu3 }
  0xe4   :  { %v1364_v61 = vadd.f32 %v1363_v8, %v1291_v62  ;;  %v1219_v1 = vpop.f32.mrf.mxu0  ;;  %v1292_v12 = vpop.f32.mrf.mxu1  ;;  %v559_v62 = vmul.f32 %v3077_v10, %v287_v57  ;;  %v561_v8 = vmul.f32 %v3089_v14, %v289_v50  ;;  %v771_v50 = vld [vmem:[%s5647_s1 + $0x1f8] sm:$0xff] }
  0xe5   :  { %v1293_v34 = vadd.f32 %v1292_v12, %v1219_v1 }
  0xe6   :  { %v3733_v58 = vadd.f32 %v1436_v43, %v1364_v61  ;;  %v3743_v43 = vpack.c.bf16 %v558_v60, %v548_v59  ;;  %v3745_v61 = vpack.c.bf16 %v559_v62, %v549_v33  ;;  %v3749_v57 = vpack.c.bf16 %v561_v8, %v551_v17  ;;  %v296_v17 = vld [vmem:[%s5648_s2 + $0x780] sm:$0xff]  ;;  %v297_v8 = vld [vmem:[%s5648_s2 + $0x788] sm:$0xff] }
  0xe8   :  { %5779 = vst [vmem:[#allocation37_spill] sm:$0xff] %v3743_v43 }
  0xe9   :  { %5780 = vst [vmem:[#allocation38_spill] sm:$0xff] %v3745_v61 }
  0xea   :  { %5782 = vst [vmem:[#allocation40_spill] sm:$0xff] %v3749_v57 }
  0xeb   :  { %v1365_v1 = vpop.f32.mrf.mxu2  ;;  %v1438_v12 = vpop.f32.mrf.mxu3 }
  0xec   :  { %v1366_v44 = vadd.f32 %v1365_v1, %v1293_v34  ;;  %v1222_v27 = vpop.f32.mrf.mxu0  ;;  %v1295_v31 = vpop.f32.mrf.mxu1  ;;  %v737_v34 = vld [vmem:[%s5647_s1 + $0xe8] sm:$0xff] }
  0xed   :  { %v1296_v35 = vadd.f32 %v1295_v31, %v1222_v27  ;;  %v769_v31 = vld [vmem:[%s5647_s1 + $0x1e8] sm:$0xff]  ;;  %v1023_v51 = vpack.c.bf16 %v739_v36, %v737_v34  ;;  %v994_v34 = vld [vmem:[%s5647_s1 + $0x8f0] sm:$0xff]  ;;  %v1004_v36 = vld [vmem:[%s5647_s1 + $0x940] sm:$0xff] }
  0xee   :  { %v3751_v7 = vadd.f32 %v1438_v12, %v1366_v44  ;;  %v1039_v59 = vpack.c.bf16 %v771_v50, %v769_v31  ;;  %v298_v12 = vld [vmem:[%s5648_s2 + $0x790] sm:$0xff]  ;;  %v299_v44 = vld [vmem:[%s5648_s2 + $0x798] sm:$0xff]  ;;  %v568_v31 = vmul.f32 %v3074_v9, %v296_v17 }
  0xef   :  { %1261 = vmatmul.bf16.gmra.mxu0 %v3743_v43  ;;  %1334 = vmatmul.bf16.gmra.mxu1 %v3745_v61 }
  0xf0   :  { %1407 = vmatmul.bf16.gmra.mxu2 %v3747_v18  ;;  %1480 = vmatmul.bf16.gmra.mxu3 %v3749_v57  ;;  %v3799_v57 = vpack.c.bf16 %v568_v31, %v568_v31  ;;  %v3823_v31 = vperm.slane %v3062_v5, 5 }
  0xf1   :  { %1928 = vmatpush.bf16.msra.mxu2 %v1023_v51  ;;  %2001 = vmatpush.bf16.msra.mxu3 %v1039_v59  ;;  %v569_v51 = vmul.f32 %v3077_v10, %v297_v8  ;;  %v1006_v59 = vld [vmem:[%s5647_s1 + $0x950] sm:$0xff] }
  0xf2   :  { %5783 = vst [vmem:[#allocation41_spill] sm:$0xff] %v3799_v57 }
  0xf3   :  { %v1368_v60 = vpop.f32.mrf.mxu2  ;;  %v1441_v33 = vpop.f32.mrf.mxu3  ;;  %v3801_v18 = vpack.c.bf16 %v569_v51, %v569_v51  ;;  %v3826_v51 = vperm.slane %v3062_v5, 6 }
  0xf4   :  { %v1369_v62 = vadd.f32 %v1368_v60, %v1296_v35  ;;  %v1224_v45 = vpop.f32.mrf.mxu0  ;;  %v1297_v13 = vpop.f32.mrf.mxu1  ;;  %v992_v35 = vld [vmem:[%s5647_s1 + $0x8e0] sm:$0xff]  ;;  %v570_v60 = vmul.f32 %v3080_v11, %v298_v12 }
  0xf5   :  { %v1298_v1 = vadd.f32 %v1297_v13, %v1224_v45  ;;  %v1150_v50 = vpack.c.bf16 %v994_v34, %v992_v35  ;;  %5784 = vst [vmem:[#allocation42_spill] sm:$0xff] %v3801_v18 }
  0xf6   :  { %v3781_v27 = vadd.f32 %v1441_v33, %v1369_v62  ;;  %v571_v33 = vmul.f32 %v3089_v14, %v299_v44  ;;  %v1156_v62 = vpack.c.bf16 %v1006_v59, %v1004_v36  ;;  %v3803_v8 = vpack.c.bf16 %v570_v60, %v570_v60  ;;  %v60_v44 = vld [vmem:[%s5648_s2 + $0x20] sm:$0xff]  ;;  %v70_v36 = vld [vmem:[%s5648_s2 + $0x70] sm:$0xff] }
  0xf7   :  { %1782 = vmatpush.bf16.msra.mxu0 %v1150_v50  ;;  %v3814_v14 = vperm.slane %v3062_v5, 4 }
  0xf8   :  { %1860 = vmatpush.bf16.msra.mxu1 %v1156_v62  ;;  %5785 = vst [vmem:[#allocation43_spill] sm:$0xff] %v3803_v8  ;;  %v3805_v35 = vpack.c.bf16 %v571_v33, %v571_v33  ;;  %v61_v33 = vld [vmem:[%s5648_s2 + $0x28] sm:$0xff]  ;;  %v71_v62 = vld [vmem:[%s5648_s2 + $0x78] sm:$0xff] }
  0xf9   :  { %v333_v30 = vmul.f32 %v3823_v31, %v61_v33 }
  0xfa   :  { %5786 = vst [vmem:[#allocation44_spill] sm:$0xff] %v3805_v35 }
  0xfb   :  { %v1370_v45 = vpop.f32.mrf.mxu2  ;;  %v1443_v13 = vpop.f32.mrf.mxu3 }
  0xfc   :  { %v1371_v9 = vadd.f32 %v1370_v45, %v1298_v1  ;;  %v1227_v10 = vpop.f32.mrf.mxu0  ;;  %v1300_v17 = vpop.f32.mrf.mxu1  ;;  %v62_v45 = vld [vmem:[%s5648_s2 + $0x30] sm:$0xff] }
  0xfd   :  { %v1301_v34 = vadd.f32 %v1300_v17, %v1227_v10  ;;  %v72_v10 = vld [vmem:[%s5648_s2 + $0x80] sm:$0xff]  ;;  %v63_v17 = vld [vmem:[%s5648_s2 + $0x38] sm:$0xff] }
  0xfe   :  { %v3807_v11 = vadd.f32 %v1443_v13, %v1371_v9  ;;  %v3838_v13 = vperm.slane %v3062_v5, 7  ;;  %v342_v5 = vmul.f32 %v3814_v14, %v70_v36  ;;  %v767_v36 = vld [vmem:[%s5647_s1 + $0x1d8] sm:$0xff]  ;;  %v344_v56 = vmul.f32 %v3826_v51, %v72_v10 }
  0xff   :  { %1266 = vmatmul.bf16.gmra.mxu0 %v3799_v57  ;;  %1339 = vmatmul.bf16.gmra.mxu1 %v3801_v18 }
 0x100   :  { %1412 = vmatmul.bf16.gmra.mxu2 %v3803_v8  ;;  %1485 = vmatmul.bf16.gmra.mxu3 %v3805_v35  ;;  %v332_v35 = vmul.f32 %v3814_v14, %v60_v44  ;;  %v765_v8 = vld [vmem:[%s5647_s1 + $0x1c8] sm:$0xff]  ;;  %v334_v44 = vmul.f32 %v3826_v51, %v62_v45  ;;  %v335_v55 = vmul.f32 %v3838_v13, %v63_v17 }
 0x101   :  { %v1037_v21 = vpack.c.bf16 %v767_v36, %v765_v8  ;;  %v990_v8 = vld [vmem:[%s5647_s1 + $0x8d0] sm:$0xff]  ;;  %v92_v36 = vld [vmem:[%s5648_s2 + $0x120] sm:$0xff] }
 0x102   :  { %v3871_v48 = vpack.c.bf16 %v342_v5, %v332_v35  ;;  %v3875_v26 = vpack.c.bf16 %v344_v56, %v334_v44  ;;  %v80_v56 = vld [vmem:[%s5648_s2 + $0xc0] sm:$0xff]  ;;  %v81_v5 = vld [vmem:[%s5648_s2 + $0xc8] sm:$0xff]  ;;  %v82_v44 = vld [vmem:[%s5648_s2 + $0xd0] sm:$0xff] }
 0x103   :  { %v1373_v1 = vpop.f32.mrf.mxu2  ;;  %v1446_v12 = vpop.f32.mrf.mxu3  ;;  %2002 = vmatpush.bf16.msra.mxu3 %v1037_v21  ;;  %v988_v21 = vld [vmem:[%s5647_s1 + $0x8c0] sm:$0xff] }
 0x104   :  { %v1374_v50 = vadd.f32 %v1373_v1, %v1301_v34  ;;  %v1229_v59 = vpop.f32.mrf.mxu0  ;;  %v1302_v60 = vpop.f32.mrf.mxu1  ;;  %v73_v34 = vld [vmem:[%s5648_s2 + $0x88] sm:$0xff]  ;;  %5787 = vst [vmem:[#allocation45_spill] sm:$0xff] %v3871_v48 }
 0x105   :  { %v1303_v9 = vadd.f32 %v1302_v60, %v1229_v59  ;;  %v733_v59 = vld [vmem:[%s5647_s1 + $0xc8] sm:$0xff]  ;;  %v735_v60 = vld [vmem:[%s5647_s1 + $0xd8] sm:$0xff]  ;;  %v345_v22 = vmul.f32 %v3838_v13, %v73_v34  ;;  %5789 = vst [vmem:[#allocation47_spill] sm:$0xff] %v3875_v26 }
 0x106   :  { %v3849_v1 = vadd.f32 %v1446_v12, %v1374_v50  ;;  %v343_v12 = vmul.f32 %v3823_v31, %v71_v62  ;;  %v1021_v50 = vpack.c.bf16 %v735_v60, %v733_v59 }
 0x107   :  { %v3877_v25 = vpack.c.bf16 %v345_v22, %v335_v55 }
 0x108   :  { %1929 = vmatpush.bf16.msra.mxu2 %v1021_v50  ;;  %v3873_v62 = vpack.c.bf16 %v343_v12, %v333_v30  ;;  %v90_v30 = vld [vmem:[%s5648_s2 + $0x110] sm:$0xff]  ;;  %v91_v12 = vld [vmem:[%s5648_s2 + $0x118] sm:$0xff] }
 0x109   :  { %5790 = vst [vmem:[#allocation48_spill] sm:$0xff] %v3877_v25 }
 0x10a   :  { %5788 = vst [vmem:[#allocation46_spill] sm:$0xff] %v3873_v62 }
 0x10b   :  { %v1375_v49 = vpop.f32.mrf.mxu2  ;;  %v1448_v33 = vpop.f32.mrf.mxu3 }
 0x10c   :  { %v1376_v45 = vadd.f32 %v1375_v49, %v1303_v9  ;;  %v1232_v59 = vpop.f32.mrf.mxu0  ;;  %v1305_v60 = vpop.f32.mrf.mxu1  ;;  %v1148_v49 = vpack.c.bf16 %v990_v8, %v988_v21  ;;  %v353_v21 = vmul.f32 %v3823_v31, %v81_v5  ;;  %v363_v8 = vmul.f32 %v3823_v31, %v91_v12 }
 0x10d   :  { %v1306_v10 = vadd.f32 %v1305_v60, %v1232_v59  ;;  %v352_v60 = vmul.f32 %v3814_v14, %v80_v56 }
 0x10e   :  { %v3879_v17 = vadd.f32 %v1448_v33, %v1376_v45  ;;  %1783 = vmatpush.bf16.msra.mxu0 %v1148_v49  ;;  %v83_v33 = vld [vmem:[%s5648_s2 + $0xd8] sm:$0xff]  ;;  %v93_v45 = vld [vmem:[%s5648_s2 + $0x128] sm:$0xff]  ;;  %v354_v49 = vmul.f32 %v3826_v51, %v82_v44 }
 0x10f   :  { %1498 = vmatmul.bf16.vlgmr.msrb.gmra.mxu0 %v3871_v48  ;;  %1571 = vmatmul.bf16.vlgmr.msrb.gmra.mxu1 %v3873_v62 }
 0x110   :  { %1644 = vmatmul.bf16.vlgmr.msrb.gmra.mxu2 %v3875_v26  ;;  %1717 = vmatmul.bf16.vlgmr.msrb.gmra.mxu3 %v3877_v25 }
 0x113   :  { %v1378_v22 = vpop.f32.mrf.mxu2  ;;  %v1451_v55 = vpop.f32.mrf.mxu3 }
 0x114   :  { %v1379_v35 = vadd.f32 %v1378_v22, %v1306_v10  ;;  %v1234_v9 = vpop.f32.mrf.mxu0  ;;  %v1307_v34 = vpop.f32.mrf.mxu1  ;;  %v362_v10 = vmul.f32 %v3814_v14, %v90_v30  ;;  %v364_v22 = vmul.f32 %v3826_v51, %v92_v36 }
 0x115   :  { %v1308_v50 = vadd.f32 %v1307_v34, %v1234_v9  ;;  %v355_v9 = vmul.f32 %v3838_v13, %v83_v33  ;;  %v365_v34 = vmul.f32 %v3838_v13, %v93_v45 }
 0x116   :  { %v3915_v59 = vadd.f32 %v1451_v55, %v1379_v35  ;;  %v3925_v55 = vpack.c.bf16 %v362_v10, %v352_v60  ;;  %v3927_v35 = vpack.c.bf16 %v363_v8, %v353_v21  ;;  %v3929_v5 = vpack.c.bf16 %v364_v22, %v354_v49  ;;  %v111_v10 = vld [vmem:[%s5648_s2 + $0x1b8] sm:$0xff]  ;;  %v102_v21 = vld [vmem:[%s5648_s2 + $0x170] sm:$0xff]  ;;  %v112_v8 = vld [vmem:[%s5648_s2 + $0x1c0] sm:$0xff] }
 0x117   :  { %v3931_v12 = vpack.c.bf16 %v365_v34, %v355_v9  ;;  %v103_v22 = vld [vmem:[%s5648_s2 + $0x178] sm:$0xff]  ;;  %v113_v9 = vld [vmem:[%s5648_s2 + $0x1c8] sm:$0xff] }
 0x118   :  { %5791 = vst [vmem:[#allocation49_spill] sm:$0xff] %v3925_v55 }
 0x119   :  { %5792 = vst [vmem:[#allocation50_spill] sm:$0xff] %v3927_v35 }
 0x11a   :  { %5793 = vst [vmem:[#allocation51_spill] sm:$0xff] %v3929_v5 }
 0x11b   :  { %v1380_v25 = vpop.f32.mrf.mxu2  ;;  %v1453_v26 = vpop.f32.mrf.mxu3  ;;  %5794 = vst [vmem:[#allocation52_spill] sm:$0xff] %v3931_v12 }
 0x11c   :  { %v1381_v56 = vadd.f32 %v1380_v25, %v1308_v50  ;;  %v1237_v30 = vpop.f32.mrf.mxu0  ;;  %v1310_v62 = vpop.f32.mrf.mxu1  ;;  %v100_v25 = vld [vmem:[%s5648_s2 + $0x160] sm:$0xff] }
 0x11d   :  { %v1311_v44 = vadd.f32 %v1310_v62, %v1237_v30  ;;  %v110_v62 = vld [vmem:[%s5648_s2 + $0x1b0] sm:$0xff] }
 0x11e   :  { %v3933_v48 = vadd.f32 %v1453_v26, %v1381_v56  ;;  %v101_v26 = vld [vmem:[%s5648_s2 + $0x168] sm:$0xff]  ;;  %v372_v56 = vmul.f32 %v3814_v14, %v100_v25  ;;  %v382_v30 = vmul.f32 %v3814_v14, %v110_v62  ;;  %v374_v25 = vmul.f32 %v3826_v51, %v102_v21 }
 0x11f   :  { %1503 = vmatmul.bf16.gmra.mxu0 %v3925_v55  ;;  %1576 = vmatmul.bf16.gmra.mxu1 %v3927_v35  ;;  %v384_v62 = vmul.f32 %v3826_v51, %v112_v8  ;;  %v375_v35 = vmul.f32 %v3838_v13, %v103_v22 }
 0x120   :  { %1649 = vmatmul.bf16.gmra.mxu2 %v3929_v5  ;;  %1722 = vmatmul.bf16.gmra.mxu3 %v3931_v12  ;;  %v984_v12 = vld [vmem:[%s5647_s1 + $0x8a0] sm:$0xff]  ;;  %v986_v5 = vld [vmem:[%s5647_s1 + $0x8b0] sm:$0xff] }
 0x121   :  { %v1146_v55 = vpack.c.bf16 %v986_v5, %v984_v12  ;;  %v3995_v40 = vpack.c.bf16 %v384_v62, %v374_v25  ;;  %v120_v12 = vld [vmem:[%s5648_s2 + $0x200] sm:$0xff]  ;;  %v133_v25 = vld [vmem:[%s5648_s2 + $0x268] sm:$0xff] }
 0x123   :  { %v1383_v36 = vpop.f32.mrf.mxu2  ;;  %v1456_v33 = vpop.f32.mrf.mxu3  ;;  %1784 = vmatpush.bf16.msra.mxu0 %v1146_v55  ;;  %5797 = vst [vmem:[#allocation55_spill] sm:$0xff] %v3995_v40 }
 0x124   :  { %v1384_v50 = vadd.f32 %v1383_v36, %v1311_v44  ;;  %v1239_v45 = vpop.f32.mrf.mxu0  ;;  %v1312_v60 = vpop.f32.mrf.mxu1  ;;  %v373_v44 = vmul.f32 %v3823_v31, %v101_v26  ;;  %v729_v36 = vld [vmem:[%s5647_s1 + $0xa8] sm:$0xff]  ;;  %v763_v26 = vld [vmem:[%s5647_s1 + $0x1b8] sm:$0xff] }
 0x125   :  { %v1313_v49 = vadd.f32 %v1312_v60, %v1239_v45  ;;  %v731_v45 = vld [vmem:[%s5647_s1 + $0xb8] sm:$0xff]  ;;  %v761_v60 = vld [vmem:[%s5647_s1 + $0x1a8] sm:$0xff] }
 0x126   :  { %v3963_v34 = vadd.f32 %v1456_v33, %v1384_v50  ;;  %v383_v33 = vmul.f32 %v3823_v31, %v111_v10  ;;  %v1019_v50 = vpack.c.bf16 %v731_v45, %v729_v36  ;;  %v385_v10 = vmul.f32 %v3838_v13, %v113_v9 }
 0x127   :  { %v1035_v21 = vpack.c.bf16 %v763_v26, %v761_v60  ;;  %v3991_v45 = vpack.c.bf16 %v382_v30, %v372_v56  ;;  %v131_v56 = vld [vmem:[%s5648_s2 + $0x258] sm:$0xff]  ;;  %v122_v30 = vld [vmem:[%s5648_s2 + $0x210] sm:$0xff]  ;;  %v132_v60 = vld [vmem:[%s5648_s2 + $0x260] sm:$0xff] }
 0x128   :  { %1930 = vmatpush.bf16.msra.mxu2 %v1019_v50  ;;  %v3993_v18 = vpack.c.bf16 %v383_v33, %v373_v44  ;;  %v3997_v52 = vpack.c.bf16 %v385_v10, %v375_v35  ;;  %v123_v33 = vld [vmem:[%s5648_s2 + $0x218] sm:$0xff]  ;;  %v392_v50 = vmul.f32 %v3814_v14, %v120_v12 }
 0x129   :  { %2003 = vmatpush.bf16.msra.mxu3 %v1035_v21  ;;  %5795 = vst [vmem:[#allocation53_spill] sm:$0xff] %v3991_v45  ;;  %v403_v21 = vmul.f32 %v3823_v31, %v131_v56 }
 0x12a   :  { %5796 = vst [vmem:[#allocation54_spill] sm:$0xff] %v3993_v18 }
 0x12b   :  { %v1385_v8 = vpop.f32.mrf.mxu2  ;;  %v1458_v36 = vpop.f32.mrf.mxu3  ;;  %5798 = vst [vmem:[#allocation56_spill] sm:$0xff] %v3997_v52 }
 0x12c   :  { %v1386_v57 = vadd.f32 %v1385_v8, %v1313_v49  ;;  %v1242_v61 = vpop.f32.mrf.mxu0  ;;  %v1315_v43 = vpop.f32.mrf.mxu1  ;;  %v121_v49 = vld [vmem:[%s5648_s2 + $0x208] sm:$0xff]  ;;  %v394_v8 = vmul.f32 %v3826_v51, %v122_v30 }
 0x12d   :  { %v1316_v22 = vadd.f32 %v1315_v43, %v1242_v61  ;;  %v130_v43 = vld [vmem:[%s5648_s2 + $0x250] sm:$0xff]  ;;  %v393_v10 = vmul.f32 %v3823_v31, %v121_v49 }
 0x12e   :  { %v3999_v9 = vadd.f32 %v1458_v36, %v1386_v57  ;;  %v402_v26 = vmul.f32 %v3814_v14, %v130_v43  ;;  %v404_v36 = vmul.f32 %v3826_v51, %v132_v60  ;;  %v1000_v60 = vld [vmem:[%s5647_s1 + $0x920] sm:$0xff] }
 0x12f   :  { %1508 = vmatmul.bf16.gmra.mxu0 %v3991_v45  ;;  %1581 = vmatmul.bf16.gmra.mxu1 %v3993_v18 }
 0x130   :  { %1654 = vmatmul.bf16.gmra.mxu2 %v3995_v40  ;;  %1727 = vmatmul.bf16.gmra.mxu3 %v3997_v52  ;;  %v4043_v49 = vpack.c.bf16 %v404_v36, %v394_v8  ;;  %v980_v8 = vld [vmem:[%s5647_s1 + $0x880] sm:$0xff]  ;;  %v982_v36 = vld [vmem:[%s5647_s1 + $0x890] sm:$0xff] }
 0x132   :  { %5801 = vst [vmem:[#allocation59_spill] sm:$0xff] %v4043_v49 }
 0x133   :  { %v1388_v55 = vpop.f32.mrf.mxu2  ;;  %v1461_v5 = vpop.f32.mrf.mxu3 }
 0x134   :  { %v1389_v61 = vadd.f32 %v1388_v55, %v1316_v22  ;;  %v1244_v57 = vpop.f32.mrf.mxu0  ;;  %v1317_v35 = vpop.f32.mrf.mxu1  ;;  %v395_v22 = vmul.f32 %v3838_v13, %v123_v33  ;;  %v405_v55 = vmul.f32 %v3838_v13, %v133_v25  ;;  %v1002_v33 = vld [vmem:[%s5647_s1 + $0x930] sm:$0xff] }
 0x135   :  { %v1318_v44 = vadd.f32 %v1317_v35, %v1244_v57  ;;  %v1154_v25 = vpack.c.bf16 %v1002_v33, %v1000_v60 }
 0x136   :  { %v4029_v62 = vadd.f32 %v1461_v5, %v1389_v61  ;;  %v4039_v5 = vpack.c.bf16 %v402_v26, %v392_v50  ;;  %v4041_v61 = vpack.c.bf16 %v403_v21, %v393_v10  ;;  %v4045_v56 = vpack.c.bf16 %v405_v55, %v395_v22  ;;  %v757_v50 = vld [vmem:[%s5647_s1 + $0x188] sm:$0xff]  ;;  %v759_v26 = vld [vmem:[%s5647_s1 + $0x198] sm:$0xff] }
 0x137   :  { %v1033_v21 = vpack.c.bf16 %v759_v26, %v757_v50  ;;  %1861 = vmatpush.bf16.msra.mxu1 %v1154_v25  ;;  %v1144_v22 = vpack.c.bf16 %v982_v36, %v980_v8  ;;  %v151_v25 = vld [vmem:[%s5648_s2 + $0x2f8] sm:$0xff]  ;;  %v152_v26 = vld [vmem:[%s5648_s2 + $0x300] sm:$0xff] }
 0x138   :  { %5799 = vst [vmem:[#allocation57_spill] sm:$0xff] %v4039_v5 }
 0x139   :  { %5800 = vst [vmem:[#allocation58_spill] sm:$0xff] %v4041_v61  ;;  %2004 = vmatpush.bf16.msra.mxu3 %v1033_v21  ;;  %1785 = vmatpush.bf16.msra.mxu0 %v1144_v22 }
 0x13a   :  { %5802 = vst [vmem:[#allocation60_spill] sm:$0xff] %v4045_v56 }
 0x13b   :  { %v1390_v57 = vpop.f32.mrf.mxu2  ;;  %v1463_v35 = vpop.f32.mrf.mxu3 }
 0x13c   :  { %v1391_v12 = vadd.f32 %v1390_v57, %v1318_v44  ;;  %v1247_v43 = vpop.f32.mrf.mxu0  ;;  %v1320_v52 = vpop.f32.mrf.mxu1  ;;  %v725_v44 = vld [vmem:[%s5647_s1 + $0x88] sm:$0xff] }
 0x13d   :  { %v1321_v30 = vadd.f32 %v1320_v52, %v1247_v43  ;;  %v727_v52 = vld [vmem:[%s5647_s1 + $0x98] sm:$0xff] }
 0x13e   :  { %v4047_v40 = vadd.f32 %v1463_v35, %v1391_v12  ;;  %v1017_v10 = vpack.c.bf16 %v727_v52, %v725_v44  ;;  %v140_v35 = vld [vmem:[%s5648_s2 + $0x2a0] sm:$0xff]  ;;  %v150_v12 = vld [vmem:[%s5648_s2 + $0x2f0] sm:$0xff]  ;;  %v141_v44 = vld [vmem:[%s5648_s2 + $0x2a8] sm:$0xff] }
 0x13f   :  { %1513 = vmatmul.bf16.gmra.mxu0 %v4039_v5  ;;  %1586 = vmatmul.bf16.gmra.mxu1 %v4041_v61  ;;  %v142_v52 = vld [vmem:[%s5648_s2 + $0x2b0] sm:$0xff]  ;;  %v412_v8 = vmul.f32 %v3814_v14, %v140_v35  ;;  %v422_v36 = vmul.f32 %v3814_v14, %v150_v12  ;;  %v413_v22 = vmul.f32 %v3823_v31, %v141_v44 }
 0x140   :  { %1659 = vmatmul.bf16.gmra.mxu2 %v4043_v49  ;;  %1732 = vmatmul.bf16.gmra.mxu3 %v4045_v56 }
 0x141   :  { %1931 = vmatpush.bf16.msra.mxu2 %v1017_v10  ;;  %v153_v10 = vld [vmem:[%s5648_s2 + $0x308] sm:$0xff] }
 0x142   :  { %v425_v49 = vmul.f32 %v3838_v13, %v153_v10  ;;  %v171_v10 = vld [vmem:[%s5648_s2 + $0x398] sm:$0xff] }
 0x143   :  { %v1393_v55 = vpop.f32.mrf.mxu2  ;;  %v1466_v57 = vpop.f32.mrf.mxu3 }
 0x144   :  { %v1394_v43 = vadd.f32 %v1393_v55, %v1321_v30  ;;  %v1249_v60 = vpop.f32.mrf.mxu0  ;;  %v1322_v33 = vpop.f32.mrf.mxu1  ;;  %v143_v30 = vld [vmem:[%s5648_s2 + $0x2b8] sm:$0xff]  ;;  %v423_v55 = vmul.f32 %v3823_v31, %v151_v25 }
 0x145   :  { %v1323_v50 = vadd.f32 %v1322_v33, %v1249_v60  ;;  %v414_v60 = vmul.f32 %v3826_v51, %v142_v52  ;;  %v424_v33 = vmul.f32 %v3826_v51, %v152_v26  ;;  %v415_v56 = vmul.f32 %v3838_v13, %v143_v30 }
 0x146   :  { %v4101_v21 = vadd.f32 %v1466_v57, %v1394_v43  ;;  %v4111_v57 = vpack.c.bf16 %v422_v36, %v412_v8  ;;  %v4113_v43 = vpack.c.bf16 %v423_v55, %v413_v22  ;;  %v162_v8 = vld [vmem:[%s5648_s2 + $0x350] sm:$0xff]  ;;  %v172_v22 = vld [vmem:[%s5648_s2 + $0x3a0] sm:$0xff]  ;;  %v163_v55 = vld [vmem:[%s5648_s2 + $0x358] sm:$0xff] }
 0x147   :  { %v4115_v44 = vpack.c.bf16 %v424_v33, %v414_v60  ;;  %v4117_v25 = vpack.c.bf16 %v425_v49, %v415_v56  ;;  %v173_v60 = vld [vmem:[%s5648_s2 + $0x3a8] sm:$0xff] }
 0x148   :  { %5803 = vst [vmem:[#allocation61_spill] sm:$0xff] %v4111_v57 }
 0x149   :  { %5804 = vst [vmem:[#allocation62_spill] sm:$0xff] %v4113_v43 }
 0x14a   :  { %5805 = vst [vmem:[#allocation63_spill] sm:$0xff] %v4115_v44 }
 0x14b   :  { %v1395_v61 = vpop.f32.mrf.mxu2  ;;  %v1468_v5 = vpop.f32.mrf.mxu3  ;;  %5806 = vst [vmem:[#allocation64_spill] sm:$0xff] %v4117_v25 }
 0x14c   :  { %v1396_v35 = vadd.f32 %v1395_v61, %v1323_v50  ;;  %v1252_v12 = vpop.f32.mrf.mxu0  ;;  %v1325_v18 = vpop.f32.mrf.mxu1  ;;  %v160_v61 = vld [vmem:[%s5648_s2 + $0x340] sm:$0xff]  ;;  %v161_v50 = vld [vmem:[%s5648_s2 + $0x348] sm:$0xff] }
 0x14d   :  { %v1326_v52 = vadd.f32 %v1325_v18, %v1252_v12  ;;  %v170_v18 = vld [vmem:[%s5648_s2 + $0x390] sm:$0xff] }
 0x14e   :  { %v4119_v45 = vadd.f32 %v1468_v5, %v1396_v35  ;;  %v432_v35 = vmul.f32 %v3814_v14, %v160_v61  ;;  %v442_v12 = vmul.f32 %v3814_v14, %v170_v18  ;;  %v434_v61 = vmul.f32 %v3826_v51, %v162_v8  ;;  %v755_v18 = vld [vmem:[%s5647_s1 + $0x178] sm:$0xff] }
 0x14f   :  { %1518 = vmatmul.bf16.gmra.mxu0 %v4111_v57  ;;  %1591 = vmatmul.bf16.gmra.mxu1 %v4113_v43  ;;  %v445_v43 = vmul.f32 %v3838_v13, %v173_v60  ;;  %v978_v60 = vld [vmem:[%s5647_s1 + $0x870] sm:$0xff] }
 0x150   :  { %1664 = vmatmul.bf16.gmra.mxu2 %v4115_v44  ;;  %1737 = vmatmul.bf16.gmra.mxu3 %v4117_v25  ;;  %v444_v25 = vmul.f32 %v3826_v51, %v172_v22  ;;  %v435_v44 = vmul.f32 %v3838_v13, %v163_v55  ;;  %v4171_v63 = vpack.c.bf16 %v442_v12, %v432_v35 }
 0x152   :  { %5807 = vst [vmem:[#allocation65_spill] sm:$0xff] %v4171_v63  ;;  %v4175_v16 = vpack.c.bf16 %v444_v25, %v434_v61  ;;  %v4177_v15 = vpack.c.bf16 %v445_v43, %v435_v44  ;;  %v180_v25 = vld [vmem:[%s5648_s2 + $0x3e0] sm:$0xff]  ;;  %v182_v61 = vld [vmem:[%s5648_s2 + $0x3f0] sm:$0xff] }
 0x153   :  { %v1398_v26 = vpop.f32.mrf.mxu2  ;;  %v1471_v30 = vpop.f32.mrf.mxu3 }
 0x154   :  { %v1399_v5 = vadd.f32 %v1398_v26, %v1326_v52  ;;  %v1254_v49 = vpop.f32.mrf.mxu0  ;;  %v1327_v56 = vpop.f32.mrf.mxu1  ;;  %v721_v52 = vld [vmem:[%s5647_s1 + $0x68] sm:$0xff]  ;;  %v723_v26 = vld [vmem:[%s5647_s1 + $0x78] sm:$0xff]  ;;  %5809 = vst [vmem:[#allocation67_spill] sm:$0xff] %v4175_v16 }
 0x155   :  { %v1328_v36 = vadd.f32 %v1327_v56, %v1254_v49  ;;  %v753_v49 = vld [vmem:[%s5647_s1 + $0x168] sm:$0xff]  ;;  %v433_v56 = vmul.f32 %v3823_v31, %v161_v50  ;;  %5810 = vst [vmem:[#allocation68_spill] sm:$0xff] %v4177_v15 }
 0x156   :  { %v4149_v33 = vadd.f32 %v1471_v30, %v1399_v5  ;;  %v443_v30 = vmul.f32 %v3823_v31, %v171_v10  ;;  %v1015_v5 = vpack.c.bf16 %v723_v26, %v721_v52  ;;  %v1031_v57 = vpack.c.bf16 %v755_v18, %v753_v49  ;;  %v192_v18 = vld [vmem:[%s5648_s2 + $0x440] sm:$0xff] }
 0x158   :  { %1932 = vmatpush.bf16.msra.mxu2 %v1015_v5  ;;  %2005 = vmatpush.bf16.msra.mxu3 %v1031_v57  ;;  %v4173_v10 = vpack.c.bf16 %v443_v30, %v433_v56  ;;  %v976_v57 = vld [vmem:[%s5647_s1 + $0x860] sm:$0xff]  ;;  %v181_v56 = vld [vmem:[%s5648_s2 + $0x3e8] sm:$0xff]  ;;  %v191_v30 = vld [vmem:[%s5648_s2 + $0x438] sm:$0xff] }
 0x15a   :  { %5808 = vst [vmem:[#allocation66_spill] sm:$0xff] %v4173_v10 }
 0x15b   :  { %v1400_v2 = vpop.f32.mrf.mxu2  ;;  %v1473_v50 = vpop.f32.mrf.mxu3 }
 0x15c   :  { %v1401_v8 = vadd.f32 %v1400_v2, %v1328_v36  ;;  %v1257_v52 = vpop.f32.mrf.mxu0  ;;  %v1330_v26 = vpop.f32.mrf.mxu1  ;;  %v1142_v2 = vpack.c.bf16 %v978_v60, %v976_v57  ;;  %v190_v36 = vld [vmem:[%s5648_s2 + $0x430] sm:$0xff]  ;;  %v453_v57 = vmul.f32 %v3823_v31, %v181_v56  ;;  %v463_v60 = vmul.f32 %v3823_v31, %v191_v30 }
 0x15d   :  { %v1331_v22 = vadd.f32 %v1330_v26, %v1257_v52  ;;  %v452_v26 = vmul.f32 %v3814_v14, %v180_v25 }
 0x15e   :  { %v4179_v55 = vadd.f32 %v1473_v50, %v1401_v8  ;;  %1786 = vmatpush.bf16.msra.mxu0 %v1142_v2  ;;  %v183_v50 = vld [vmem:[%s5648_s2 + $0x3f8] sm:$0xff]  ;;  %v193_v8 = vld [vmem:[%s5648_s2 + $0x448] sm:$0xff]  ;;  %v454_v2 = vmul.f32 %v3826_v51, %v182_v61 }
 0x15f   :  { %1523 = vmatmul.bf16.gmra.mxu0 %v4171_v63  ;;  %1596 = vmatmul.bf16.gmra.mxu1 %v4173_v10 }
 0x160   :  { %1669 = vmatmul.bf16.gmra.mxu2 %v4175_v16  ;;  %1742 = vmatmul.bf16.gmra.mxu3 %v4177_v15 }
 0x163   :  { %v1403_v43 = vpop.f32.mrf.mxu2  ;;  %v1476_v44 = vpop.f32.mrf.mxu3 }
 0x164   :  { %v1404_v35 = vadd.f32 %v1403_v43, %v1331_v22  ;;  %v1259_v12 = vpop.f32.mrf.mxu0  ;;  %v1332_v49 = vpop.f32.mrf.mxu1  ;;  %v462_v22 = vmul.f32 %v3814_v14, %v190_v36  ;;  %v464_v43 = vmul.f32 %v3826_v51, %v192_v18  ;;  %v751_v18 = vld [vmem:[%s5647_s1 + $0x158] sm:$0xff] }
 0x165   :  { %v1333_v5 = vadd.f32 %v1332_v49, %v1259_v12  ;;  %v455_v12 = vmul.f32 %v3838_v13, %v183_v50  ;;  %v465_v49 = vmul.f32 %v3838_v13, %v193_v8 }
 0x166   :  { %v4215_v52 = vadd.f32 %v1476_v44, %v1404_v35  ;;  %v4225_v44 = vpack.c.bf16 %v462_v22, %v452_v26  ;;  %v4227_v35 = vpack.c.bf16 %v463_v60, %v453_v57  ;;  %v4229_v56 = vpack.c.bf16 %v464_v43, %v454_v2  ;;  %v200_v22 = vld [vmem:[%s5648_s2 + $0x480] sm:$0xff]  ;;  %v210_v57 = vld [vmem:[%s5648_s2 + $0x4d0] sm:$0xff] }
 0x167   :  { %v4231_v30 = vpack.c.bf16 %v465_v49, %v455_v12  ;;  %v201_v12 = vld [vmem:[%s5648_s2 + $0x488] sm:$0xff]  ;;  %v211_v49 = vld [vmem:[%s5648_s2 + $0x4d8] sm:$0xff] }
 0x168   :  { %5811 = vst [vmem:[#allocation69_spill] sm:$0xff] %v4225_v44 }
 0x169   :  { %5812 = vst [vmem:[#allocation70_spill] sm:$0xff] %v4227_v35 }
 0x16a   :  { %5813 = vst [vmem:[#allocation71_spill] sm:$0xff] %v4229_v56 }
 0x16b   :  { %v1405_v15 = vpop.f32.mrf.mxu2  ;;  %v1478_v16 = vpop.f32.mrf.mxu3  ;;  %5814 = vst [vmem:[#allocation72_spill] sm:$0xff] %v4231_v30 }
 0x16c   :  { %v1406_v25 = vadd.f32 %v1405_v15, %v1333_v5  ;;  %v1262_v36 = vpop.f32.mrf.mxu0  ;;  %v1335_v10 = vpop.f32.mrf.mxu1  ;;  %v717_v15 = vld [vmem:[%s5647_s1 + $0x48] sm:$0xff]  ;;  %v719_v5 = vld [vmem:[%s5647_s1 + $0x58] sm:$0xff] }
 0x16d   :  { %v1336_v61 = vadd.f32 %v1335_v10, %v1262_v36  ;;  %v1013_v10 = vpack.c.bf16 %v719_v5, %v717_v15  ;;  %v203_v15 = vld [vmem:[%s5648_s2 + $0x498] sm:$0xff]  ;;  %v213_v5 = vld [vmem:[%s5648_s2 + $0x4e8] sm:$0xff] }
 0x16e   :  { %v4233_v63 = vadd.f32 %v1478_v16, %v1406_v25  ;;  %v749_v16 = vld [vmem:[%s5647_s1 + $0x148] sm:$0xff]  ;;  %v202_v25 = vld [vmem:[%s5648_s2 + $0x490] sm:$0xff] }
 0x16f   :  { %1528 = vmatmul.bf16.gmra.mxu0 %v4225_v44  ;;  %1601 = vmatmul.bf16.gmra.mxu1 %v4227_v35  ;;  %v1029_v50 = vpack.c.bf16 %v751_v18, %v749_v16  ;;  %v482_v18 = vmul.f32 %v3814_v14, %v210_v57  ;;  %v485_v57 = vmul.f32 %v3838_v13, %v213_v5  ;;  %v230_v5 = vld [vmem:[%s5648_s2 + $0x570] sm:$0xff] }
 0x170   :  { %1674 = vmatmul.bf16.gmra.mxu2 %v4229_v56  ;;  %1747 = vmatmul.bf16.gmra.mxu3 %v4231_v30  ;;  %v974_v30 = vld [vmem:[%s5647_s1 + $0x850] sm:$0xff] }
 0x171   :  { %1933 = vmatpush.bf16.msra.mxu2 %v1013_v10  ;;  %2006 = vmatpush.bf16.msra.mxu3 %v1029_v50  ;;  %v472_v10 = vmul.f32 %v3814_v14, %v200_v22  ;;  %v473_v50 = vmul.f32 %v3823_v31, %v201_v12  ;;  %v475_v22 = vmul.f32 %v3838_v13, %v203_v15 }
 0x173   :  { %v1408_v8 = vpop.f32.mrf.mxu2  ;;  %v1481_v26 = vpop.f32.mrf.mxu3  ;;  %v4291_v56 = vpack.c.bf16 %v482_v18, %v472_v10  ;;  %v4297_v42 = vpack.c.bf16 %v485_v57, %v475_v22  ;;  %v223_v22 = vld [vmem:[%s5648_s2 + $0x538] sm:$0xff]  ;;  %v233_v57 = vld [vmem:[%s5648_s2 + $0x588] sm:$0xff] }
 0x174   :  { %v1409_v60 = vadd.f32 %v1408_v8, %v1336_v61  ;;  %v1264_v2 = vpop.f32.mrf.mxu0  ;;  %v1337_v43 = vpop.f32.mrf.mxu1  ;;  %v212_v61 = vld [vmem:[%s5648_s2 + $0x4e0] sm:$0xff]  ;;  %v483_v8 = vmul.f32 %v3823_v31, %v211_v49 }
 0x175   :  { %v1338_v36 = vadd.f32 %v1337_v43, %v1264_v2  ;;  %v474_v2 = vmul.f32 %v3826_v51, %v202_v25  ;;  %v972_v43 = vld [vmem:[%s5647_s1 + $0x840] sm:$0xff]  ;;  %5815 = vst [vmem:[#allocation73_spill] sm:$0xff] %v4291_v56 }
 0x176   :  { %v4275_v16 = vadd.f32 %v1481_v26, %v1409_v60  ;;  %v484_v26 = vmul.f32 %v3826_v51, %v212_v61  ;;  %v1140_v60 = vpack.c.bf16 %v974_v30, %v972_v43  ;;  %v4293_v25 = vpack.c.bf16 %v483_v8, %v473_v50  ;;  %5818 = vst [vmem:[#allocation76_spill] sm:$0xff] %v4297_v42  ;;  %v996_v30 = vld [vmem:[%s5647_s1 + $0x900] sm:$0xff]  ;;  %v221_v8 = vld [vmem:[%s5648_s2 + $0x528] sm:$0xff]  ;;  %v222_v43 = vld [vmem:[%s5648_s2 + $0x530] sm:$0xff] }
 0x178   :  { %1787 = vmatpush.bf16.msra.mxu0 %v1140_v60  ;;  %5816 = vst [vmem:[#allocation74_spill] sm:$0xff] %v4293_v25  ;;  %v4295_v38 = vpack.c.bf16 %v484_v26, %v474_v2  ;;  %v231_v2 = vld [vmem:[%s5648_s2 + $0x578] sm:$0xff]  ;;  %v232_v26 = vld [vmem:[%s5648_s2 + $0x580] sm:$0xff] }
 0x17a   :  { %5817 = vst [vmem:[#allocation75_spill] sm:$0xff] %v4295_v38 }
 0x17b   :  { %v1410_v12 = vpop.f32.mrf.mxu2  ;;  %v1483_v49 = vpop.f32.mrf.mxu3 }
 0x17c   :  { %v1411_v35 = vadd.f32 %v1410_v12, %v1338_v36  ;;  %v1267_v44 = vpop.f32.mrf.mxu0  ;;  %v1340_v39 = vpop.f32.mrf.mxu1  ;;  %v998_v36 = vld [vmem:[%s5647_s1 + $0x910] sm:$0xff] }
 0x17d   :  { %v1341_v61 = vadd.f32 %v1340_v39, %v1267_v44  ;;  %v1152_v15 = vpack.c.bf16 %v998_v36, %v996_v30  ;;  %v503_v30 = vmul.f32 %v3823_v31, %v231_v2  ;;  %v494_v36 = vmul.f32 %v3826_v51, %v222_v43  ;;  %v713_v43 = vld [vmem:[%s5647_s1 + $0x28] sm:$0xff] }
 0x17e   :  { %v4299_v41 = vadd.f32 %v1483_v49, %v1411_v35  ;;  %v220_v35 = vld [vmem:[%s5648_s2 + $0x520] sm:$0xff]  ;;  %v502_v49 = vmul.f32 %v3814_v14, %v230_v5 }
 0x17f   :  { %1533 = vmatmul.bf16.gmra.mxu0 %v4291_v56  ;;  %1606 = vmatmul.bf16.gmra.mxu1 %v4293_v25  ;;  %v492_v12 = vmul.f32 %v3814_v14, %v220_v35 }
 0x180   :  { %1679 = vmatmul.bf16.gmra.mxu2 %v4295_v38  ;;  %1752 = vmatmul.bf16.gmra.mxu3 %v4297_v42 }
 0x181   :  { %1862 = vmatpush.bf16.msra.mxu1 %v1152_v15  ;;  %v504_v15 = vmul.f32 %v3826_v51, %v232_v26  ;;  %v745_v26 = vld [vmem:[%s5647_s1 + $0x128] sm:$0xff] }
 0x183   :  { %v1413_v39 = vpop.f32.mrf.mxu2  ;;  %v1486_v44 = vpop.f32.mrf.mxu3  ;;  %v4349_v38 = vpack.c.bf16 %v504_v15, %v494_v36 }
 0x184   :  { %v1414_v10 = vadd.f32 %v1413_v39, %v1341_v61  ;;  %v1269_v18 = vpop.f32.mrf.mxu0  ;;  %v1342_v50 = vpop.f32.mrf.mxu1  ;;  %v493_v61 = vmul.f32 %v3823_v31, %v221_v8  ;;  %v495_v39 = vmul.f32 %v3838_v13, %v223_v22 }
 0x185   :  { %v505_v18 = vmul.f32 %v3838_v13, %v233_v57  ;;  %5821 = vst [vmem:[#allocation79_spill] sm:$0xff] %v4349_v38 }
 0x186   :  { %v4335_v60 = vadd.f32 %v1486_v44, %v1414_v10  ;;  %v4345_v44 = vpack.c.bf16 %v502_v49, %v492_v12  ;;  %v4347_v10 = vpack.c.bf16 %v503_v30, %v493_v61  ;;  %v968_v49 = vld [vmem:[%s5647_s1 + $0x820] sm:$0xff]  ;;  %v970_v61 = vld [vmem:[%s5647_s1 + $0x830] sm:$0xff] }
 0x187   :  { %v4351_v8 = vpack.c.bf16 %v505_v18, %v495_v39  ;;  %v1138_v30 = vpack.c.bf16 %v970_v61, %v968_v49  ;;  %v240_v39 = vld [vmem:[%s5648_s2 + $0x5c0] sm:$0xff]  ;;  %v250_v18 = vld [vmem:[%s5648_s2 + $0x610] sm:$0xff] }
 0x188   :  { %5819 = vst [vmem:[#allocation77_spill] sm:$0xff] %v4345_v44  ;;  %v512_v49 = vmul.f32 %v3814_v14, %v240_v39 }
 0x189   :  { %5820 = vst [vmem:[#allocation78_spill] sm:$0xff] %v4347_v10  ;;  %1788 = vmatpush.bf16.msra.mxu0 %v1138_v30  ;;  %v522_v30 = vmul.f32 %v3814_v14, %v250_v18 }
 0x18a   :  { %5822 = vst [vmem:[#allocation80_spill] sm:$0xff] %v4351_v8 }
 0x18b   :  { %v1415_v50 = vpop.f32.mrf.mxu2  ;;  %v1488_v42 = vpop.f32.mrf.mxu3 }
 0x18c   :  { %v1499_v35 = vpop.f32.mrf.mxu0  ;;  %v1572_v5 = vpop.f32.mrf.mxu1  ;;  %v715_v42 = vld [vmem:[%s5647_s1 + $0x38] sm:$0xff] }
 0x18d   :  { %v1500_v2 = vadd.f32 %v1499_v35, %v3613_v37  ;;  %v1011_v57 = vpack.c.bf16 %v715_v42, %v713_v43  ;;  %v747_v37 = vld [vmem:[%s5647_s1 + $0x138] sm:$0xff]  ;;  %v242_v42 = vld [vmem:[%s5648_s2 + $0x5d0] sm:$0xff] }
 0x18e   :  { %v1027_v12 = vpack.c.bf16 %v747_v37, %v745_v26  ;;  %v251_v43 = vld [vmem:[%s5648_s2 + $0x618] sm:$0xff]  ;;  %v253_v37 = vld [vmem:[%s5648_s2 + $0x628] sm:$0xff] }
 0x18f   :  { %v1573_v22 = vadd.f32 %v1572_v5, %v1500_v2  ;;  %1538 = vmatmul.bf16.gmra.mxu0 %v4345_v44  ;;  %1611 = vmatmul.bf16.gmra.mxu1 %v4347_v10  ;;  %v241_v2 = vld [vmem:[%s5648_s2 + $0x5c8] sm:$0xff]  ;;  %v525_v10 = vmul.f32 %v3838_v13, %v253_v37 }
 0x190   :  { %1684 = vmatmul.bf16.gmra.mxu2 %v4349_v38  ;;  %1757 = vmatmul.bf16.gmra.mxu3 %v4351_v8  ;;  %v17_v37 = vld [vmem:[%s5646_s0 + $0x8] sm:$0x3] }
 0x191   :  { %1934 = vmatpush.bf16.msra.mxu2 %v1011_v57  ;;  %2007 = vmatpush.bf16.msra.mxu3 %v1027_v12  ;;  %v243_v57 = vld [vmem:[%s5648_s2 + $0x5d8] sm:$0xff] }
 0x192   :  { %v515_v38 = vmul.f32 %v3838_v13, %v243_v57 }
 0x193   :  { %v1645_v36 = vpop.f32.mrf.mxu2  ;;  %v1718_v15 = vpop.f32.mrf.mxu3 }
 0x194   :  { %v1646_v50 = vadd.f32 %v1645_v36, %v1573_v22  ;;  %v1501_v35 = vpop.f32.mrf.mxu0  ;;  %v1574_v5 = vpop.f32.mrf.mxu1  ;;  %v252_v22 = vld [vmem:[%s5648_s2 + $0x620] sm:$0xff]  ;;  %v523_v36 = vmul.f32 %v3823_v31, %v251_v43  ;;  %v4417_v43 = vpack.c.bf16 %v525_v10, %v515_v38 }
 0x195   :  { %v1502_v26 = vadd.f32 %v1501_v35, %v3631_v32  ;;  %v513_v32 = vmul.f32 %v3823_v31, %v241_v2  ;;  %v514_v35 = vmul.f32 %v3826_v51, %v242_v42  ;;  %v524_v8 = vmul.f32 %v3826_v51, %v252_v22 }
 0x196   :  { %v4401_v12 = vadd.f32 %v1718_v15, %v1646_v50  ;;  %v4411_v50 = vpack.c.bf16 %v522_v30, %v512_v49  ;;  %5826 = vst [vmem:[#allocation84_spill] sm:$0xff] %v4417_v43 }
 0x197   :  { %v1575_v61 = vadd.f32 %v1574_v5, %v1502_v26  ;;  %v4413_v39 = vpack.c.bf16 %v523_v36, %v513_v32  ;;  %v4415_v2 = vpack.c.bf16 %v524_v8, %v514_v35  ;;  %v270_v8 = vld [vmem:[%s5648_s2 + $0x6b0] sm:$0xff]  ;;  %v261_v32 = vld [vmem:[%s5648_s2 + $0x668] sm:$0xff]  ;;  %v271_v36 = vld [vmem:[%s5648_s2 + $0x6b8] sm:$0xff] }
 0x198   :  { %5823 = vst [vmem:[#allocation81_spill] sm:$0xff] %v4411_v50  ;;  %v262_v35 = vld [vmem:[%s5648_s2 + $0x670] sm:$0xff] }
 0x199   :  { %5824 = vst [vmem:[#allocation82_spill] sm:$0xff] %v4413_v39 }
 0x19a   :  { %5825 = vst [vmem:[#allocation83_spill] sm:$0xff] %v4415_v2 }
 0x19b   :  { %v1647_v44 = vpop.f32.mrf.mxu2  ;;  %v1720_v15 = vpop.f32.mrf.mxu3 }
 0x19c   :  { %v1648_v5 = vadd.f32 %v1647_v44, %v1575_v61  ;;  %v1504_v18 = vpop.f32.mrf.mxu0  ;;  %v1577_v26 = vpop.f32.mrf.mxu1  ;;  %v2728_v44 = vmul.f32 -1.442695, %v17_v37  ;;  %v542_v37 = vmul.f32 %v3814_v14, %v270_v8 }
 0x19d   :  { %v1505_v42 = vadd.f32 %v1504_v18, %v3661_v0  ;;  %v260_v0 = vld [vmem:[%s5648_s2 + $0x660] sm:$0xff]  ;;  %v263_v18 = vld [vmem:[%s5648_s2 + $0x678] sm:$0xff] }
 0x19e   :  { %v4420_v22 = vadd.f32 %v1720_v15, %v1648_v5  ;;  %v272_v5 = vld [vmem:[%s5648_s2 + $0x6c0] sm:$0xff]  ;;  %2762 = vpow2.f32 %v2728_v44  ;;  %v535_v8 = vmul.f32 %v3838_v13, %v263_v18 }
 0x19f   :  { %v1578_v57 = vadd.f32 %v1577_v26, %v1505_v42  ;;  %1543 = vmatmul.bf16.gmra.mxu0 %v4411_v50  ;;  %1616 = vmatmul.bf16.gmra.mxu1 %v4413_v39  ;;  %v273_v26 = vld [vmem:[%s5648_s2 + $0x6c8] sm:$0xff]  ;;  %v544_v44 = vmul.f32 %v3826_v51, %v272_v5 }
 0x1a0   :  { %5827 = vst [vmem:[#allocation85_spill] sm:$0xff] %v4420_v22  ;;  %1689 = vmatmul.bf16.gmra.mxu2 %v4415_v2  ;;  %1762 = vmatmul.bf16.gmra.mxu3 %v4417_v43  ;;  %v534_v43 = vmul.f32 %v3826_v51, %v262_v35  ;;  %v709_v2 = vld [vmem:[%s5647_s1 + $0x8] sm:$0xff]  ;;  %v966_v35 = vld [vmem:[%s5647_s1 + $0x810] sm:$0xff] }
 0x1a3   :  { %v1650_v38 = vpop.f32.mrf.mxu2  ;;  %v1723_v10 = vpop.f32.mrf.mxu3 }
 0x1a4   :  { %v1651_v49 = vadd.f32 %v1650_v38, %v1578_v57  ;;  %v1506_v61 = vpop.f32.mrf.mxu0  ;;  %v1579_v30 = vpop.f32.mrf.mxu1  ;;  %v532_v57 = vmul.f32 %v3814_v14, %v260_v0  ;;  %v533_v38 = vmul.f32 %v3823_v31, %v261_v32  ;;  %v741_v0 = vld [vmem:[%s5647_s1 + $0x108] sm:$0xff]  ;;  %v743_v32 = vld [vmem:[%s5647_s1 + $0x118] sm:$0xff] }
 0x1a5   :  { %v1507_v15 = vadd.f32 %v1506_v61, %v3697_v3  ;;  %v543_v61 = vmul.f32 %v3823_v31, %v271_v36  ;;  %v964_v36 = vld [vmem:[%s5647_s1 + $0x800] sm:$0xff] }
 0x1a6   :  { %v4454_v42 = vadd.f32 %v1723_v10, %v1651_v49  ;;  %v711_v10 = vld [vmem:[%s5647_s1 + $0x18] sm:$0xff]  ;;  %v545_v49 = vmul.f32 %v3838_v13, %v273_v26  ;;  %v1136_v39 = vpack.c.bf16 %v966_v35, %v964_v36  ;;  %v4482_v50 = vpack.c.bf16 %v542_v37, %v532_v57  ;;  %v2763_v26 = vpop.eup %2762  ;;  %v280_v37 = vld [vmem:[%s5648_s2 + $0x700] sm:$0xff]  ;;  %v293_v35 = vld [vmem:[%s5648_s2 + $0x768] sm:$0xff] }
 0x1a7   :  { %v1580_v3 = vadd.f32 %v1579_v30, %v1507_v15  ;;  %v1009_v30 = vpack.c.bf16 %v711_v10, %v709_v2  ;;  %v1025_v15 = vpack.c.bf16 %v743_v32, %v741_v0  ;;  %v4484_v2 = vpack.c.bf16 %v543_v61, %v533_v38  ;;  %v281_v38 = vld [vmem:[%s5648_s2 + $0x708] sm:$0xff]  ;;  %v291_v61 = vld [vmem:[%s5648_s2 + $0x758] sm:$0xff] }
 0x1a8   :  { %5828 = vst [vmem:[#allocation86_spill] sm:$0xff] %v4454_v42  ;;  %1789 = vmatpush.bf16.msra.mxu0 %v1136_v39  ;;  %v4486_v42 = vpack.c.bf16 %v544_v44, %v534_v43  ;;  %v4488_v22 = vpack.c.bf16 %v545_v49, %v535_v8  ;;  %v4495_v57 = vadd.f32 1.0, %v2763_v26  ;;  %v282_v44 = vld [vmem:[%s5648_s2 + $0x710] sm:$0xff]  ;;  %v292_v49 = vld [vmem:[%s5648_s2 + $0x760] sm:$0xff]  ;;  %v283_v36 = vld [vmem:[%s5648_s2 + $0x718] sm:$0xff] }
 0x1a9   :  { %1935 = vmatpush.bf16.msra.mxu2 %v1009_v30  ;;  %2008 = vmatpush.bf16.msra.mxu3 %v1025_v15 }
 0x1aa   :  { %5829 = vst [vmem:[#allocation87_spill] sm:$0xff] %v4486_v42  ;;  %2764 = vrcp.f32 %v4495_v57  ;;  %vm46_vm4 = vweird.f32 %v4495_v57 }
 0x1ab   :  { %v1652_v5 = vpop.f32.mrf.mxu2  ;;  %v1725_v18 = vpop.f32.mrf.mxu3  ;;  %5830 = vst [vmem:[#allocation88_spill] sm:$0xff] %v4488_v22 }
 0x1ac   :  { %v1653_v10 = vadd.f32 %v1652_v5, %v1580_v3  ;;  %v1509_v25 = vpop.f32.mrf.mxu0  ;;  %v1582_v56 = vpop.f32.mrf.mxu1  ;;  %v552_v5 = vmul.f32 %v3814_v14, %v280_v37 }
 0x1ad   :  { %v1510_v0 = vadd.f32 %v1509_v25, %v3733_v58  ;;  %v290_v58 = vld [vmem:[%s5648_s2 + $0x750] sm:$0xff] }
 0x1ae   :  { %v4491_v32 = vadd.f32 %v1725_v18, %v1653_v10  ;;  %v562_v26 = vmul.f32 %v3814_v14, %v290_v58  ;;  %v563_v10 = vmul.f32 %v3823_v31, %v291_v61 }
 0x1af   :  { %v1583_v30 = vadd.f32 %v1582_v56, %v1510_v0  ;;  %1548 = vmatmul.bf16.gmra.mxu0 %v4482_v50  ;;  %1621 = vmatmul.bf16.gmra.mxu1 %v4484_v2  ;;  %v554_v0 = vmul.f32 %v3826_v51, %v282_v44 }
 0x1b0   :  { %1694 = vmatmul.bf16.gmra.mxu2 %v4486_v42  ;;  %1767 = vmatmul.bf16.gmra.mxu3 %v4488_v22  ;;  %v4535_v22 = vpop.eup %2764  ;;  %v4537_v37 = vpack.c.bf16 %v562_v26, %v552_v5  ;;  %v897_v26 = vld [vmem:[%s5647_s1 + $0x5e8] sm:$0xff] }
 0x1b1   :  { %vm47_vm5 = vweird.f32 %v4535_v22 }
 0x1b2   :  { %vm4603_vm6 = vmor %vm46_vm4, %vm47_vm5 }
 0x1b3   :  { %v1655_v39 = vpop.f32.mrf.mxu2  ;;  %v1728_v43 = vpop.f32.mrf.mxu3 }
 0x1b4   :  { %v1656_v56 = vadd.f32 %v1655_v39, %v1583_v30  ;;  %v1511_v25 = vpop.f32.mrf.mxu0  ;;  %v1584_v3 = vpop.f32.mrf.mxu1  ;;  %v564_v30 = vmul.f32 %v3826_v51, %v292_v49  ;;  %v555_v39 = vmul.f32 %v3838_v13, %v283_v36  ;;  %v42_v49 = vmul.f32 %v4535_v22, %v4495_v57 }
 0x1b5   :  { %v1512_v8 = vadd.f32 %v1511_v25, %v3751_v7  ;;  %v553_v7 = vmul.f32 %v3823_v31, %v281_v38  ;;  %v565_v25 = vmul.f32 %v3838_v13, %v293_v35 }
 0x1b6   :  { %v4525_v15 = vadd.f32 %v1728_v43, %v1656_v56  ;;  %v4541_v61 = vpack.c.bf16 %v564_v30, %v554_v0  ;;  %v43_v5 = vsub.f32 1.0, %v42_v49  ;;  %v300_v0 = vld [vmem:[%s5648_s2 + $0x7a0] sm:$0xff] }
 0x1b7   :  { %v1585_v18 = vadd.f32 %v1584_v3, %v1512_v8  ;;  %v4539_v3 = vpack.c.bf16 %v563_v10, %v553_v7  ;;  %v4543_v44 = vpack.c.bf16 %v565_v25, %v555_v39  ;;  %v899_v10 = vld [vmem:[%s5647_s1 + $0x5f8] sm:$0xff] }
 0x1b8   :  { %5831 = vst [vmem:[#allocation89_spill] sm:$0xff] %v4541_v61  ;;  %v1103_v30 = vpack.c.bf16 %v899_v10, %v897_v26  ;;  %v44_v49 = vmul.f32 %v4535_v22, %v43_v5  ;;  %v801_v5 = vld [vmem:[%s5647_s1 + $0x2e8] sm:$0xff]  ;;  %v52_v10 = vand.u32 2147483648, %v4495_v57 }
 0x1b9   :  { %5832 = vst [vmem:[#allocation90_spill] sm:$0xff] %v4543_v44 }
 0x1ba   :  { %2293 = vmatpush.bf16.msrb.mxu3 %v1103_v30  ;;  %v835_v30 = vld [vmem:[%s5647_s1 + $0x3f8] sm:$0xff] }
 0x1bb   :  { %v1657_v43 = vpop.f32.mrf.mxu2  ;;  %v1730_v56 = vpop.f32.mrf.mxu3 }
 0x1bc   :  { %v1658_v58 = vadd.f32 %v1657_v43, %v1585_v18  ;;  %v1514_v38 = vpop.f32.mrf.mxu0  ;;  %v1587_v8 = vpop.f32.mrf.mxu1  ;;  %v865_v18 = vld [vmem:[%s5647_s1 + $0x4e8] sm:$0xff] }
 0x1bd   :  { %v1515_v36 = vadd.f32 %v1514_v38, %v3781_v27  ;;  %v867_v27 = vld [vmem:[%s5647_s1 + $0x4f8] sm:$0xff]  ;;  %v301_v43 = vld [vmem:[%s5648_s2 + $0x7a8] sm:$0xff] }
 0x1be   :  { %v4548_v35 = vadd.f32 %v1730_v56, %v1658_v58  ;;  %v1087_v7 = vpack.c.bf16 %v867_v27, %v865_v18  ;;  %v572_v18 = vmul.f32 %v3814_v14, %v300_v0  ;;  %v303_v27 = vld [vmem:[%s5648_s2 + $0x7b8] sm:$0xff] }
 0x1bf   :  { %v1588_v42 = vadd.f32 %v1587_v8, %v1515_v36  ;;  %1553 = vmatmul.bf16.gmra.mxu0 %v4537_v37  ;;  %1626 = vmatmul.bf16.gmra.mxu1 %v4539_v3  ;;  %v302_v8 = vld [vmem:[%s5648_s2 + $0x7b0] sm:$0xff] }
 0x1c0   :  { %1699 = vmatmul.bf16.gmra.mxu2 %v4541_v61  ;;  %1772 = vmatmul.bf16.gmra.mxu3 %v4543_v44 }
 0x1c1   :  { %2220 = vmatpush.bf16.msrb.mxu2 %v1087_v7  ;;  %v574_v7 = vmul.f32 %v3826_v51, %v302_v8  ;;  %v4607_v8 = vpack.c.bf16 %v572_v18, %v572_v18  ;;  %v65_v51 = vld [vmem:[%s5648_s2 + $0x48] sm:$0xff] }
 0x1c3   :  { %v1660_v39 = vpop.f32.mrf.mxu2  ;;  %v1733_v25 = vpop.f32.mrf.mxu3 }
 0x1c4   :  { %v1661_v56 = vadd.f32 %v1660_v39, %v1588_v42  ;;  %v1516_v58 = vpop.f32.mrf.mxu0  ;;  %v1589_v38 = vpop.f32.mrf.mxu1  ;;  %v573_v42 = vmul.f32 %v3823_v31, %v301_v43  ;;  %v833_v31 = vld [vmem:[%s5647_s1 + $0x3e8] sm:$0xff]  ;;  %v575_v39 = vmul.f32 %v3838_v13, %v303_v27  ;;  %v50_v43 = vand.u32 2147483647, %v4495_v57 }
 0x1c5   :  { %v1517_v36 = vadd.f32 %v1516_v58, %v3807_v11  ;;  %v803_v11 = vld [vmem:[%s5647_s1 + $0x2f8] sm:$0xff]  ;;  %v53_v13 = vor.u32 1.1754944e-38, %v52_v10 }
 0x1c6   :  { %v4581_v26 = vadd.f32 %v1733_v25, %v1661_v56  ;;  %v1055_v0 = vpack.c.bf16 %v803_v11, %v801_v5  ;;  %v45_v25 = vadd.f32 %v4535_v22, %v44_v49  ;;  %v1071_v56 = vpack.c.bf16 %v835_v30, %v833_v31 }
 0x1c7   :  { %v1590_v14 = vadd.f32 %v1589_v38, %v1517_v36  ;;  %v4609_v36 = vpack.c.bf16 %v573_v42, %v573_v42  ;;  %v4611_v5 = vpack.c.bf16 %v574_v7, %v574_v7  ;;  %v4613_v57 = vpack.c.bf16 %v575_v39, %v575_v39 }
 0x1c8   :  { %2074 = vmatpush.bf16.msrb.mxu0 %v1055_v0  ;;  %2147 = vmatpush.bf16.msrb.mxu1 %v1071_v56  ;;  %v49_v31 = vsel %vm4603_vm6, %v4535_v22, %v45_v25  ;;  %vm51_vm7 = vcmp.eq.f32.partialorder %v50_v43, 8.507059e+37  ;;  %v74_v56 = vld [vmem:[%s5648_s2 + $0x90] sm:$0xff] }
 0x1c9   :  { %5835 = vst [vmem:[#allocation91_spill] sm:$0xff] %v4611_v5  ;;  %v54_v42 = vsel %vm51_vm7, %v53_v13, %v49_v31 }
 0x1ca   :  { %5836 = vst [vmem:[#allocation92_spill] sm:$0xff] %v4613_v57  ;;  %v4630_v22 = vperm.slane %v54_v42, 1 }
 0x1cb   :  { %v1662_v58 = vpop.f32.mrf.mxu2  ;;  %v1735_v38 = vpop.f32.mrf.mxu3 }
 0x1cc   :  { %v1663_v27 = vadd.f32 %v1662_v58, %v1590_v14  ;;  %v1519_v49 = vpop.f32.mrf.mxu0  ;;  %v1592_v11 = vpop.f32.mrf.mxu1  ;;  %v4625_v14 = vperm.slane %v54_v42, 0  ;;  %v75_v58 = vld [vmem:[%s5648_s2 + $0x98] sm:$0xff]  ;;  %v337_v31 = vmul.f32 %v4630_v22, %v65_v51 }
 0x1cd   :  { %v1520_v0 = vadd.f32 %v1519_v49, %v3849_v1  ;;  %v64_v1 = vld [vmem:[%s5648_s2 + $0x40] sm:$0xff]  ;;  %v863_v42 = vld [vmem:[%s5647_s1 + $0x4d8] sm:$0xff] }
 0x1ce   :  { %v4619_v30 = vadd.f32 %v1735_v38, %v1663_v27  ;;  %v336_v27 = vmul.f32 %v4625_v14, %v64_v1 }
 0x1cf   :  { %v1593_v18 = vadd.f32 %v1592_v11, %v1520_v0  ;;  %1558 = vmatmul.bf16.gmra.mxu0 %v4607_v8  ;;  %1631 = vmatmul.bf16.gmra.mxu1 %v4609_v36  ;;  %v346_v11 = vmul.f32 %v4625_v14, %v74_v56  ;;  %v347_v0 = vmul.f32 %v4630_v22, %v75_v58 }
 0x1d0   :  { %1704 = vmatmul.bf16.gmra.mxu2 %v4611_v5  ;;  %1777 = vmatmul.bf16.gmra.mxu3 %v4613_v57 }
 0x1d1   :  { %v4662_v56 = vpack.c.bf16 %v347_v0, %v337_v31 }
 0x1d3   :  { %v1665_v7 = vpop.f32.mrf.mxu2  ;;  %v1738_v10 = vpop.f32.mrf.mxu3 }
 0x1d4   :  { %v1666_v39 = vadd.f32 %v1665_v7, %v1593_v18  ;;  %v1521_v25 = vpop.f32.mrf.mxu0  ;;  %v1594_v43 = vpop.f32.mrf.mxu1  ;;  %v861_v18 = vld [vmem:[%s5647_s1 + $0x4c8] sm:$0xff] }
 0x1d5   :  { %v1522_v38 = vadd.f32 %v1521_v25, %v3879_v17  ;;  %v893_v17 = vld [vmem:[%s5647_s1 + $0x5c8] sm:$0xff]  ;;  %v1085_v7 = vpack.c.bf16 %v863_v42, %v861_v18 }
 0x1d6   :  { %v4642_v13 = vadd.f32 %v1738_v10, %v1666_v39  ;;  %v895_v10 = vld [vmem:[%s5647_s1 + $0x5d8] sm:$0xff] }
 0x1d7   :  { %v1595_v49 = vadd.f32 %v1594_v43, %v1522_v38  ;;  %v1101_v1 = vpack.c.bf16 %v895_v10, %v893_v17  ;;  %2221 = vmatpush.bf16.msrb.mxu2 %v1085_v7  ;;  %v4660_v43 = vpack.c.bf16 %v346_v11, %v336_v27  ;;  %v797_v27 = vld [vmem:[%s5647_s1 + $0x2c8] sm:$0xff]  ;;  %v831_v11 = vld [vmem:[%s5647_s1 + $0x3d8] sm:$0xff]  ;;  %v84_v7 = vld [vmem:[%s5648_s2 + $0xe0] sm:$0xff] }
 0x1d9   :  { %2294 = vmatpush.bf16.msrb.mxu3 %v1101_v1  ;;  %v94_v1 = vld [vmem:[%s5648_s2 + $0x130] sm:$0xff] }
 0x1db   :  { %v1667_v39 = vpop.f32.mrf.mxu2  ;;  %v1740_v25 = vpop.f32.mrf.mxu3 }
 0x1dc   :  { %v1668_v51 = vadd.f32 %v1667_v39, %v1595_v49  ;;  %v1524_v58 = vpop.f32.mrf.mxu0  ;;  %v1597_v38 = vpop.f32.mrf.mxu1  ;;  %v799_v49 = vld [vmem:[%s5647_s1 + $0x2d8] sm:$0xff]  ;;  %v85_v39 = vld [vmem:[%s5648_s2 + $0xe8] sm:$0xff] }
 0x1dd   :  { %v1525_v57 = vadd.f32 %v1524_v58, %v3915_v59  ;;  %v1053_v59 = vpack.c.bf16 %v799_v49, %v797_v27  ;;  %v366_v27 = vmul.f32 %v4625_v14, %v94_v1  ;;  %v357_v49 = vmul.f32 %v4630_v22, %v85_v39  ;;  %v104_v1 = vld [vmem:[%s5648_s2 + $0x180] sm:$0xff] }
 0x1de   :  { %v4665_v18 = vadd.f32 %v1740_v25, %v1668_v51  ;;  %v95_v25 = vld [vmem:[%s5648_s2 + $0x138] sm:$0xff] }
 0x1df   :  { %v1598_v42 = vadd.f32 %v1597_v38, %v1525_v57  ;;  %1790 = vmatmul.bf16.vlgmr.msra.gmra.mxu0 %v4660_v43  ;;  %2729 = vmatmul.msk.bf16.vlgmr.msra.gmra.mxu1 %vm1158_vm8, %v4662_v56  ;;  %v829_v57 = vld [vmem:[%s5647_s1 + $0x3c8] sm:$0xff]  ;;  %v356_v38 = vmul.f32 %v4625_v14, %v84_v7 }
 0x1e0   :  { %1936 = vmatmul.bf16.vlgmr.msra.gmra.mxu2 %v3099_v23  ;;  %2009 = vmatmul.bf16.vlgmr.msra.gmra.mxu3 %v3101_v24  ;;  %v1069_v31 = vpack.c.bf16 %v831_v11, %v829_v57 }
 0x1e1   :  { %2075 = vmatpush.bf16.msrb.mxu0 %v1053_v59  ;;  %v367_v59 = vmul.f32 %v4630_v22, %v95_v25  ;;  %v105_v25 = vld [vmem:[%s5648_s2 + $0x188] sm:$0xff] }
 0x1e2   :  { %2148 = vmatpush.bf16.msrb.mxu1 %v1069_v31  ;;  %v4703_v31 = vpack.c.bf16 %v366_v27, %v356_v38  ;;  %v376_v38 = vmul.f32 %v4625_v14, %v104_v1  ;;  %v857_v27 = vld [vmem:[%s5647_s1 + $0x4a8] sm:$0xff] }
 0x1e3   :  { %v1670_v0 = vpop.f32.mrf.mxu2  ;;  %v1743_v17 = vpop.f32.mrf.mxu3 }
 0x1e4   :  { %v1671_v23 = vadd.f32 %v1670_v0, %v1598_v42  ;;  %v1526_v24 = vpop.f32.mrf.mxu0  ;;  %v1599_v10 = vpop.f32.mrf.mxu1  ;;  %v4705_v0 = vpack.c.bf16 %v367_v59, %v357_v49  ;;  %v859_v49 = vld [vmem:[%s5647_s1 + $0x4b8] sm:$0xff]  ;;  %v889_v59 = vld [vmem:[%s5647_s1 + $0x5a8] sm:$0xff] }
 0x1e5   :  { %v1527_v51 = vadd.f32 %v1526_v24, %v3933_v48 }
 0x1e6   :  { %v4697_v58 = vadd.f32 %v1743_v17, %v1671_v23 }
 0x1e7   :  { %v1600_v42 = vadd.f32 %v1599_v10, %v1527_v51 }
 0x1eb   :  { %v1672_v57 = vpop.f32.mrf.mxu2  ;;  %v1745_v11 = vpop.f32.mrf.mxu3 }
 0x1ec   :  { %v1673_v5 = vadd.f32 %v1672_v57, %v1600_v42  ;;  %v1529_v44 = vpop.f32.mrf.mxu0  ;;  %v1602_v48 = vpop.f32.mrf.mxu1 }
 0x1ed   :  { %v1530_v17 = vadd.f32 %v1529_v44, %v3963_v34  ;;  %v114_v34 = vld [vmem:[%s5648_s2 + $0x1d0] sm:$0xff] }
 0x1ee   :  { %v4708_v23 = vadd.f32 %v1745_v11, %v1673_v5  ;;  %v386_v42 = vmul.f32 %v4625_v14, %v114_v34  ;;  %v825_v34 = vld [vmem:[%s5647_s1 + $0x3a8] sm:$0xff] }
 0x1ef   :  { %v1603_v7 = vadd.f32 %v1602_v48, %v1530_v17  ;;  %1795 = vmatmul.bf16.gmra.mxu0 %v4703_v31  ;;  %2730 = vmatmul.msk.bf16.gmra.mxu1 %vm1158_vm8, %v4705_v0  ;;  %v1083_v48 = vpack.c.bf16 %v859_v49, %v857_v27  ;;  %v891_v17 = vld [vmem:[%s5647_s1 + $0x5b8] sm:$0xff] }
 0x1f0   :  { %1941 = vmatmul.bf16.gmra.mxu2 %v3149_v46  ;;  %2014 = vmatmul.bf16.gmra.mxu3 %v3151_v47  ;;  %v115_v46 = vld [vmem:[%s5648_s2 + $0x1d8] sm:$0xff] }
 0x1f1   :  { %v387_v11 = vmul.f32 %v4630_v22, %v115_v46  ;;  %2222 = vmatpush.bf16.msrb.mxu2 %v1083_v48  ;;  %v4758_v46 = vpack.c.bf16 %v386_v42, %v376_v38  ;;  %v134_v48 = vld [vmem:[%s5648_s2 + $0x270] sm:$0xff] }
 0x1f3   :  { %v1675_v24 = vpop.f32.mrf.mxu2  ;;  %v1748_v10 = vpop.f32.mrf.mxu3 }
 0x1f4   :  { %v1676_v44 = vadd.f32 %v1675_v24, %v1603_v7  ;;  %v1531_v5 = vpop.f32.mrf.mxu0  ;;  %v1604_v39 = vpop.f32.mrf.mxu1  ;;  %v793_v7 = vld [vmem:[%s5647_s1 + $0x2a8] sm:$0xff]  ;;  %v795_v24 = vld [vmem:[%s5647_s1 + $0x2b8] sm:$0xff] }
 0x1f5   :  { %v1532_v47 = vadd.f32 %v1531_v5, %v3999_v9  ;;  %v377_v9 = vmul.f32 %v4630_v22, %v105_v25  ;;  %v1051_v1 = vpack.c.bf16 %v795_v24, %v793_v7 }
 0x1f6   :  { %v4728_v51 = vadd.f32 %v1748_v10, %v1676_v44  ;;  %v1099_v10 = vpack.c.bf16 %v891_v17, %v889_v59  ;;  %v827_v44 = vld [vmem:[%s5647_s1 + $0x3b8] sm:$0xff] }
 0x1f7   :  { %v1605_v57 = vadd.f32 %v1604_v39, %v1532_v47  ;;  %v1067_v5 = vpack.c.bf16 %v827_v44, %v825_v34  ;;  %2076 = vmatpush.bf16.msrb.mxu0 %v1051_v1  ;;  %v4760_v47 = vpack.c.bf16 %v387_v11, %v377_v9 }
 0x1f8   :  { %2295 = vmatpush.bf16.msrb.mxu3 %v1099_v10  ;;  %v125_v10 = vld [vmem:[%s5648_s2 + $0x228] sm:$0xff] }
 0x1f9   :  { %2149 = vmatpush.bf16.msrb.mxu1 %v1067_v5  ;;  %v406_v5 = vmul.f32 %v4625_v14, %v134_v48 }
 0x1fb   :  { %v1677_v39 = vpop.f32.mrf.mxu2  ;;  %v1750_v25 = vpop.f32.mrf.mxu3 }
 0x1fc   :  { %v1678_v27 = vadd.f32 %v1677_v39, %v1605_v57  ;;  %v1534_v49 = vpop.f32.mrf.mxu0  ;;  %v1607_v59 = vpop.f32.mrf.mxu1  ;;  %v124_v57 = vld [vmem:[%s5648_s2 + $0x220] sm:$0xff]  ;;  %v397_v39 = vmul.f32 %v4630_v22, %v125_v10  ;;  %v887_v10 = vld [vmem:[%s5647_s1 + $0x598] sm:$0xff] }
 0x1fd   :  { %v1535_v17 = vadd.f32 %v1534_v49, %v4029_v62  ;;  %v396_v34 = vmul.f32 %v4625_v14, %v124_v57 }
 0x1fe   :  { %v4763_v7 = vadd.f32 %v1750_v25, %v1678_v27 }
 0x1ff   :  { %v1608_v24 = vadd.f32 %v1607_v59, %v1535_v17  ;;  %1800 = vmatmul.bf16.gmra.mxu0 %v4758_v46  ;;  %2731 = vmatmul.msk.bf16.gmra.mxu1 %vm1158_vm8, %v4760_v47  ;;  %v4789_v59 = vpack.c.bf16 %v406_v5, %v396_v34 }
 0x200   :  { %1946 = vmatmul.bf16.gmra.mxu2 %v3217_v19  ;;  %2019 = vmatmul.bf16.gmra.mxu3 %v3219_v20  ;;  %v135_v19 = vld [vmem:[%s5648_s2 + $0x278] sm:$0xff] }
 0x201   :  { %v407_v25 = vmul.f32 %v4630_v22, %v135_v19  ;;  %v789_v19 = vld [vmem:[%s5647_s1 + $0x288] sm:$0xff] }
 0x203   :  { %v1680_v38 = vpop.f32.mrf.mxu2  ;;  %v1753_v42 = vpop.f32.mrf.mxu3  ;;  %v4791_v17 = vpack.c.bf16 %v407_v25, %v397_v39  ;;  %v154_v39 = vld [vmem:[%s5648_s2 + $0x310] sm:$0xff] }
 0x204   :  { %v1681_v9 = vadd.f32 %v1680_v38, %v1608_v24  ;;  %v1536_v62 = vpop.f32.mrf.mxu0  ;;  %v1609_v11 = vpop.f32.mrf.mxu1 }
 0x205   :  { %v1537_v20 = vadd.f32 %v1536_v62, %v4047_v40  ;;  %v853_v62 = vld [vmem:[%s5647_s1 + $0x488] sm:$0xff] }
 0x206   :  { %v4783_v1 = vadd.f32 %v1753_v42, %v1681_v9 }
 0x207   :  { %v1610_v44 = vadd.f32 %v1609_v11, %v1537_v20  ;;  %v855_v11 = vld [vmem:[%s5647_s1 + $0x498] sm:$0xff] }
 0x208   :  { %v1081_v48 = vpack.c.bf16 %v855_v11, %v853_v62  ;;  %v791_v20 = vld [vmem:[%s5647_s1 + $0x298] sm:$0xff]  ;;  %v426_v11 = vmul.f32 %v4625_v14, %v154_v39 }
 0x20a   :  { %2223 = vmatpush.bf16.msrb.mxu2 %v1081_v48 }
 0x20b   :  { %v1682_v27 = vpop.f32.mrf.mxu2  ;;  %v1755_v49 = vpop.f32.mrf.mxu3 }
 0x20c   :  { %v1683_v24 = vadd.f32 %v1682_v27, %v1610_v44  ;;  %v1539_v38 = vpop.f32.mrf.mxu0  ;;  %v1612_v40 = vpop.f32.mrf.mxu1  ;;  %v1049_v44 = vpack.c.bf16 %v791_v20, %v789_v19 }
 0x20d   :  { %v1540_v42 = vadd.f32 %v1539_v38, %v4101_v21  ;;  %v885_v21 = vld [vmem:[%s5647_s1 + $0x588] sm:$0xff]  ;;  %v155_v38 = vld [vmem:[%s5648_s2 + $0x318] sm:$0xff] }
 0x20e   :  { %v4794_v9 = vadd.f32 %v1755_v49, %v1683_v24  ;;  %v1097_v34 = vpack.c.bf16 %v887_v10, %v885_v21  ;;  %2077 = vmatpush.bf16.msrb.mxu0 %v1049_v44  ;;  %v145_v24 = vld [vmem:[%s5648_s2 + $0x2c8] sm:$0xff]  ;;  %v823_v21 = vld [vmem:[%s5647_s1 + $0x398] sm:$0xff]  ;;  %v427_v19 = vmul.f32 %v4630_v22, %v155_v38 }
 0x20f   :  { %v1613_v57 = vadd.f32 %v1612_v40, %v1540_v42  ;;  %1805 = vmatmul.bf16.gmra.mxu0 %v4789_v59  ;;  %2732 = vmatmul.msk.bf16.gmra.mxu1 %vm1158_vm8, %v4791_v17  ;;  %v417_v10 = vmul.f32 %v4630_v22, %v145_v24 }
 0x210   :  { %1951 = vmatmul.bf16.gmra.mxu2 %v3273_v53  ;;  %2024 = vmatmul.bf16.gmra.mxu3 %v3275_v54  ;;  %v144_v54 = vld [vmem:[%s5648_s2 + $0x2c0] sm:$0xff] }
 0x211   :  { %2296 = vmatpush.bf16.msrb.mxu3 %v1097_v34  ;;  %v416_v62 = vmul.f32 %v4625_v14, %v144_v54 }
 0x213   :  { %v1685_v5 = vpop.f32.mrf.mxu2  ;;  %v1758_v53 = vpop.f32.mrf.mxu3  ;;  %v4844_v44 = vpack.c.bf16 %v426_v11, %v416_v62 }
 0x214   :  { %v1686_v25 = vadd.f32 %v1685_v5, %v1613_v57  ;;  %v1541_v27 = vpop.f32.mrf.mxu0  ;;  %v1614_v49 = vpop.f32.mrf.mxu1  ;;  %v821_v57 = vld [vmem:[%s5647_s1 + $0x388] sm:$0xff]  ;;  %v4846_v5 = vpack.c.bf16 %v427_v19, %v417_v10 }
 0x215   :  { %v1542_v40 = vadd.f32 %v1541_v27, %v4119_v45  ;;  %v1065_v45 = vpack.c.bf16 %v823_v21, %v821_v57  ;;  %v174_v57 = vld [vmem:[%s5648_s2 + $0x3b0] sm:$0xff]  ;;  %v165_v21 = vld [vmem:[%s5648_s2 + $0x368] sm:$0xff] }
 0x216   :  { %v4832_v42 = vadd.f32 %v1758_v53, %v1686_v25 }
 0x217   :  { %v1615_v48 = vadd.f32 %v1614_v49, %v1542_v40  ;;  %2150 = vmatpush.bf16.msrb.mxu1 %v1065_v45  ;;  %v164_v40 = vld [vmem:[%s5648_s2 + $0x360] sm:$0xff]  ;;  %v446_v45 = vmul.f32 %v4625_v14, %v174_v57 }
 0x218   :  { %v436_v10 = vmul.f32 %v4625_v14, %v164_v40 }
 0x21a   :  { %v4887_v40 = vpack.c.bf16 %v446_v45, %v436_v10  ;;  %v819_v45 = vld [vmem:[%s5647_s1 + $0x378] sm:$0xff] }
 0x21b   :  { %v1687_v20 = vpop.f32.mrf.mxu2  ;;  %v1760_v34 = vpop.f32.mrf.mxu3 }
 0x21c   :  { %v1688_v53 = vadd.f32 %v1687_v20, %v1615_v48  ;;  %v1544_v54 = vpop.f32.mrf.mxu0  ;;  %v1617_v39 = vpop.f32.mrf.mxu1  ;;  %v437_v20 = vmul.f32 %v4630_v22, %v165_v21 }
 0x21d   :  { %v1545_v25 = vadd.f32 %v1544_v54, %v4149_v33  ;;  %v851_v54 = vld [vmem:[%s5647_s1 + $0x478] sm:$0xff] }
 0x21e   :  { %v4849_v27 = vadd.f32 %v1760_v34, %v1688_v53  ;;  %v849_v53 = vld [vmem:[%s5647_s1 + $0x468] sm:$0xff] }
 0x21f   :  { %v1618_v49 = vadd.f32 %v1617_v39, %v1545_v25  ;;  %1810 = vmatmul.bf16.gmra.mxu0 %v4844_v44  ;;  %2733 = vmatmul.msk.bf16.gmra.mxu1 %vm1158_vm8, %v4846_v5  ;;  %v1079_v39 = vpack.c.bf16 %v851_v54, %v849_v53  ;;  %v883_v25 = vld [vmem:[%s5647_s1 + $0x578] sm:$0xff] }
 0x220   :  { %1956 = vmatmul.bf16.gmra.mxu2 %v3329_v28  ;;  %2029 = vmatmul.bf16.gmra.mxu3 %v3331_v29  ;;  %v175_v28 = vld [vmem:[%s5648_s2 + $0x3b8] sm:$0xff] }
 0x221   :  { %v447_v34 = vmul.f32 %v4630_v22, %v175_v28  ;;  %2224 = vmatpush.bf16.msrb.mxu2 %v1079_v39  ;;  %v787_v53 = vld [vmem:[%s5647_s1 + $0x278] sm:$0xff] }
 0x223   :  { %v1690_v24 = vpop.f32.mrf.mxu2  ;;  %v1763_v38 = vpop.f32.mrf.mxu3 }
 0x224   :  { %v1691_v62 = vadd.f32 %v1690_v24, %v1618_v49  ;;  %v1546_v33 = vpop.f32.mrf.mxu0  ;;  %v1619_v11 = vpop.f32.mrf.mxu1 }
 0x225   :  { %v1547_v29 = vadd.f32 %v1546_v33, %v4179_v55  ;;  %v881_v55 = vld [vmem:[%s5647_s1 + $0x568] sm:$0xff] }
 0x226   :  { %v4869_v48 = vadd.f32 %v1763_v38, %v1691_v62  ;;  %v1095_v49 = vpack.c.bf16 %v883_v25, %v881_v55  ;;  %v4889_v62 = vpack.c.bf16 %v447_v34, %v437_v20  ;;  %v184_v55 = vld [vmem:[%s5648_s2 + $0x400] sm:$0xff] }
 0x227   :  { %v1620_v19 = vadd.f32 %v1619_v11, %v1547_v29  ;;  %v785_v29 = vld [vmem:[%s5647_s1 + $0x268] sm:$0xff] }
 0x228   :  { %2297 = vmatpush.bf16.msrb.mxu3 %v1095_v49 }
 0x22b   :  { %v1692_v24 = vpop.f32.mrf.mxu2  ;;  %v1765_v38 = vpop.f32.mrf.mxu3 }
 0x22c   :  { %v1693_v33 = vadd.f32 %v1692_v24, %v1620_v19  ;;  %v1549_v11 = vpop.f32.mrf.mxu0  ;;  %v1622_v57 = vpop.f32.mrf.mxu1  ;;  %v1047_v19 = vpack.c.bf16 %v787_v53, %v785_v29  ;;  %v194_v24 = vld [vmem:[%s5648_s2 + $0x450] sm:$0xff] }
 0x22d   :  { %v1550_v21 = vadd.f32 %v1549_v11, %v4215_v52  ;;  %v817_v52 = vld [vmem:[%s5647_s1 + $0x368] sm:$0xff]  ;;  %v456_v11 = vmul.f32 %v4625_v14, %v184_v55 }
 0x22e   :  { %v4892_v28 = vadd.f32 %v1765_v38, %v1693_v33  ;;  %v1063_v20 = vpack.c.bf16 %v819_v45, %v817_v52  ;;  %2078 = vmatpush.bf16.msrb.mxu0 %v1047_v19 }
 0x22f   :  { %v1623_v10 = vadd.f32 %v1622_v57, %v1550_v21  ;;  %1815 = vmatmul.bf16.gmra.mxu0 %v4887_v40  ;;  %2734 = vmatmul.msk.bf16.gmra.mxu1 %vm1158_vm8, %v4889_v62  ;;  %v466_v21 = vmul.f32 %v4625_v14, %v194_v24  ;;  %v845_v24 = vld [vmem:[%s5647_s1 + $0x448] sm:$0xff] }
 0x230   :  { %1961 = vmatmul.bf16.gmra.mxu2 %v3397_v4  ;;  %2034 = vmatmul.bf16.gmra.mxu3 %v3399_v6  ;;  %v185_v4 = vld [vmem:[%s5648_s2 + $0x408] sm:$0xff]  ;;  %v195_v6 = vld [vmem:[%s5648_s2 + $0x458] sm:$0xff] }
 0x231   :  { %2151 = vmatpush.bf16.msrb.mxu1 %v1063_v20  ;;  %v457_v29 = vmul.f32 %v4630_v22, %v185_v4  ;;  %v467_v53 = vmul.f32 %v4630_v22, %v195_v6  ;;  %v4930_v52 = vpack.c.bf16 %v466_v21, %v456_v11  ;;  %v877_v4 = vld [vmem:[%s5647_s1 + $0x548] sm:$0xff]  ;;  %v204_v21 = vld [vmem:[%s5648_s2 + $0x4a0] sm:$0xff] }
 0x233   :  { %v1695_v34 = vpop.f32.mrf.mxu2  ;;  %v1768_v54 = vpop.f32.mrf.mxu3  ;;  %5837 = vst [vmem:[#allocation93_spill] sm:$0xff] %v4930_v52  ;;  %v4932_v45 = vpack.c.bf16 %v467_v53, %v457_v29 }
 0x234   :  { %v1696_v39 = vadd.f32 %v1695_v34, %v1623_v10  ;;  %v1551_v25 = vpop.f32.mrf.mxu0  ;;  %v1624_v49 = vpop.f32.mrf.mxu1 }
 0x235   :  { %v1552_v38 = vadd.f32 %v1551_v25, %v4233_v63  ;;  %5838 = vst [vmem:[#allocation94_spill] sm:$0xff] %v4932_v45  ;;  %v5839_v25 = vld [vmem:[#allocation17_spill] sm:$0xff] }
 0x236   :  { %v4924_v33 = vadd.f32 %v1768_v54, %v1696_v39 }
 0x237   :  { %v1625_v57 = vadd.f32 %v1624_v49, %v1552_v38  ;;  %v5840_v49 = vld [vmem:[#allocation18_spill] sm:$0xff] }
 0x238   :  { %v879_v38 = vld [vmem:[%s5647_s1 + $0x558] sm:$0xff] }
 0x239   :  { %v1093_v29 = vpack.c.bf16 %v879_v38, %v877_v4  ;;  %v781_v38 = vld [vmem:[%s5647_s1 + $0x248] sm:$0xff] }
 0x23b   :  { %v1697_v10 = vpop.f32.mrf.mxu2  ;;  %v1770_v19 = vpop.f32.mrf.mxu3  ;;  %2298 = vmatpush.bf16.msrb.mxu3 %v1093_v29 }
 0x23c   :  { %v1698_v20 = vadd.f32 %v1697_v10, %v1625_v57  ;;  %v1554_v34 = vpop.f32.mrf.mxu0  ;;  %v1627_v63 = vpop.f32.mrf.mxu1 }
 0x23d   :  { %v1555_v54 = vadd.f32 %v1554_v34, %v4275_v16  ;;  %v847_v16 = vld [vmem:[%s5647_s1 + $0x458] sm:$0xff]  ;;  %v205_v34 = vld [vmem:[%s5648_s2 + $0x4a8] sm:$0xff] }
 0x23e   :  { %v4935_v39 = vadd.f32 %v1770_v19, %v1698_v20  ;;  %v1077_v6 = vpack.c.bf16 %v847_v16, %v845_v24  ;;  %v214_v20 = vld [vmem:[%s5648_s2 + $0x4f0] sm:$0xff]  ;;  %v477_v16 = vmul.f32 %v4630_v22, %v205_v34 }
 0x23f   :  { %v1628_v55 = vadd.f32 %v1627_v63, %v1555_v54  ;;  %1820 = vmatmul.bf16.gmra.mxu0 %v4930_v52  ;;  %2735 = vmatmul.msk.bf16.gmra.mxu1 %vm1158_vm8, %v4932_v45  ;;  %v215_v63 = vld [vmem:[%s5648_s2 + $0x4f8] sm:$0xff]  ;;  %v486_v24 = vmul.f32 %v4625_v14, %v214_v20  ;;  %v805_v45 = vld [vmem:[%s5647_s1 + $0x308] sm:$0xff] }
 0x240   :  { %1966 = vmatmul.bf16.gmra.mxu2 %v5839_v25  ;;  %2039 = vmatmul.bf16.gmra.mxu3 %v5840_v49  ;;  %v487_v4 = vmul.f32 %v4630_v22, %v215_v63  ;;  %v807_v52 = vld [vmem:[%s5647_s1 + $0x318] sm:$0xff] }
 0x241   :  { %2225 = vmatpush.bf16.msrb.mxu2 %v1077_v6  ;;  %v813_v6 = vld [vmem:[%s5647_s1 + $0x348] sm:$0xff] }
 0x243   :  { %v1700_v11 = vpop.f32.mrf.mxu2  ;;  %v1773_v57 = vpop.f32.mrf.mxu3 }
 0x244   :  { %v1701_v53 = vadd.f32 %v1700_v11, %v1628_v55  ;;  %v1556_v10 = vpop.f32.mrf.mxu0  ;;  %v1629_v19 = vpop.f32.mrf.mxu1  ;;  %v476_v55 = vmul.f32 %v4625_v14, %v204_v21 }
 0x245   :  { %v1557_v54 = vadd.f32 %v1556_v10, %v4299_v41  ;;  %v783_v41 = vld [vmem:[%s5647_s1 + $0x258] sm:$0xff]  ;;  %v4987_v10 = vpack.c.bf16 %v487_v4, %v477_v16  ;;  %v224_v4 = vld [vmem:[%s5648_s2 + $0x540] sm:$0xff] }
 0x246   :  { %v4967_v25 = vadd.f32 %v1773_v57, %v1701_v53  ;;  %v1045_v11 = vpack.c.bf16 %v783_v41, %v781_v38  ;;  %v815_v57 = vld [vmem:[%s5647_s1 + $0x358] sm:$0xff]  ;;  %v4985_v53 = vpack.c.bf16 %v486_v24, %v476_v55  ;;  %v5843_v55 = vld [vmem:[#allocation21_spill] sm:$0xff] }
 0x247   :  { %v1630_v49 = vadd.f32 %v1629_v19, %v1557_v54  ;;  %5842 = vst [vmem:[#allocation18_spill] sm:$0xff] %v4987_v10  ;;  %v1061_v19 = vpack.c.bf16 %v815_v57, %v813_v6  ;;  %v5844_v24 = vld [vmem:[#allocation22_spill] sm:$0xff]  ;;  %v225_v57 = vld [vmem:[%s5648_s2 + $0x548] sm:$0xff] }
 0x248   :  { %5841 = vst [vmem:[#allocation17_spill] sm:$0xff] %v4985_v53  ;;  %2079 = vmatpush.bf16.msrb.mxu0 %v1045_v11  ;;  %v234_v11 = vld [vmem:[%s5648_s2 + $0x590] sm:$0xff] }
 0x249   :  { %2152 = vmatpush.bf16.msrb.mxu1 %v1061_v19  ;;  %v496_v19 = vmul.f32 %v4625_v14, %v224_v4  ;;  %v843_v4 = vld [vmem:[%s5647_s1 + $0x438] sm:$0xff] }
 0x24b   :  { %v1702_v21 = vpop.f32.mrf.mxu2  ;;  %v1775_v29 = vpop.f32.mrf.mxu3 }
 0x24c   :  { %v1703_v20 = vadd.f32 %v1702_v21, %v1630_v49  ;;  %v1559_v34 = vpop.f32.mrf.mxu0  ;;  %v1632_v63 = vpop.f32.mrf.mxu1  ;;  %v235_v21 = vld [vmem:[%s5648_s2 + $0x598] sm:$0xff] }
 0x24d   :  { %v1560_v54 = vadd.f32 %v1559_v34, %v4335_v60  ;;  %v497_v34 = vmul.f32 %v4630_v22, %v225_v57  ;;  %v875_v57 = vld [vmem:[%s5647_s1 + $0x538] sm:$0xff] }
 0x24e   :  { %v4990_v61 = vadd.f32 %v1775_v29, %v1703_v20  ;;  %v506_v20 = vmul.f32 %v4625_v14, %v234_v11 }
 0x24f   :  { %v1633_v38 = vadd.f32 %v1632_v63, %v1560_v54  ;;  %1825 = vmatmul.bf16.gmra.mxu0 %v4985_v53  ;;  %2736 = vmatmul.msk.bf16.gmra.mxu1 %vm1158_vm8, %v4987_v10  ;;  %v507_v63 = vmul.f32 %v4630_v22, %v235_v21 }
 0x250   :  { %1971 = vmatmul.bf16.gmra.mxu2 %v5843_v55  ;;  %2044 = vmatmul.bf16.gmra.mxu3 %v5844_v24  ;;  %v5015_v55 = vpack.c.bf16 %v506_v20, %v496_v19  ;;  %v5847_v20 = vld [vmem:[#allocation25_spill] sm:$0xff] }
 0x251   :  { %v5017_v24 = vpack.c.bf16 %v507_v63, %v497_v34  ;;  %v5848_v34 = vld [vmem:[#allocation26_spill] sm:$0xff] }
 0x252   :  { %5845 = vst [vmem:[#allocation21_spill] sm:$0xff] %v5015_v55  ;;  %v779_v63 = vld [vmem:[%s5647_s1 + $0x238] sm:$0xff] }
 0x253   :  { %v1705_v16 = vpop.f32.mrf.mxu2  ;;  %v1778_v49 = vpop.f32.mrf.mxu3  ;;  %5846 = vst [vmem:[#allocation22_spill] sm:$0xff] %v5017_v24 }
 0x254   :  { %v1706_v60 = vadd.f32 %v1705_v16, %v1633_v38  ;;  %v1561_v41 = vpop.f32.mrf.mxu0  ;;  %v1634_v6 = vpop.f32.mrf.mxu1 }
 0x256   :  { %v5009_v29 = vadd.f32 %v1778_v49, %v1706_v60  ;;  %v841_v49 = vld [vmem:[%s5647_s1 + $0x428] sm:$0xff] }
 0x257   :  { %v873_v60 = vld [vmem:[%s5647_s1 + $0x528] sm:$0xff]  ;;  %v1075_v11 = vpack.c.bf16 %v843_v4, %v841_v49  ;;  %v244_v4 = vld [vmem:[%s5648_s2 + $0x5e0] sm:$0xff] }
 0x258   :  { %v1091_v21 = vpack.c.bf16 %v875_v57, %v873_v60 }
 0x259   :  { %2226 = vmatpush.bf16.msrb.mxu2 %v1075_v11 }
 0x25a   :  { %2299 = vmatpush.bf16.msrb.mxu3 %v1091_v21  ;;  %v254_v21 = vld [vmem:[%s5648_s2 + $0x630] sm:$0xff] }
 0x25b   :  { %v1707_v54 = vpop.f32.mrf.mxu2  ;;  %v1780_v38 = vpop.f32.mrf.mxu3 }
 0x25c   :  { %v1791_v16 = vpop.f32.mrf.mxu0  ;;  %v1864_v41 = vpop.f32.mrf.mxu1  ;;  %v809_v54 = vld [vmem:[%s5647_s1 + $0x328] sm:$0xff] }
 0x25d   :  { %v1792_v6 = vadd.f32 %v1791_v16, %v4401_v12  ;;  %v777_v12 = vld [vmem:[%s5647_s1 + $0x228] sm:$0xff]  ;;  %v811_v16 = vld [vmem:[%s5647_s1 + $0x338] sm:$0xff] }
 0x25e   :  { %v1043_v38 = vpack.c.bf16 %v779_v63, %v777_v12  ;;  %v1059_v60 = vpack.c.bf16 %v811_v16, %v809_v54  ;;  %v516_v63 = vmul.f32 %v4625_v14, %v244_v4  ;;  %v526_v16 = vmul.f32 %v4625_v14, %v254_v21  ;;  %v5853_v21 = vld [vmem:[#allocation29_spill] sm:$0xff] }
 0x25f   :  { %v1865_v19 = vadd.f32 %v1864_v41, %v1792_v6  ;;  %1830 = vmatmul.bf16.gmra.mxu0 %v5015_v55  ;;  %2737 = vmatmul.msk.bf16.gmra.mxu1 %vm1158_vm8, %v5017_v24 }
 0x260   :  { %1976 = vmatmul.bf16.gmra.mxu2 %v5847_v20  ;;  %2049 = vmatmul.bf16.gmra.mxu3 %v5848_v34  ;;  %v255_v20 = vld [vmem:[%s5648_s2 + $0x638] sm:$0xff]  ;;  %v5849_v34 = vld [vmem:[#allocation85_spill] sm:$0xff]  ;;  %v5068_v10 = vpack.c.bf16 %v526_v16, %v516_v63 }
 0x261   :  { %2658 = vst [vmem:[#allocation2] sm:$0xff] %v1865_v19  ;;  %v245_v19 = vld [vmem:[%s5648_s2 + $0x5e8] sm:$0xff]  ;;  %2080 = vmatpush.bf16.msrb.mxu0 %v1043_v38  ;;  %2153 = vmatpush.bf16.msrb.mxu1 %v1059_v60  ;;  %v274_v16 = vld [vmem:[%s5648_s2 + $0x6d0] sm:$0xff] }
 0x262   :  { %5850 = vst [vmem:[#allocation25_spill] sm:$0xff] %v5068_v10 }
 0x263   :  { %v1937_v41 = vpop.f32.mrf.mxu2  ;;  %v2010_v49 = vpop.f32.mrf.mxu3 }
 0x264   :  { %v5052_v6 = vadd.f32 %v2010_v49, %v1937_v41  ;;  %v1793_v11 = vpop.f32.mrf.mxu0  ;;  %v1866_v57 = vpop.f32.mrf.mxu1  ;;  %v517_v41 = vmul.f32 %v4630_v22, %v245_v19  ;;  %v527_v49 = vmul.f32 %v4630_v22, %v255_v20  ;;  %v5854_v19 = vld [vmem:[#allocation30_spill] sm:$0xff] }
 0x265   :  { %v1794_v12 = vadd.f32 %v1793_v11, %v5849_v34  ;;  %v5852_v34 = vld [vmem:[#allocation86_spill] sm:$0xff] }
 0x266   :  { %v5070_v53 = vpack.c.bf16 %v527_v49, %v517_v41  ;;  %v265_v41 = vld [vmem:[%s5648_s2 + $0x688] sm:$0xff]  ;;  %v275_v49 = vld [vmem:[%s5648_s2 + $0x6d8] sm:$0xff] }
 0x267   :  { %v1867_v54 = vadd.f32 %v1866_v57, %v1794_v12 }
 0x268   :  { %5851 = vst [vmem:[#allocation26_spill] sm:$0xff] %v5070_v53 }
 0x269   :  { %2661 = vst [vmem:[#allocation2 + $0x10] sm:$0xff] %v1867_v54 }
 0x26b   :  { %v1939_v24 = vpop.f32.mrf.mxu2  ;;  %v2012_v55 = vpop.f32.mrf.mxu3 }
 0x26c   :  { %v5072_v38 = vadd.f32 %v2012_v55, %v1939_v24  ;;  %v1796_v11 = vpop.f32.mrf.mxu0  ;;  %v1869_v60 = vpop.f32.mrf.mxu1  ;;  %v264_v55 = vld [vmem:[%s5648_s2 + $0x680] sm:$0xff] }
 0x26d   :  { %v1797_v4 = vadd.f32 %v1796_v11, %v5852_v34 }
 0x26f   :  { %v1870_v57 = vadd.f32 %v1869_v60, %v1797_v4  ;;  %1835 = vmatmul.bf16.gmra.mxu0 %v5068_v10  ;;  %2738 = vmatmul.msk.bf16.gmra.mxu1 %vm1158_vm8, %v5070_v53  ;;  %v536_v60 = vmul.f32 %v4625_v14, %v264_v55  ;;  %v546_v4 = vmul.f32 %v4625_v14, %v274_v16  ;;  %v871_v55 = vld [vmem:[%s5647_s1 + $0x518] sm:$0xff] }
 0x270   :  { %1981 = vmatmul.bf16.gmra.mxu2 %v5853_v21  ;;  %2054 = vmatmul.bf16.gmra.mxu3 %v5854_v19  ;;  %v547_v21 = vmul.f32 %v4630_v22, %v275_v49  ;;  %v837_v19 = vld [vmem:[%s5647_s1 + $0x408] sm:$0xff] }
 0x271   :  { %2663 = vst [vmem:[#allocation2 + $0x20] sm:$0xff] %v1870_v57  ;;  %v537_v57 = vmul.f32 %v4630_v22, %v265_v41  ;;  %v5117_v49 = vpack.c.bf16 %v546_v4, %v536_v60  ;;  %v1057_v4 = vpack.c.bf16 %v807_v52, %v805_v45 }
 0x273   :  { %v1942_v20 = vpop.f32.mrf.mxu2  ;;  %v2015_v12 = vpop.f32.mrf.mxu3  ;;  %2154 = vmatpush.bf16.msrb.mxu1 %v1057_v4 }
 0x274   :  { %v5083_v24 = vadd.f32 %v2015_v12, %v1942_v20  ;;  %v1798_v63 = vpop.f32.mrf.mxu0  ;;  %v1871_v54 = vpop.f32.mrf.mxu1  ;;  %v839_v20 = vld [vmem:[%s5647_s1 + $0x418] sm:$0xff] }
 0x275   :  { %v1799_v11 = vadd.f32 %v1798_v63, %v4491_v32  ;;  %v869_v32 = vld [vmem:[%s5647_s1 + $0x508] sm:$0xff]  ;;  %v1073_v12 = vpack.c.bf16 %v839_v20, %v837_v19 }
 0x276   :  { %v773_v63 = vld [vmem:[%s5647_s1 + $0x208] sm:$0xff] }
 0x277   :  { %v1872_v34 = vadd.f32 %v1871_v54, %v1799_v11  ;;  %v775_v54 = vld [vmem:[%s5647_s1 + $0x218] sm:$0xff]  ;;  %v5119_v11 = vpack.c.bf16 %v547_v21, %v537_v57  ;;  %2227 = vmatpush.bf16.msrb.mxu2 %v1073_v12  ;;  %v5856_v21 = vld [vmem:[#allocation33_spill] sm:$0xff] }
 0x278   :  { %v1041_v19 = vpack.c.bf16 %v775_v54, %v773_v63  ;;  %v285_v63 = vld [vmem:[%s5648_s2 + $0x728] sm:$0xff]  ;;  %v295_v54 = vld [vmem:[%s5648_s2 + $0x778] sm:$0xff] }
 0x279   :  { %2665 = vst [vmem:[#allocation2 + $0x30] sm:$0xff] %v1872_v34  ;;  %v1089_v34 = vpack.c.bf16 %v871_v55, %v869_v32  ;;  %v5857_v32 = vld [vmem:[#allocation34_spill] sm:$0xff]  ;;  %v567_v4 = vmul.f32 %v4630_v22, %v295_v54 }
 0x27a   :  { %5855 = vst [vmem:[#allocation85_spill] sm:$0xff] %v5119_v11  ;;  %2081 = vmatpush.bf16.msrb.mxu0 %v1041_v19  ;;  %v995_v54 = vld [vmem:[%s5647_s1 + $0x8f8] sm:$0xff] }
 0x27b   :  { %v1944_v16 = vpop.f32.mrf.mxu2  ;;  %v2017_v41 = vpop.f32.mrf.mxu3  ;;  %2300 = vmatpush.bf16.msrb.mxu3 %v1089_v34 }
 0x27c   :  { %v5121_v20 = vadd.f32 %v2017_v41, %v1944_v16  ;;  %v1801_v53 = vpop.f32.mrf.mxu0  ;;  %v1874_v10 = vpop.f32.mrf.mxu1 }
 0x27d   :  { %v1802_v60 = vadd.f32 %v1801_v53, %v4525_v15  ;;  %v284_v15 = vld [vmem:[%s5648_s2 + $0x720] sm:$0xff] }
 0x27e   :  { %v556_v41 = vmul.f32 %v4625_v14, %v284_v15 }
 0x27f   :  { %v1875_v57 = vadd.f32 %v1874_v10, %v1802_v60  ;;  %1840 = vmatmul.bf16.gmra.mxu0 %v5117_v49  ;;  %2739 = vmatmul.msk.bf16.gmra.mxu1 %vm1158_vm8, %v5119_v11  ;;  %v294_v10 = vld [vmem:[%s5648_s2 + $0x770] sm:$0xff]  ;;  %v557_v60 = vmul.f32 %v4630_v22, %v285_v63  ;;  %v993_v63 = vld [vmem:[%s5647_s1 + $0x8e8] sm:$0xff] }
 0x280   :  { %1986 = vmatmul.bf16.gmra.mxu2 %v5856_v21  ;;  %2059 = vmatmul.bf16.gmra.mxu3 %v5857_v32  ;;  %v566_v19 = vmul.f32 %v4625_v14, %v294_v10  ;;  %v5859_v10 = vld [vmem:[#allocation38_spill] sm:$0xff] }
 0x281   :  { %2667 = vst [vmem:[#allocation2 + $0x40] sm:$0xff] %v1875_v57 }
 0x282   :  { %v5154_v32 = vpack.c.bf16 %v566_v19, %v556_v41  ;;  %v304_v19 = vld [vmem:[%s5648_s2 + $0x7c0] sm:$0xff] }
 0x283   :  { %v1947_v12 = vpop.f32.mrf.mxu2  ;;  %v2020_v55 = vpop.f32.mrf.mxu3 }
 0x284   :  { %v5138_v53 = vadd.f32 %v2020_v55, %v1947_v12  ;;  %v1803_v52 = vpop.f32.mrf.mxu0  ;;  %v1876_v45 = vpop.f32.mrf.mxu1  ;;  %v5156_v12 = vpack.c.bf16 %v567_v4, %v557_v60 }
 0x285   :  { %v1804_v16 = vadd.f32 %v1803_v52, %v4548_v35 }
 0x287   :  { %v1877_v34 = vadd.f32 %v1876_v45, %v1804_v16  ;;  %v5858_v45 = vld [vmem:[#allocation37_spill] sm:$0xff]  ;;  %v1007_v16 = vld [vmem:[%s5647_s1 + $0x958] sm:$0xff] }
 0x289   :  { %2669 = vst [vmem:[#allocation2 + $0x50] sm:$0xff] %v1877_v34 }
 0x28b   :  { %v1949_v57 = vpop.f32.mrf.mxu2  ;;  %v2022_v21 = vpop.f32.mrf.mxu3 }
 0x28c   :  { %v5158_v55 = vadd.f32 %v2022_v21, %v1949_v57  ;;  %v1806_v11 = vpop.f32.mrf.mxu0  ;;  %v1879_v35 = vpop.f32.mrf.mxu1 }
 0x28d   :  { %v1807_v15 = vadd.f32 %v1806_v11, %v4581_v26  ;;  %v1005_v26 = vld [vmem:[%s5647_s1 + $0x948] sm:$0xff]  ;;  %v1151_v11 = vpack.c.bf16 %v995_v54, %v993_v63  ;;  %v576_v54 = vmul.f32 %v4625_v14, %v304_v19 }
 0x28e   :  { %v1157_v60 = vpack.c.bf16 %v1007_v16, %v1005_v26  ;;  %v963_v16 = vld [vmem:[%s5647_s1 + $0x7f8] sm:$0xff] }
 0x28f   :  { %v1880_v52 = vadd.f32 %v1879_v35, %v1807_v15  ;;  %1845 = vmatmul.bf16.gmra.mxu0 %v5154_v32  ;;  %2740 = vmatmul.msk.bf16.gmra.mxu1 %vm1158_vm8, %v5156_v12  ;;  %v305_v35 = vld [vmem:[%s5648_s2 + $0x7c8] sm:$0xff] }
 0x290   :  { %1991 = vmatmul.bf16.gmra.mxu2 %v5858_v45  ;;  %2064 = vmatmul.bf16.gmra.mxu3 %v5859_v10  ;;  %v929_v15 = vld [vmem:[%s5647_s1 + $0x6e8] sm:$0xff]  ;;  %v577_v26 = vmul.f32 %v4630_v22, %v305_v35 }
 0x291   :  { %2671 = vst [vmem:[#allocation2 + $0x60] sm:$0xff] %v1880_v52  ;;  %2512 = vmatpush.bf16.msra.mxu2 %v1151_v11  ;;  %v931_v52 = vld [vmem:[%s5647_s1 + $0x6f8] sm:$0xff]  ;;  %2590 = vmatpush.bf16.msra.mxu3 %v1157_v60  ;;  %v961_v11 = vld [vmem:[%s5647_s1 + $0x7e8] sm:$0xff]  ;;  %v5201_v60 = vpack.c.bf16 %v576_v54, %v576_v54 }
 0x292   :  { %v1119_v10 = vpack.c.bf16 %v931_v52, %v929_v15  ;;  %v5862_v15 = vld [vmem:[#allocation41_spill] sm:$0xff]  ;;  %v5863_v52 = vld [vmem:[#allocation42_spill] sm:$0xff] }
 0x293   :  { %v1952_v41 = vpop.f32.mrf.mxu2  ;;  %v2025_v34 = vpop.f32.mrf.mxu3  ;;  %5860 = vst [vmem:[#allocation86_spill] sm:$0xff] %v5201_v60 }
 0x294   :  { %v5181_v4 = vadd.f32 %v2025_v34, %v1952_v41  ;;  %v1808_v57 = vpop.f32.mrf.mxu0  ;;  %v1881_v21 = vpop.f32.mrf.mxu1  ;;  %2366 = vmatpush.bf16.msra.mxu0 %v1119_v10  ;;  %v1135_v41 = vpack.c.bf16 %v963_v16, %v961_v11  ;;  %v989_v16 = vld [vmem:[%s5647_s1 + $0x8c8] sm:$0xff] }
 0x295   :  { %v1809_v45 = vadd.f32 %v1808_v57, %v4619_v30  ;;  %v5203_v57 = vpack.c.bf16 %v577_v26, %v577_v26 }
 0x296   :  { %2439 = vmatpush.bf16.msra.mxu1 %v1135_v41  ;;  %v991_v41 = vld [vmem:[%s5647_s1 + $0x8d8] sm:$0xff] }
 0x297   :  { %v1882_v63 = vadd.f32 %v1881_v21, %v1809_v45  ;;  %5861 = vst [vmem:[#allocation29_spill] sm:$0xff] %v5203_v57 }
 0x299   :  { %2673 = vst [vmem:[#allocation2 + $0x70] sm:$0xff] %v1882_v63 }
 0x29b   :  { %v1954_v34 = vpop.f32.mrf.mxu2  ;;  %v2027_v30 = vpop.f32.mrf.mxu3 }
 0x29c   :  { %v5205_v14 = vadd.f32 %v2027_v30, %v1954_v34  ;;  %v1811_v22 = vpop.f32.mrf.mxu0  ;;  %v1884_v19 = vpop.f32.mrf.mxu1  ;;  %v1149_v34 = vpack.c.bf16 %v991_v41, %v989_v16  ;;  %v959_v16 = vld [vmem:[%s5647_s1 + $0x7d8] sm:$0xff] }
 0x29d   :  { %v1812_v21 = vadd.f32 %v1811_v22, %v4642_v13 }
 0x29e   :  { %2513 = vmatpush.bf16.msra.mxu2 %v1149_v34 }
 0x29f   :  { %v1885_v35 = vadd.f32 %v1884_v19, %v1812_v21  ;;  %1850 = vmatmul.bf16.gmra.mxu0 %v5201_v60  ;;  %2741 = vmatmul.msk.bf16.gmra.mxu1 %vm1158_vm8, %v5203_v57  ;;  %v5882_v60 = vld [vmem:[#allocation61_spill] sm:$0xff] }
 0x2a0   :  { %1996 = vmatmul.bf16.gmra.mxu2 %v5862_v15  ;;  %2069 = vmatmul.bf16.gmra.mxu3 %v5863_v52  ;;  %v5864_v52 = vld [vmem:[#allocation5_spill] sm:$0xff] }
 0x2a1   :  { %2675 = vst [vmem:[#allocation2 + $0x80] sm:$0xff] %v1885_v35 }
 0x2a3   :  { %v1957_v45 = vpop.f32.mrf.mxu2  ;;  %v2030_v10 = vpop.f32.mrf.mxu3 }
 0x2a4   :  { %v5213_v63 = vadd.f32 %v2030_v10, %v1957_v45  ;;  %v1813_v54 = vpop.f32.mrf.mxu0  ;;  %v1886_v26 = vpop.f32.mrf.mxu1  ;;  %v5865_v45 = vld [vmem:[#allocation6_spill] sm:$0xff]  ;;  %v5866_v10 = vld [vmem:[#allocation45_spill] sm:$0xff] }
 0x2a5   :  { %v1814_v11 = vadd.f32 %v1813_v54, %v4665_v18  ;;  %v5867_v54 = vld [vmem:[#allocation46_spill] sm:$0xff] }
 0x2a7   :  { %v1887_v13 = vadd.f32 %v1886_v26, %v1814_v11  ;;  %v925_v26 = vld [vmem:[%s5647_s1 + $0x6c8] sm:$0xff]  ;;  %v927_v11 = vld [vmem:[%s5647_s1 + $0x6d8] sm:$0xff] }
 0x2a9   :  { %2677 = vst [vmem:[#allocation2 + $0x90] sm:$0xff] %v1887_v13  ;;  %v1117_v13 = vpack.c.bf16 %v927_v11, %v925_v26 }
 0x2ab   :  { %v1959_v30 = vpop.f32.mrf.mxu2  ;;  %v2032_v22 = vpop.f32.mrf.mxu3  ;;  %2367 = vmatpush.bf16.msra.mxu0 %v1117_v13  ;;  %v5871_v13 = vld [vmem:[#allocation50_spill] sm:$0xff] }
 0x2ac   :  { %v5222_v19 = vadd.f32 %v2032_v22, %v1959_v30  ;;  %v1816_v21 = vpop.f32.mrf.mxu0  ;;  %v1889_v35 = vpop.f32.mrf.mxu1 }
 0x2ad   :  { %v1817_v18 = vadd.f32 %v1816_v21, %v4697_v58  ;;  %v957_v58 = vld [vmem:[%s5647_s1 + $0x7c8] sm:$0xff] }
 0x2ae   :  { %v1133_v30 = vpack.c.bf16 %v959_v16, %v957_v58  ;;  %v5868_v58 = vld [vmem:[#allocation7_spill] sm:$0xff]  ;;  %v5869_v16 = vld [vmem:[#allocation8_spill] sm:$0xff] }
 0x2af   :  { %v1890_v15 = vadd.f32 %v1889_v35, %v1817_v18  ;;  %2082 = vmatmul.bf16.vlgmr.msrb.gmra.mxu0 %v5864_v52  ;;  %2155 = vmatmul.bf16.vlgmr.msrb.gmra.mxu1 %v5865_v45 }
 0x2b0   :  { %2228 = vmatmul.bf16.vlgmr.msrb.gmra.mxu2 %v5866_v10  ;;  %2301 = vmatmul.bf16.vlgmr.msrb.gmra.mxu3 %v5867_v54 }
 0x2b1   :  { %2679 = vst [vmem:[#allocation2 + $0xa0] sm:$0xff] %v1890_v15  ;;  %2440 = vmatpush.bf16.msra.mxu1 %v1133_v30 }
 0x2b3   :  { %v1962_v41 = vpop.f32.mrf.mxu2  ;;  %v2035_v34 = vpop.f32.mrf.mxu3 }
 0x2b4   :  { %v5241_v22 = vadd.f32 %v2035_v34, %v1962_v41  ;;  %v1818_v21 = vpop.f32.mrf.mxu0  ;;  %v1891_v35 = vpop.f32.mrf.mxu1  ;;  %v5870_v41 = vld [vmem:[#allocation49_spill] sm:$0xff] }
 0x2b5   :  { %v1819_v18 = vadd.f32 %v1818_v21, %v4708_v23 }
 0x2b7   :  { %v1892_v15 = vadd.f32 %v1891_v35, %v1819_v18  ;;  %v987_v18 = vld [vmem:[%s5647_s1 + $0x8b8] sm:$0xff] }
 0x2b9   :  { %2681 = vst [vmem:[#allocation2 + $0xb0] sm:$0xff] %v1892_v15 }
 0x2bb   :  { %v1964_v52 = vpop.f32.mrf.mxu2  ;;  %v2037_v45 = vpop.f32.mrf.mxu3 }
 0x2bc   :  { %v5244_v10 = vadd.f32 %v2037_v45, %v1964_v52  ;;  %v1821_v54 = vpop.f32.mrf.mxu0  ;;  %v1894_v26 = vpop.f32.mrf.mxu1 }
 0x2bd   :  { %v1822_v11 = vadd.f32 %v1821_v54, %v4728_v51  ;;  %v985_v51 = vld [vmem:[%s5647_s1 + $0x8a8] sm:$0xff]  ;;  %v923_v54 = vld [vmem:[%s5647_s1 + $0x6b8] sm:$0xff] }
 0x2be   :  { %v1147_v52 = vpack.c.bf16 %v987_v18, %v985_v51  ;;  %v5872_v51 = vld [vmem:[#allocation9_spill] sm:$0xff]  ;;  %v5873_v18 = vld [vmem:[#allocation10_spill] sm:$0xff] }
 0x2bf   :  { %v1895_v57 = vadd.f32 %v1894_v26, %v1822_v11  ;;  %2087 = vmatmul.bf16.gmra.mxu0 %v5868_v58  ;;  %2160 = vmatmul.bf16.gmra.mxu1 %v5869_v16  ;;  %v953_v26 = vld [vmem:[%s5647_s1 + $0x7a8] sm:$0xff] }
 0x2c0   :  { %2233 = vmatmul.bf16.gmra.mxu2 %v5870_v41  ;;  %2306 = vmatmul.bf16.gmra.mxu3 %v5871_v13 }
 0x2c1   :  { %2683 = vst [vmem:[#allocation2 + $0xc0] sm:$0xff] %v1895_v57  ;;  %2514 = vmatpush.bf16.msra.mxu2 %v1147_v52  ;;  %v921_v57 = vld [vmem:[%s5647_s1 + $0x6a8] sm:$0xff]  ;;  %v5875_v52 = vld [vmem:[#allocation54_spill] sm:$0xff] }
 0x2c2   :  { %v1115_v11 = vpack.c.bf16 %v923_v54, %v921_v57 }
 0x2c3   :  { %v1967_v23 = vpop.f32.mrf.mxu2  ;;  %v2040_v34 = vpop.f32.mrf.mxu3 }
 0x2c4   :  { %v5251_v30 = vadd.f32 %v2040_v34, %v1967_v23  ;;  %v1823_v21 = vpop.f32.mrf.mxu0  ;;  %v1896_v35 = vpop.f32.mrf.mxu1  ;;  %2368 = vmatpush.bf16.msra.mxu0 %v1115_v11 }
 0x2c5   :  { %v1824_v15 = vadd.f32 %v1823_v21, %v4763_v7  ;;  %v955_v7 = vld [vmem:[%s5647_s1 + $0x7b8] sm:$0xff] }
 0x2c6   :  { %v1131_v41 = vpack.c.bf16 %v955_v7, %v953_v26 }
 0x2c7   :  { %v1897_v45 = vadd.f32 %v1896_v35, %v1824_v15  ;;  %v5874_v15 = vld [vmem:[#allocation53_spill] sm:$0xff] }
 0x2c8   :  { %2441 = vmatpush.bf16.msra.mxu1 %v1131_v41 }
 0x2c9   :  { %2685 = vst [vmem:[#allocation2 + $0xd0] sm:$0xff] %v1897_v45 }
 0x2cb   :  { %v1969_v58 = vpop.f32.mrf.mxu2  ;;  %v2042_v16 = vpop.f32.mrf.mxu3 }
 0x2cc   :  { %v5272_v13 = vadd.f32 %v2042_v16, %v1969_v58  ;;  %v1826_v23 = vpop.f32.mrf.mxu0  ;;  %v1899_v34 = vpop.f32.mrf.mxu1  ;;  %v1001_v58 = vld [vmem:[%s5647_s1 + $0x928] sm:$0xff]  ;;  %v1003_v16 = vld [vmem:[%s5647_s1 + $0x938] sm:$0xff] }
 0x2cd   :  { %v1827_v21 = vadd.f32 %v1826_v23, %v4783_v1  ;;  %v1155_v41 = vpack.c.bf16 %v1003_v16, %v1001_v58 }
 0x2cf   :  { %v1900_v35 = vadd.f32 %v1899_v34, %v1827_v21  ;;  %2092 = vmatmul.bf16.gmra.mxu0 %v5872_v51  ;;  %2165 = vmatmul.bf16.gmra.mxu1 %v5873_v18 }
 0x2d0   :  { %2238 = vmatmul.bf16.gmra.mxu2 %v5874_v15  ;;  %2311 = vmatmul.bf16.gmra.mxu3 %v5875_v52  ;;  %v5876_v15 = vld [vmem:[#allocation11_spill] sm:$0xff]  ;;  %v5877_v52 = vld [vmem:[#allocation12_spill] sm:$0xff] }
 0x2d1   :  { %2687 = vst [vmem:[#allocation2 + $0xe0] sm:$0xff] %v1900_v35  ;;  %2591 = vmatpush.bf16.msra.mxu3 %v1155_v41 }
 0x2d3   :  { %v1972_v45 = vpop.f32.mrf.mxu2  ;;  %v2045_v57 = vpop.f32.mrf.mxu3 }
 0x2d4   :  { %v5279_v54 = vadd.f32 %v2045_v57, %v1972_v45  ;;  %v1828_v26 = vpop.f32.mrf.mxu0  ;;  %v1901_v7 = vpop.f32.mrf.mxu1  ;;  %v5878_v45 = vld [vmem:[#allocation57_spill] sm:$0xff]  ;;  %v5879_v57 = vld [vmem:[#allocation58_spill] sm:$0xff] }
 0x2d5   :  { %v1829_v11 = vadd.f32 %v1828_v26, %v4794_v9  ;;  %v981_v26 = vld [vmem:[%s5647_s1 + $0x888] sm:$0xff] }
 0x2d7   :  { %v1902_v1 = vadd.f32 %v1901_v7, %v1829_v11  ;;  %v983_v7 = vld [vmem:[%s5647_s1 + $0x898] sm:$0xff] }
 0x2d8   :  { %v1145_v11 = vpack.c.bf16 %v983_v7, %v981_v26 }
 0x2d9   :  { %2689 = vst [vmem:[#allocation2 + $0xf0] sm:$0xff] %v1902_v1  ;;  %v919_v1 = vld [vmem:[%s5647_s1 + $0x698] sm:$0xff] }
 0x2da   :  { %2515 = vmatpush.bf16.msra.mxu2 %v1145_v11 }
 0x2db   :  { %v1974_v23 = vpop.f32.mrf.mxu2  ;;  %v2047_v34 = vpop.f32.mrf.mxu3 }
 0x2dc   :  { %v5288_v21 = vadd.f32 %v2047_v34, %v1974_v23  ;;  %v1831_v35 = vpop.f32.mrf.mxu0  ;;  %v1904_v51 = vpop.f32.mrf.mxu1 }
 0x2dd   :  { %v1832_v9 = vadd.f32 %v1831_v35, %v4832_v42  ;;  %v917_v42 = vld [vmem:[%s5647_s1 + $0x688] sm:$0xff] }
 0x2de   :  { %v1113_v41 = vpack.c.bf16 %v919_v1, %v917_v42 }
 0x2df   :  { %v1905_v18 = vadd.f32 %v1904_v51, %v1832_v9  ;;  %2097 = vmatmul.bf16.gmra.mxu0 %v5876_v15  ;;  %2170 = vmatmul.bf16.gmra.mxu1 %v5877_v52  ;;  %v949_v51 = vld [vmem:[%s5647_s1 + $0x788] sm:$0xff]  ;;  %v951_v9 = vld [vmem:[%s5647_s1 + $0x798] sm:$0xff] }
 0x2e0   :  { %2243 = vmatmul.bf16.gmra.mxu2 %v5878_v45  ;;  %2316 = vmatmul.bf16.gmra.mxu3 %v5879_v57  ;;  %v1129_v15 = vpack.c.bf16 %v951_v9, %v949_v51 }
 0x2e1   :  { %2691 = vst [vmem:[#allocation2 + $0x100] sm:$0xff] %v1905_v18  ;;  %2369 = vmatpush.bf16.msra.mxu0 %v1113_v41 }
 0x2e2   :  { %2442 = vmatpush.bf16.msra.mxu1 %v1129_v15 }
 0x2e3   :  { %v1977_v58 = vpop.f32.mrf.mxu2  ;;  %v2050_v16 = vpop.f32.mrf.mxu3 }
 0x2e4   :  { %v5307_v23 = vadd.f32 %v2050_v16, %v1977_v58  ;;  %v1833_v34 = vpop.f32.mrf.mxu0  ;;  %v1906_v35 = vpop.f32.mrf.mxu1  ;;  %v5880_v58 = vld [vmem:[#allocation13_spill] sm:$0xff]  ;;  %v5881_v16 = vld [vmem:[#allocation14_spill] sm:$0xff] }
 0x2e5   :  { %v1834_v18 = vadd.f32 %v1833_v34, %v4849_v27  ;;  %v5883_v27 = vld [vmem:[#allocation62_spill] sm:$0xff] }
 0x2e7   :  { %v1907_v52 = vadd.f32 %v1906_v35, %v1834_v18 }
 0x2e9   :  { %2693 = vst [vmem:[#allocation2 + $0x110] sm:$0xff] %v1907_v52 }
 0x2eb   :  { %v1979_v45 = vpop.f32.mrf.mxu2  ;;  %v2052_v57 = vpop.f32.mrf.mxu3 }
 0x2ec   :  { %v5316_v26 = vadd.f32 %v2052_v57, %v1979_v45  ;;  %v1836_v7 = vpop.f32.mrf.mxu0  ;;  %v1909_v42 = vpop.f32.mrf.mxu1 }
 0x2ed   :  { %v1837_v11 = vadd.f32 %v1836_v7, %v4869_v48  ;;  %v977_v48 = vld [vmem:[%s5647_s1 + $0x868] sm:$0xff] }
 0x2ef   :  { %v1910_v1 = vadd.f32 %v1909_v42, %v1837_v11  ;;  %2102 = vmatmul.bf16.gmra.mxu0 %v5880_v58  ;;  %2175 = vmatmul.bf16.gmra.mxu1 %v5881_v16 }
 0x2f0   :  { %2248 = vmatmul.bf16.gmra.mxu2 %v5882_v60  ;;  %2321 = vmatmul.bf16.gmra.mxu3 %v5883_v27  ;;  %v979_v60 = vld [vmem:[%s5647_s1 + $0x878] sm:$0xff] }
 0x2f1   :  { %2695 = vst [vmem:[#allocation2 + $0x120] sm:$0xff] %v1910_v1  ;;  %v1143_v52 = vpack.c.bf16 %v979_v60, %v977_v48  ;;  %v915_v1 = vld [vmem:[%s5647_s1 + $0x678] sm:$0xff] }
 0x2f3   :  { %v1982_v41 = vpop.f32.mrf.mxu2  ;;  %v2055_v34 = vpop.f32.mrf.mxu3  ;;  %2516 = vmatpush.bf16.msra.mxu2 %v1143_v52 }
 0x2f4   :  { %v5323_v35 = vadd.f32 %v2055_v34, %v1982_v41  ;;  %v1838_v51 = vpop.f32.mrf.mxu0  ;;  %v1911_v9 = vpop.f32.mrf.mxu1  ;;  %v5884_v41 = vld [vmem:[#allocation15_spill] sm:$0xff]  ;;  %v5885_v34 = vld [vmem:[#allocation16_spill] sm:$0xff] }
 0x2f5   :  { %v1839_v18 = vadd.f32 %v1838_v51, %v4892_v28  ;;  %v913_v28 = vld [vmem:[%s5647_s1 + $0x668] sm:$0xff]  ;;  %v5886_v51 = vld [vmem:[#allocation65_spill] sm:$0xff] }
 0x2f6   :  { %v1111_v16 = vpack.c.bf16 %v915_v1, %v913_v28 }
 0x2f7   :  { %v1912_v15 = vadd.f32 %v1911_v9, %v1839_v18  ;;  %v5887_v9 = vld [vmem:[#allocation66_spill] sm:$0xff]  ;;  %v945_v18 = vld [vmem:[%s5647_s1 + $0x768] sm:$0xff] }
 0x2f8   :  { %2370 = vmatpush.bf16.msra.mxu0 %v1111_v16 }
 0x2f9   :  { %2697 = vst [vmem:[#allocation2 + $0x130] sm:$0xff] %v1912_v15 }
 0x2fb   :  { %v1984_v45 = vpop.f32.mrf.mxu2  ;;  %v2057_v57 = vpop.f32.mrf.mxu3 }
 0x2fc   :  { %v5332_v7 = vadd.f32 %v2057_v57, %v1984_v45  ;;  %v1841_v42 = vpop.f32.mrf.mxu0  ;;  %v1914_v11 = vpop.f32.mrf.mxu1 }
 0x2fd   :  { %v1842_v58 = vadd.f32 %v1841_v42, %v4924_v33  ;;  %v947_v33 = vld [vmem:[%s5647_s1 + $0x778] sm:$0xff] }
 0x2fe   :  { %v1127_v15 = vpack.c.bf16 %v947_v33, %v945_v18  ;;  %v5890_v18 = vld [vmem:[#allocation69_spill] sm:$0xff]  ;;  %v5891_v33 = vld [vmem:[#allocation70_spill] sm:$0xff] }
 0x2ff   :  { %v1915_v27 = vadd.f32 %v1914_v11, %v1842_v58  ;;  %2107 = vmatmul.bf16.gmra.mxu0 %v5884_v41  ;;  %2180 = vmatmul.bf16.gmra.mxu1 %v5885_v34 }
 0x300   :  { %2253 = vmatmul.bf16.gmra.mxu2 %v5886_v51  ;;  %2326 = vmatmul.bf16.gmra.mxu3 %v5887_v9  ;;  %v5888_v51 = vld [vmem:[#allocation19_spill] sm:$0xff]  ;;  %v5889_v9 = vld [vmem:[#allocation20_spill] sm:$0xff] }
 0x301   :  { %2699 = vst [vmem:[#allocation2 + $0x140] sm:$0xff] %v1915_v27  ;;  %2443 = vmatpush.bf16.msra.mxu1 %v1127_v15  ;;  %v975_v15 = vld [vmem:[%s5647_s1 + $0x858] sm:$0xff] }
 0x303   :  { %v1987_v48 = vpop.f32.mrf.mxu2  ;;  %v2060_v60 = vpop.f32.mrf.mxu3 }
 0x304   :  { %v5351_v52 = vadd.f32 %v2060_v60, %v1987_v48  ;;  %v1843_v45 = vpop.f32.mrf.mxu0  ;;  %v1916_v57 = vpop.f32.mrf.mxu1 }
 0x305   :  { %v1844_v42 = vadd.f32 %v1843_v45, %v4935_v39  ;;  %v973_v39 = vld [vmem:[%s5647_s1 + $0x848] sm:$0xff] }
 0x306   :  { %v1141_v48 = vpack.c.bf16 %v975_v15, %v973_v39 }
 0x307   :  { %v1917_v11 = vadd.f32 %v1916_v57, %v1844_v42 }
 0x308   :  { %2517 = vmatpush.bf16.msra.mxu2 %v1141_v48  ;;  %v997_v48 = vld [vmem:[%s5647_s1 + $0x908] sm:$0xff] }
 0x309   :  { %2701 = vst [vmem:[#allocation2 + $0x150] sm:$0xff] %v1917_v11 }
 0x30b   :  { %v1989_v28 = vpop.f32.mrf.mxu2  ;;  %v2062_v1 = vpop.f32.mrf.mxu3 }
 0x30c   :  { %v5354_v58 = vadd.f32 %v2062_v1, %v1989_v28  ;;  %v1846_v16 = vpop.f32.mrf.mxu0  ;;  %v1919_v27 = vpop.f32.mrf.mxu1  ;;  %v909_v1 = vld [vmem:[%s5647_s1 + $0x648] sm:$0xff] }
 0x30d   :  { %v1847_v41 = vadd.f32 %v1846_v16, %v4967_v25  ;;  %v911_v16 = vld [vmem:[%s5647_s1 + $0x658] sm:$0xff] }
 0x30f   :  { %v1920_v34 = vadd.f32 %v1919_v27, %v1847_v41  ;;  %2112 = vmatmul.bf16.gmra.mxu0 %v5888_v51  ;;  %2185 = vmatmul.bf16.gmra.mxu1 %v5889_v9  ;;  %v941_v27 = vld [vmem:[%s5647_s1 + $0x748] sm:$0xff]  ;;  %v1109_v41 = vpack.c.bf16 %v911_v16, %v909_v1  ;;  %v5895_v1 = vld [vmem:[#allocation74_spill] sm:$0xff] }
 0x310   :  { %2258 = vmatmul.bf16.gmra.mxu2 %v5890_v18  ;;  %2331 = vmatmul.bf16.gmra.mxu3 %v5891_v33 }
 0x311   :  { %2703 = vst [vmem:[#allocation2 + $0x160] sm:$0xff] %v1920_v34  ;;  %v943_v34 = vld [vmem:[%s5647_s1 + $0x758] sm:$0xff]  ;;  %2371 = vmatpush.bf16.msra.mxu0 %v1109_v41 }
 0x313   :  { %v1992_v25 = vpop.f32.mrf.mxu2  ;;  %v2065_v60 = vpop.f32.mrf.mxu3 }
 0x314   :  { %v5367_v45 = vadd.f32 %v2065_v60, %v1992_v25  ;;  %v1848_v57 = vpop.f32.mrf.mxu0  ;;  %v1921_v42 = vpop.f32.mrf.mxu1  ;;  %v999_v25 = vld [vmem:[%s5647_s1 + $0x918] sm:$0xff] }
 0x315   :  { %v1849_v11 = vadd.f32 %v1848_v57, %v4990_v61  ;;  %v1125_v61 = vpack.c.bf16 %v943_v34, %v941_v27  ;;  %v5892_v57 = vld [vmem:[#allocation23_spill] sm:$0xff] }
 0x317   :  { %v1922_v28 = vadd.f32 %v1921_v42, %v1849_v11  ;;  %2444 = vmatpush.bf16.msra.mxu1 %v1125_v61  ;;  %v5893_v42 = vld [vmem:[#allocation24_spill] sm:$0xff]  ;;  %v1153_v11 = vpack.c.bf16 %v999_v25, %v997_v48  ;;  %v971_v48 = vld [vmem:[%s5647_s1 + $0x838] sm:$0xff] }
 0x319   :  { %2705 = vst [vmem:[#allocation2 + $0x170] sm:$0xff] %v1922_v28  ;;  %v5894_v28 = vld [vmem:[#allocation73_spill] sm:$0xff]  ;;  %2592 = vmatpush.bf16.msra.mxu3 %v1153_v11 }
 0x31a   :  { %v5898_v11 = vld [vmem:[#allocation77_spill] sm:$0xff] }
 0x31b   :  { %v1994_v51 = vpop.f32.mrf.mxu2  ;;  %v2067_v9 = vpop.f32.mrf.mxu3 }
 0x31c   :  { %v5382_v18 = vadd.f32 %v2067_v9, %v1994_v51  ;;  %v1851_v33 = vpop.f32.mrf.mxu0  ;;  %v1924_v39 = vpop.f32.mrf.mxu1 }
 0x31d   :  { %v1852_v15 = vadd.f32 %v1851_v33, %v5009_v29 }
 0x31f   :  { %v1925_v60 = vadd.f32 %v1924_v39, %v1852_v15  ;;  %2117 = vmatmul.bf16.gmra.mxu0 %v5892_v57  ;;  %2190 = vmatmul.bf16.gmra.mxu1 %v5893_v42  ;;  %v969_v15 = vld [vmem:[%s5647_s1 + $0x828] sm:$0xff] }
 0x320   :  { %2263 = vmatmul.bf16.gmra.mxu2 %v5894_v28  ;;  %2336 = vmatmul.bf16.gmra.mxu3 %v5895_v1  ;;  %v5897_v57 = vld [vmem:[#allocation28_spill] sm:$0xff]  ;;  %v1139_v42 = vpack.c.bf16 %v971_v48, %v969_v15  ;;  %v5899_v28 = vld [vmem:[#allocation78_spill] sm:$0xff] }
 0x321   :  { %2707 = vst [vmem:[#allocation2 + $0x180] sm:$0xff] %v1925_v60  ;;  %v5896_v60 = vld [vmem:[#allocation27_spill] sm:$0xff]  ;;  %v907_v1 = vld [vmem:[%s5647_s1 + $0x638] sm:$0xff] }
 0x322   :  { %2518 = vmatpush.bf16.msra.mxu2 %v1139_v42 }
 0x323   :  { %v1997_v29 = vpop.f32.mrf.mxu2  ;;  %v2070_v16 = vpop.f32.mrf.mxu3 }
 0x324   :  { %v5395_v27 = vadd.f32 %v2070_v16, %v1997_v29  ;;  %v1853_v41 = vpop.f32.mrf.mxu0  ;;  %v1926_v34 = vpop.f32.mrf.mxu1  ;;  %v937_v29 = vld [vmem:[%s5647_s1 + $0x728] sm:$0xff] }
 0x325   :  { %v939_v41 = vld [vmem:[%s5647_s1 + $0x738] sm:$0xff] }
 0x326   :  { %v1123_v34 = vpack.c.bf16 %v939_v41, %v937_v29 }
 0x328   :  { %2445 = vmatpush.bf16.msra.mxu1 %v1123_v34  ;;  %v5902_v34 = vld [vmem:[#allocation81_spill] sm:$0xff] }
 0x32b   :  { %v1999_v61 = vpop.f32.mrf.mxu2  ;;  %v2072_v51 = vpop.f32.mrf.mxu3 }
 0x32c   :  { %v2083_v9 = vpop.f32.mrf.mxu0  ;;  %v2156_v33 = vpop.f32.mrf.mxu1 }
 0x32d   :  { %v2084_v39 = vadd.f32 %v2083_v9, %v5052_v6  ;;  %v905_v6 = vld [vmem:[%s5647_s1 + $0x628] sm:$0xff] }
 0x32e   :  { %v1107_v16 = vpack.c.bf16 %v907_v1, %v905_v6 }
 0x32f   :  { %v2157_v25 = vadd.f32 %v2156_v33, %v2084_v39  ;;  %2122 = vmatmul.bf16.gmra.mxu0 %v5896_v60  ;;  %2195 = vmatmul.bf16.gmra.mxu1 %v5897_v57 }
 0x330   :  { %2268 = vmatmul.bf16.gmra.mxu2 %v5898_v11  ;;  %2341 = vmatmul.bf16.gmra.mxu3 %v5899_v28 }
 0x331   :  { %2372 = vmatpush.bf16.msra.mxu0 %v1107_v16  ;;  %v5900_v16 = vld [vmem:[#allocation31_spill] sm:$0xff] }
 0x333   :  { %v2229_v61 = vpop.f32.mrf.mxu2  ;;  %v2302_v51 = vpop.f32.mrf.mxu3 }
 0x334   :  { %v2230_v9 = vadd.f32 %v2229_v61, %v2157_v25  ;;  %v2085_v33 = vpop.f32.mrf.mxu0  ;;  %v2158_v39 = vpop.f32.mrf.mxu1  ;;  %v5901_v25 = vld [vmem:[#allocation32_spill] sm:$0xff] }
 0x335   :  { %v2086_v15 = vadd.f32 %v2085_v33, %v5072_v38  ;;  %v5903_v38 = vld [vmem:[#allocation82_spill] sm:$0xff] }
 0x336   :  { %v5421_v48 = vadd.f32 %v2302_v51, %v2230_v9 }
 0x337   :  { %v2159_v60 = vadd.f32 %v2158_v39, %v2086_v15 }
 0x33b   :  { %v2231_v57 = vpop.f32.mrf.mxu2  ;;  %v2304_v42 = vpop.f32.mrf.mxu3 }
 0x33c   :  { %v2232_v11 = vadd.f32 %v2231_v57, %v2159_v60  ;;  %v2088_v28 = vpop.f32.mrf.mxu0  ;;  %v2161_v6 = vpop.f32.mrf.mxu1  ;;  %v965_v57 = vld [vmem:[%s5647_s1 + $0x808] sm:$0xff] }
 0x33d   :  { %v2089_v1 = vadd.f32 %v2088_v28, %v5083_v24 }
 0x33e   :  { %v5424_v29 = vadd.f32 %v2304_v42, %v2232_v11  ;;  %v967_v42 = vld [vmem:[%s5647_s1 + $0x818] sm:$0xff]  ;;  %v901_v11 = vld [vmem:[%s5647_s1 + $0x608] sm:$0xff] }
 0x33f   :  { %v2162_v41 = vadd.f32 %v2161_v6, %v2089_v1  ;;  %2127 = vmatmul.bf16.gmra.mxu0 %v5900_v16  ;;  %2200 = vmatmul.bf16.gmra.mxu1 %v5901_v25  ;;  %v1137_v28 = vpack.c.bf16 %v967_v42, %v965_v57 }
 0x340   :  { %2273 = vmatmul.bf16.gmra.mxu2 %v5902_v34  ;;  %2346 = vmatmul.bf16.gmra.mxu3 %v5903_v38 }
 0x341   :  { %2519 = vmatpush.bf16.msra.mxu2 %v1137_v28 }
 0x343   :  { %v2234_v61 = vpop.f32.mrf.mxu2  ;;  %v2307_v51 = vpop.f32.mrf.mxu3 }
 0x344   :  { %v2235_v9 = vadd.f32 %v2234_v61, %v2162_v41  ;;  %v2090_v33 = vpop.f32.mrf.mxu0  ;;  %v2163_v39 = vpop.f32.mrf.mxu1 }
 0x345   :  { %v2091_v15 = vadd.f32 %v2090_v33, %v5121_v20  ;;  %v903_v20 = vld [vmem:[%s5647_s1 + $0x618] sm:$0xff] }
 0x346   :  { %v5431_v60 = vadd.f32 %v2307_v51, %v2235_v9  ;;  %v1105_v6 = vpack.c.bf16 %v903_v20, %v901_v11  ;;  %v933_v51 = vld [vmem:[%s5647_s1 + $0x708] sm:$0xff]  ;;  %v935_v9 = vld [vmem:[%s5647_s1 + $0x718] sm:$0xff]  ;;  %s2792_s1 = smov [#allocation2]  }
 0x347   :  { %v2164_v24 = vadd.f32 %v2163_v39, %v2091_v15  ;;  %v5904_v39 = vld [vmem:[#allocation35_spill] sm:$0xff]  ;;  %v5905_v15 = vld [vmem:[#allocation36_spill] sm:$0xff]  ;;  %s2713_s18 = sshll.u32 %s2792_s1, 4  ;;  %s2714_s18 = int_to_ptr.vmem [resolvable:$true] %s2713_s18 }
 0x348   :  { %2373 = vmatpush.bf16.msra.mxu0 %v1105_v6 }
 0x34b   :  { %v2236_v1 = vpop.f32.mrf.mxu2  ;;  %v2309_v41 = vpop.f32.mrf.mxu3 }
 0x34c   :  { %v2237_v16 = vadd.f32 %v2236_v1, %v2164_v24  ;;  %v2093_v25 = vpop.f32.mrf.mxu0  ;;  %v2166_v34 = vpop.f32.mrf.mxu1  ;;  %v1121_v24 = vpack.c.bf16 %v935_v9, %v933_v51  ;;  %v5906_v9 = vld [vmem:[#allocation39_spill] sm:$0xff] }
 0x34d   :  { %v2094_v38 = vadd.f32 %v2093_v25, %v5138_v53 }
 0x34e   :  { %v5446_v61 = vadd.f32 %v2309_v41, %v2237_v16  ;;  %2446 = vmatpush.bf16.msra.mxu1 %v1121_v24 }
 0x34f   :  { %v2167_v33 = vadd.f32 %v2166_v34, %v2094_v38  ;;  %2132 = vmatmul.bf16.gmra.mxu0 %v5904_v39  ;;  %2205 = vmatmul.bf16.gmra.mxu1 %v5905_v15 }
 0x350   :  { %2278 = vmatmul.bf16.gmra.mxu2 %v4482_v50  ;;  %2351 = vmatmul.bf16.gmra.mxu3 %v4484_v2 }
 0x353   :  { %v2239_v53 = vpop.f32.mrf.mxu2  ;;  %v2312_v57 = vpop.f32.mrf.mxu3 }
 0x354   :  { %v2240_v42 = vadd.f32 %v2239_v53, %v2167_v33  ;;  %v2095_v11 = vpop.f32.mrf.mxu0  ;;  %v2168_v28 = vpop.f32.mrf.mxu1  ;;  %v5907_v33 = vld [vmem:[#allocation40_spill] sm:$0xff] }
 0x355   :  { %v2096_v20 = vadd.f32 %v2095_v11, %v5158_v55 }
 0x356   :  { %v5459_v6 = vadd.f32 %v2312_v57, %v2240_v42 }
 0x357   :  { %v2169_v1 = vadd.f32 %v2168_v28, %v2096_v20 }
 0x35b   :  { %v2241_v41 = vpop.f32.mrf.mxu2  ;;  %v2314_v16 = vpop.f32.mrf.mxu3 }
 0x35c   :  { %v2242_v25 = vadd.f32 %v2241_v41, %v2169_v1  ;;  %v2098_v34 = vpop.f32.mrf.mxu0  ;;  %v2171_v38 = vpop.f32.mrf.mxu1 }
 0x35d   :  { %v2099_v50 = vadd.f32 %v2098_v34, %v5181_v4  ;;  %v5909_v34 = vld [vmem:[#allocation44_spill] sm:$0xff] }
 0x35e   :  { %v5462_v51 = vadd.f32 %v2314_v16, %v2242_v25  ;;  %v5908_v25 = vld [vmem:[#allocation43_spill] sm:$0xff] }
 0x35f   :  { %v2172_v2 = vadd.f32 %v2171_v38, %v2099_v50  ;;  %2137 = vmatmul.bf16.gmra.mxu0 %v5906_v9  ;;  %2210 = vmatmul.bf16.gmra.mxu1 %v5907_v33 }
 0x360   :  { %2283 = vmatmul.bf16.gmra.mxu2 %v4537_v37  ;;  %2356 = vmatmul.bf16.gmra.mxu3 %v4539_v3 }
 0x363   :  { %v2244_v55 = vpop.f32.mrf.mxu2  ;;  %v2317_v39 = vpop.f32.mrf.mxu3 }
 0x364   :  { %v2245_v15 = vadd.f32 %v2244_v55, %v2172_v2  ;;  %v2100_v24 = vpop.f32.mrf.mxu0  ;;  %v2173_v53 = vpop.f32.mrf.mxu1 }
 0x365   :  { %v2101_v57 = vadd.f32 %v2100_v24, %v5205_v14 }
 0x366   :  { %v5469_v42 = vadd.f32 %v2317_v39, %v2245_v15 }
 0x367   :  { %v2174_v4 = vadd.f32 %v2173_v53, %v2101_v57 }
 0x36b   :  { %v2246_v11 = vpop.f32.mrf.mxu2  ;;  %v2319_v28 = vpop.f32.mrf.mxu3 }
 0x36c   :  { %v2247_v20 = vadd.f32 %v2246_v11, %v2174_v4  ;;  %v2103_v1 = vpop.f32.mrf.mxu0  ;;  %v2176_v41 = vpop.f32.mrf.mxu1  ;;  %v5910_v11 = vld [vmem:[#allocation47_spill] sm:$0xff] }
 0x36d   :  { %v2104_v16 = vadd.f32 %v2103_v1, %v5213_v63 }
 0x36e   :  { %v5472_v37 = vadd.f32 %v2319_v28, %v2247_v20  ;;  %v5911_v28 = vld [vmem:[#allocation48_spill] sm:$0xff] }
 0x36f   :  { %v2177_v3 = vadd.f32 %v2176_v41, %v2104_v16  ;;  %2142 = vmatmul.bf16.gmra.mxu0 %v5908_v25  ;;  %2215 = vmatmul.bf16.gmra.mxu1 %v5909_v34 }
 0x370   :  { %2288 = vmatmul.bf16.gmra.mxu2 %v4607_v8  ;;  %2361 = vmatmul.bf16.gmra.mxu3 %v4609_v36 }
 0x373   :  { %v2249_v14 = vpop.f32.mrf.mxu2  ;;  %v2322_v38 = vpop.f32.mrf.mxu3 }
 0x374   :  { %v2250_v50 = vadd.f32 %v2249_v14, %v2177_v3  ;;  %v2105_v2 = vpop.f32.mrf.mxu0  ;;  %v2178_v9 = vpop.f32.mrf.mxu1 }
 0x375   :  { %v2106_v33 = vadd.f32 %v2105_v2, %v5222_v19 }
 0x376   :  { %v5479_v55 = vadd.f32 %v2322_v38, %v2250_v50 }
 0x377   :  { %v2179_v63 = vadd.f32 %v2178_v9, %v2106_v33  ;;  %v5912_v33 = vld [vmem:[#allocation51_spill] sm:$0xff] }
 0x37b   :  { %v2251_v39 = vpop.f32.mrf.mxu2  ;;  %v2324_v15 = vpop.f32.mrf.mxu3 }
 0x37c   :  { %v2252_v24 = vadd.f32 %v2251_v39, %v2179_v63  ;;  %v2108_v53 = vpop.f32.mrf.mxu0  ;;  %v2181_v57 = vpop.f32.mrf.mxu1  ;;  %v5913_v63 = vld [vmem:[#allocation52_spill] sm:$0xff] }
 0x37d   :  { %v2109_v4 = vadd.f32 %v2108_v53, %v5241_v22 }
 0x37e   :  { %v5482_v8 = vadd.f32 %v2324_v15, %v2252_v24 }
 0x37f   :  { %v2182_v36 = vadd.f32 %v2181_v57, %v2109_v4  ;;  %2374 = vmatmul.bf16.vlgmr.msra.gmra.mxu0 %v5910_v11  ;;  %2447 = vmatmul.bf16.vlgmr.msra.gmra.mxu1 %v5911_v28 }
 0x380   :  { %2520 = vmatmul.bf16.vlgmr.msra.gmra.mxu2 %v4660_v43  ;;  %2742 = vmatmul.msk.bf16.vlgmr.msra.gmra.mxu3 %vm1158_vm8, %v4662_v56 }
 0x383   :  { %v2254_v19 = vpop.f32.mrf.mxu2  ;;  %v2327_v20 = vpop.f32.mrf.mxu3 }
 0x384   :  { %v2255_v1 = vadd.f32 %v2254_v19, %v2182_v36  ;;  %v2110_v41 = vpop.f32.mrf.mxu0  ;;  %v2183_v16 = vpop.f32.mrf.mxu1 }
 0x385   :  { %v2111_v3 = vadd.f32 %v2110_v41, %v5244_v10  ;;  %v5914_v41 = vld [vmem:[#allocation55_spill] sm:$0xff] }
 0x386   :  { %v5490_v22 = vadd.f32 %v2327_v20, %v2255_v1 }
 0x387   :  { %v2184_v25 = vadd.f32 %v2183_v16, %v2111_v3  ;;  %v5915_v16 = vld [vmem:[#allocation56_spill] sm:$0xff] }
 0x38b   :  { %v2256_v34 = vpop.f32.mrf.mxu2  ;;  %v2329_v14 = vpop.f32.mrf.mxu3 }
 0x38c   :  { %v2257_v38 = vadd.f32 %v2256_v34, %v2184_v25  ;;  %v2113_v50 = vpop.f32.mrf.mxu0  ;;  %v2186_v2 = vpop.f32.mrf.mxu1 }
 0x38d   :  { %v2114_v43 = vadd.f32 %v2113_v50, %v5251_v30 }
 0x38e   :  { %v5493_v9 = vadd.f32 %v2329_v14, %v2257_v38 }
 0x38f   :  { %v2187_v56 = vadd.f32 %v2186_v2, %v2114_v43  ;;  %2379 = vmatmul.bf16.gmra.mxu0 %v5912_v33  ;;  %2452 = vmatmul.bf16.gmra.mxu1 %v5913_v63 }
 0x390   :  { %2525 = vmatmul.bf16.gmra.mxu2 %v4703_v31  ;;  %2743 = vmatmul.msk.bf16.gmra.mxu3 %vm1158_vm8, %v4705_v0 }
 0x393   :  { %v2259_v10 = vpop.f32.mrf.mxu2  ;;  %v2332_v39 = vpop.f32.mrf.mxu3 }
 0x394   :  { %v2260_v15 = vadd.f32 %v2259_v10, %v2187_v56  ;;  %v2115_v24 = vpop.f32.mrf.mxu0  ;;  %v2188_v53 = vpop.f32.mrf.mxu1 }
 0x395   :  { %v2116_v57 = vadd.f32 %v2115_v24, %v5272_v13 }
 0x396   :  { %v5501_v30 = vadd.f32 %v2332_v39, %v2260_v15  ;;  %v5916_v39 = vld [vmem:[#allocation59_spill] sm:$0xff]  ;;  %v5917_v15 = vld [vmem:[#allocation60_spill] sm:$0xff] }
 0x397   :  { %v2189_v4 = vadd.f32 %v2188_v53, %v2116_v57 }
 0x39b   :  { %v2261_v36 = vpop.f32.mrf.mxu2  ;;  %v2334_v11 = vpop.f32.mrf.mxu3 }
 0x39c   :  { %v2262_v28 = vadd.f32 %v2261_v36, %v2189_v4  ;;  %v2118_v19 = vpop.f32.mrf.mxu0  ;;  %v2191_v20 = vpop.f32.mrf.mxu1 }
 0x39d   :  { %v2119_v31 = vadd.f32 %v2118_v19, %v5279_v54 }
 0x39e   :  { %v5504_v1 = vadd.f32 %v2334_v11, %v2262_v28 }
 0x39f   :  { %v2192_v0 = vadd.f32 %v2191_v20, %v2119_v31  ;;  %2384 = vmatmul.bf16.gmra.mxu0 %v5914_v41  ;;  %2457 = vmatmul.bf16.gmra.mxu1 %v5915_v16  ;;  %v5918_v16 = vld [vmem:[#allocation63_spill] sm:$0xff] }
 0x3a0   :  { %2530 = vmatmul.bf16.gmra.mxu2 %v4758_v46  ;;  %2744 = vmatmul.msk.bf16.gmra.mxu3 %vm1158_vm8, %v4760_v47 }
 0x3a3   :  { %v2264_v13 = vpop.f32.mrf.mxu2  ;;  %v2337_v3 = vpop.f32.mrf.mxu3 }
 0x3a4   :  { %v2265_v25 = vadd.f32 %v2264_v13, %v2192_v0  ;;  %v2120_v34 = vpop.f32.mrf.mxu0  ;;  %v2193_v14 = vpop.f32.mrf.mxu1  ;;  %v5919_v13 = vld [vmem:[#allocation64_spill] sm:$0xff] }
 0x3a5   :  { %v2121_v38 = vadd.f32 %v2120_v34, %v5288_v21 }
 0x3a6   :  { %v5512_v54 = vadd.f32 %v2337_v3, %v2265_v25 }
 0x3a7   :  { %v2194_v50 = vadd.f32 %v2193_v14, %v2121_v38 }
 0x3ab   :  { %v2266_v2 = vpop.f32.mrf.mxu2  ;;  %v2339_v43 = vpop.f32.mrf.mxu3 }
 0x3ac   :  { %v2267_v56 = vadd.f32 %v2266_v2, %v2194_v50  ;;  %v2123_v33 = vpop.f32.mrf.mxu0  ;;  %v2196_v63 = vpop.f32.mrf.mxu1 }
 0x3ad   :  { %v2124_v46 = vadd.f32 %v2123_v33, %v5307_v23 }
 0x3ae   :  { %v5515_v10 = vadd.f32 %v2339_v43, %v2267_v56 }
 0x3af   :  { %v2197_v47 = vadd.f32 %v2196_v63, %v2124_v46  ;;  %2389 = vmatmul.bf16.gmra.mxu0 %v5916_v39  ;;  %2462 = vmatmul.bf16.gmra.mxu1 %v5917_v15  ;;  %v5921_v39 = vld [vmem:[#allocation68_spill] sm:$0xff] }
 0x3b0   :  { %2535 = vmatmul.bf16.gmra.mxu2 %v4789_v59  ;;  %2745 = vmatmul.msk.bf16.gmra.mxu3 %vm1158_vm8, %v4791_v17 }
 0x3b3   :  { %v2269_v21 = vpop.f32.mrf.mxu2  ;;  %v2342_v24 = vpop.f32.mrf.mxu3 }
 0x3b4   :  { %v2270_v53 = vadd.f32 %v2269_v21, %v2197_v47  ;;  %v2125_v57 = vpop.f32.mrf.mxu0  ;;  %v2198_v4 = vpop.f32.mrf.mxu1  ;;  %v5920_v47 = vld [vmem:[#allocation67_spill] sm:$0xff] }
 0x3b5   :  { %v2126_v36 = vadd.f32 %v2125_v57, %v5316_v26 }
 0x3b6   :  { %v5523_v23 = vadd.f32 %v2342_v24, %v2270_v53 }
 0x3b7   :  { %v2199_v11 = vadd.f32 %v2198_v4, %v2126_v36 }
 0x3bb   :  { %v2271_v28 = vpop.f32.mrf.mxu2  ;;  %v2344_v19 = vpop.f32.mrf.mxu3 }
 0x3bc   :  { %v2272_v20 = vadd.f32 %v2271_v28, %v2199_v11  ;;  %v2128_v31 = vpop.f32.mrf.mxu0  ;;  %v2201_v0 = vpop.f32.mrf.mxu1 }
 0x3bd   :  { %v2129_v59 = vadd.f32 %v2128_v31, %v5323_v35 }
 0x3be   :  { %v5526_v41 = vadd.f32 %v2344_v19, %v2272_v20 }
 0x3bf   :  { %v2202_v17 = vadd.f32 %v2201_v0, %v2129_v59  ;;  %2394 = vmatmul.bf16.gmra.mxu0 %v5918_v16  ;;  %2467 = vmatmul.bf16.gmra.mxu1 %v5919_v13  ;;  %v5922_v0 = vld [vmem:[#allocation71_spill] sm:$0xff]  ;;  %v5923_v59 = vld [vmem:[#allocation72_spill] sm:$0xff] }
 0x3c0   :  { %2540 = vmatmul.bf16.gmra.mxu2 %v4844_v44  ;;  %2746 = vmatmul.msk.bf16.gmra.mxu3 %vm1158_vm8, %v4846_v5 }
 0x3c3   :  { %v2274_v26 = vpop.f32.mrf.mxu2  ;;  %v2347_v3 = vpop.f32.mrf.mxu3 }
 0x3c4   :  { %v2275_v25 = vadd.f32 %v2274_v26, %v2202_v17  ;;  %v2130_v34 = vpop.f32.mrf.mxu0  ;;  %v2203_v14 = vpop.f32.mrf.mxu1  ;;  %v5924_v17 = vld [vmem:[#allocation93_spill] sm:$0xff] }
 0x3c5   :  { %v2131_v38 = vadd.f32 %v2130_v34, %v5332_v7 }
 0x3c6   :  { %v5534_v35 = vadd.f32 %v2347_v3, %v2275_v25 }
 0x3c7   :  { %v2204_v50 = vadd.f32 %v2203_v14, %v2131_v38 }
 0x3cb   :  { %v2276_v2 = vpop.f32.mrf.mxu2  ;;  %v2349_v43 = vpop.f32.mrf.mxu3 }
 0x3cc   :  { %v2277_v56 = vadd.f32 %v2276_v2, %v2204_v50  ;;  %v2133_v33 = vpop.f32.mrf.mxu0  ;;  %v2206_v63 = vpop.f32.mrf.mxu1 }
 0x3cd   :  { %v2134_v44 = vadd.f32 %v2133_v33, %v5351_v52 }
 0x3ce   :  { %v5537_v46 = vadd.f32 %v2349_v43, %v2277_v56 }
 0x3cf   :  { %v2207_v5 = vadd.f32 %v2206_v63, %v2134_v44  ;;  %2399 = vmatmul.bf16.gmra.mxu0 %v5920_v47  ;;  %2472 = vmatmul.bf16.gmra.mxu1 %v5921_v39  ;;  %v5927_v47 = vld [vmem:[#allocation76_spill] sm:$0xff]  ;;  %v5928_v39 = vld [vmem:[#allocation17_spill] sm:$0xff] }
 0x3d0   :  { %2545 = vmatmul.bf16.gmra.mxu2 %v4887_v40  ;;  %2747 = vmatmul.msk.bf16.gmra.mxu3 %vm1158_vm8, %v4889_v62 }
 0x3d3   :  { %v2279_v7 = vpop.f32.mrf.mxu2  ;;  %v2352_v15 = vpop.f32.mrf.mxu3 }
 0x3d4   :  { %v2280_v21 = vadd.f32 %v2279_v7, %v2207_v5  ;;  %v2135_v24 = vpop.f32.mrf.mxu0  ;;  %v2208_v53 = vpop.f32.mrf.mxu1  ;;  %v5926_v5 = vld [vmem:[#allocation75_spill] sm:$0xff] }
 0x3d5   :  { %v2136_v57 = vadd.f32 %v2135_v24, %v5354_v58  ;;  %v5925_v58 = vld [vmem:[#allocation94_spill] sm:$0xff] }
 0x3d6   :  { %v5545_v52 = vadd.f32 %v2352_v15, %v2280_v21 }
 0x3d7   :  { %v2209_v4 = vadd.f32 %v2208_v53, %v2136_v57 }
 0x3db   :  { %v2281_v36 = vpop.f32.mrf.mxu2  ;;  %v2354_v11 = vpop.f32.mrf.mxu3 }
 0x3dc   :  { %v2282_v28 = vadd.f32 %v2281_v36, %v2209_v4  ;;  %v2138_v19 = vpop.f32.mrf.mxu0  ;;  %v2211_v20 = vpop.f32.mrf.mxu1 }
 0x3dd   :  { %v2139_v40 = vadd.f32 %v2138_v19, %v5367_v45  ;;  %v5930_v19 = vld [vmem:[#allocation79_spill] sm:$0xff] }
 0x3de   :  { %v5548_v31 = vadd.f32 %v2354_v11, %v2282_v28 }
 0x3df   :  { %v2212_v62 = vadd.f32 %v2211_v20, %v2139_v40  ;;  %2404 = vmatmul.bf16.gmra.mxu0 %v5922_v0  ;;  %2477 = vmatmul.bf16.gmra.mxu1 %v5923_v59  ;;  %v5931_v20 = vld [vmem:[#allocation80_spill] sm:$0xff]  ;;  %v5932_v40 = vld [vmem:[#allocation21_spill] sm:$0xff] }
 0x3e0   :  { %2550 = vmatmul.bf16.gmra.mxu2 %v5924_v17  ;;  %2748 = vmatmul.msk.bf16.gmra.mxu3 %vm1158_vm8, %v5925_v58 }
 0x3e3   :  { %v2284_v16 = vpop.f32.mrf.mxu2  ;;  %v2357_v13 = vpop.f32.mrf.mxu3 }
 0x3e4   :  { %v2285_v26 = vadd.f32 %v2284_v16, %v2212_v62  ;;  %v2140_v3 = vpop.f32.mrf.mxu0  ;;  %v2213_v25 = vpop.f32.mrf.mxu1  ;;  %v5933_v62 = vld [vmem:[#allocation22_spill] sm:$0xff] }
 0x3e5   :  { %v2141_v34 = vadd.f32 %v2140_v3, %v5382_v18  ;;  %v5929_v18 = vld [vmem:[#allocation18_spill] sm:$0xff] }
 0x3e6   :  { %v5556_v45 = vadd.f32 %v2357_v13, %v2285_v26 }
 0x3e7   :  { %v2214_v14 = vadd.f32 %v2213_v25, %v2141_v34 }
 0x3eb   :  { %v2286_v38 = vpop.f32.mrf.mxu2  ;;  %v2359_v50 = vpop.f32.mrf.mxu3 }
 0x3ec   :  { %v2287_v2 = vadd.f32 %v2286_v38, %v2214_v14  ;;  %v2143_v43 = vpop.f32.mrf.mxu0  ;;  %v2216_v56 = vpop.f32.mrf.mxu1 }
 0x3ed   :  { %v2144_v33 = vadd.f32 %v2143_v43, %v5395_v27 }
 0x3ee   :  { %v5559_v63 = vadd.f32 %v2359_v50, %v2287_v2 }
 0x3ef   :  { %v2217_v44 = vadd.f32 %v2216_v56, %v2144_v33  ;;  %2409 = vmatmul.bf16.gmra.mxu0 %v5926_v5  ;;  %2482 = vmatmul.bf16.gmra.mxu1 %v5927_v47  ;;  %v5934_v56 = vld [vmem:[#allocation83_spill] sm:$0xff]  ;;  %v5935_v33 = vld [vmem:[#allocation84_spill] sm:$0xff] }
 0x3f0   :  { %2555 = vmatmul.bf16.gmra.mxu2 %v5928_v39  ;;  %2749 = vmatmul.msk.bf16.gmra.mxu3 %vm1158_vm8, %v5929_v18 }
 0x3f3   :  { %v2289_v7 = vpop.f32.mrf.mxu2  ;;  %v2362_v15 = vpop.f32.mrf.mxu3 }
 0x3f4   :  { %v2290_v21 = vadd.f32 %v2289_v7, %v2217_v44  ;;  %v2145_v24 = vpop.f32.mrf.mxu0  ;;  %v2218_v53 = vpop.f32.mrf.mxu1  ;;  %v5936_v44 = vld [vmem:[#allocation25_spill] sm:$0xff] }
 0x3f6   :  { %v5566_v57 = vadd.f32 %v2362_v15, %v2290_v21 }
 0x3fb   :  { %v2291_v27 = vpop.f32.mrf.mxu2  ;;  %v2364_v4 = vpop.f32.mrf.mxu3 }
 0x3fc   :  { %v2375_v36 = vpop.f32.mrf.mxu0  ;;  %v2448_v11 = vpop.f32.mrf.mxu1 }
 0x3fd   :  { %v2376_v28 = vadd.f32 %v2375_v36, %v5421_v48 }
 0x3ff   :  { %2414 = vmatmul.bf16.gmra.mxu0 %v5930_v19  ;;  %2487 = vmatmul.bf16.gmra.mxu1 %v5931_v20  ;;  %v2449_v0 = vadd.f32 %v2448_v11, %v2376_v28  ;;  %v5938_v20 = vld [vmem:[#allocation87_spill] sm:$0xff] }
 0x400   :  { %2560 = vmatmul.bf16.gmra.mxu2 %v5932_v40  ;;  %2750 = vmatmul.msk.bf16.gmra.mxu3 %vm1158_vm8, %v5933_v62  ;;  %v5939_v40 = vld [vmem:[#allocation88_spill] sm:$0xff] }
 0x403   :  { %v2521_v59 = vpop.f32.mrf.mxu2  ;;  %v2594_v17 = vpop.f32.mrf.mxu3 }
 0x404   :  { %v2522_v58 = vadd.f32 %v2521_v59, %v2449_v0  ;;  %v2377_v16 = vpop.f32.mrf.mxu0  ;;  %v2450_v13 = vpop.f32.mrf.mxu1 }
 0x405   :  { %v2378_v3 = vadd.f32 %v2377_v16, %v5424_v29  ;;  %v5937_v29 = vld [vmem:[#allocation26_spill] sm:$0xff] }
 0x406   :  { %v2595_v26 = vadd.f32 %v2594_v17, %v2522_v58 }
 0x407   :  { %v2451_v48 = vadd.f32 %v2450_v13, %v2378_v3 }
 0x408   :  { %2660 = vst.msk [vmem:[#allocation2 + $0x8] sm:$0xff] %vm2659_vm9, %v2595_v26 }
 0x40b   :  { %v2523_v25 = vpop.f32.mrf.mxu2  ;;  %v2596_v34 = vpop.f32.mrf.mxu3 }
 0x40c   :  { %v2524_v14 = vadd.f32 %v2523_v25, %v2451_v48  ;;  %v2380_v38 = vpop.f32.mrf.mxu0  ;;  %v2453_v50 = vpop.f32.mrf.mxu1 }
 0x40d   :  { %v2381_v43 = vadd.f32 %v2380_v38, %v5431_v60 }
 0x40e   :  { %v2597_v2 = vadd.f32 %v2596_v34, %v2524_v14 }
 0x40f   :  { %2419 = vmatmul.bf16.gmra.mxu0 %v5934_v56  ;;  %2492 = vmatmul.bf16.gmra.mxu1 %v5935_v33  ;;  %v2454_v5 = vadd.f32 %v2453_v50, %v2381_v43  ;;  %v5941_v50 = vld [vmem:[#allocation89_spill] sm:$0xff] }
 0x410   :  { %2662 = vst.msk [vmem:[#allocation2 + $0x18] sm:$0xff] %vm2659_vm9, %v2597_v2  ;;  %2565 = vmatmul.bf16.gmra.mxu2 %v5936_v44  ;;  %2751 = vmatmul.msk.bf16.gmra.mxu3 %vm1158_vm8, %v5937_v29  ;;  %v5942_v2 = vld [vmem:[#allocation90_spill] sm:$0xff] }
 0x413   :  { %v2526_v47 = vpop.f32.mrf.mxu2  ;;  %v2599_v39 = vpop.f32.mrf.mxu3 }
 0x414   :  { %v2527_v18 = vadd.f32 %v2526_v47, %v2454_v5  ;;  %v2382_v7 = vpop.f32.mrf.mxu0  ;;  %v2455_v15 = vpop.f32.mrf.mxu1 }
 0x415   :  { %v2383_v60 = vadd.f32 %v2382_v7, %v5446_v61  ;;  %v5940_v61 = vld [vmem:[#allocation85_spill] sm:$0xff] }
 0x416   :  { %v2600_v21 = vadd.f32 %v2599_v39, %v2527_v18 }
 0x417   :  { %v2456_v24 = vadd.f32 %v2455_v15, %v2383_v60  ;;  %v5943_v60 = vld [vmem:[#allocation91_spill] sm:$0xff] }
 0x418   :  { %2664 = vst.msk [vmem:[#allocation2 + $0x28] sm:$0xff] %vm2659_vm9, %v2600_v21 }
 0x41b   :  { %v2528_v53 = vpop.f32.mrf.mxu2  ;;  %v2601_v27 = vpop.f32.mrf.mxu3 }
 0x41c   :  { %v2529_v4 = vadd.f32 %v2528_v53, %v2456_v24  ;;  %v2385_v36 = vpop.f32.mrf.mxu0  ;;  %v2458_v11 = vpop.f32.mrf.mxu1  ;;  %v5944_v24 = vld [vmem:[#allocation92_spill] sm:$0xff]  ;;  %v5945_v53 = vld [vmem:[#allocation86_spill] sm:$0xff] }
 0x41d   :  { %v2386_v19 = vadd.f32 %v2385_v36, %v5459_v6 }
 0x41e   :  { %v2602_v28 = vadd.f32 %v2601_v27, %v2529_v4 }
 0x41f   :  { %2424 = vmatmul.bf16.gmra.mxu0 %v5938_v20  ;;  %2497 = vmatmul.bf16.gmra.mxu1 %v5939_v40  ;;  %v2459_v62 = vadd.f32 %v2458_v11, %v2386_v19 }
 0x420   :  { %2666 = vst.msk [vmem:[#allocation2 + $0x38] sm:$0xff] %vm2659_vm9, %v2602_v28  ;;  %2570 = vmatmul.bf16.gmra.mxu2 %v5117_v49  ;;  %2752 = vmatmul.msk.bf16.gmra.mxu3 %vm1158_vm8, %v5940_v61 }
 0x423   :  { %v2531_v0 = vpop.f32.mrf.mxu2  ;;  %v2604_v59 = vpop.f32.mrf.mxu3 }
 0x424   :  { %v2532_v17 = vadd.f32 %v2531_v0, %v2459_v62  ;;  %v2387_v58 = vpop.f32.mrf.mxu0  ;;  %v2460_v16 = vpop.f32.mrf.mxu1 }
 0x425   :  { %v2388_v6 = vadd.f32 %v2387_v58, %v5462_v51 }
 0x426   :  { %v2605_v13 = vadd.f32 %v2604_v59, %v2532_v17 }
 0x427   :  { %v2461_v26 = vadd.f32 %v2460_v16, %v2388_v6 }
 0x428   :  { %2668 = vst.msk [vmem:[#allocation2 + $0x48] sm:$0xff] %vm2659_vm9, %v2605_v13 }
 0x42b   :  { %v2533_v3 = vpop.f32.mrf.mxu2  ;;  %v2606_v48 = vpop.f32.mrf.mxu3 }
 0x42c   :  { %v2534_v25 = vadd.f32 %v2533_v3, %v2461_v26  ;;  %v2390_v34 = vpop.f32.mrf.mxu0  ;;  %v2463_v49 = vpop.f32.mrf.mxu1 }
 0x42d   :  { %v2391_v38 = vadd.f32 %v2390_v34, %v5469_v42 }
 0x42e   :  { %v2607_v14 = vadd.f32 %v2606_v48, %v2534_v25 }
 0x42f   :  { %2429 = vmatmul.bf16.gmra.mxu0 %v5941_v50  ;;  %2502 = vmatmul.bf16.gmra.mxu1 %v5942_v2  ;;  %v2464_v51 = vadd.f32 %v2463_v49, %v2391_v38 }
 0x430   :  { %2670 = vst.msk [vmem:[#allocation2 + $0x58] sm:$0xff] %vm2659_vm9, %v2607_v14  ;;  %2575 = vmatmul.bf16.gmra.mxu2 %v5154_v32  ;;  %2753 = vmatmul.msk.bf16.gmra.mxu3 %vm1158_vm8, %v5156_v12 }
 0x433   :  { %v2536_v43 = vpop.f32.mrf.mxu2  ;;  %v2609_v56 = vpop.f32.mrf.mxu3 }
 0x434   :  { %v2537_v33 = vadd.f32 %v2536_v43, %v2464_v51  ;;  %v2392_v44 = vpop.f32.mrf.mxu0  ;;  %v2465_v29 = vpop.f32.mrf.mxu1 }
 0x435   :  { %v2393_v42 = vadd.f32 %v2392_v44, %v5472_v37  ;;  %v5946_v37 = vld [vmem:[#allocation29_spill] sm:$0xff] }
 0x436   :  { %v2610_v5 = vadd.f32 %v2609_v56, %v2537_v33 }
 0x437   :  { %v2466_v47 = vadd.f32 %v2465_v29, %v2393_v42 }
 0x438   :  { %2672 = vst.msk [vmem:[#allocation2 + $0x68] sm:$0xff] %vm2659_vm9, %v2610_v5 }
 0x43b   :  { %v2538_v39 = vpop.f32.mrf.mxu2  ;;  %v2611_v18 = vpop.f32.mrf.mxu3 }
 0x43c   :  { %v2539_v7 = vadd.f32 %v2538_v39, %v2466_v47  ;;  %v2395_v15 = vpop.f32.mrf.mxu0  ;;  %v2468_v32 = vpop.f32.mrf.mxu1 }
 0x43d   :  { %v2396_v12 = vadd.f32 %v2395_v15, %v5479_v55 }
 0x43e   :  { %v2612_v21 = vadd.f32 %v2611_v18, %v2539_v7 }
 0x43f   :  { %2434 = vmatmul.bf16.gmra.mxu0 %v5943_v60  ;;  %2507 = vmatmul.bf16.gmra.mxu1 %v5944_v24  ;;  %v2469_v27 = vadd.f32 %v2468_v32, %v2396_v12 }
 0x440   :  { %2674 = vst.msk [vmem:[#allocation2 + $0x78] sm:$0xff] %vm2659_vm9, %v2612_v21  ;;  %2580 = vmatmul.bf16.gmra.mxu2 %v5945_v53  ;;  %2754 = vmatmul.msk.bf16.gmra.mxu3 %vm1158_vm8, %v5946_v37 }
 0x443   :  { %v2541_v4 = vpop.f32.mrf.mxu2  ;;  %v2614_v36 = vpop.f32.mrf.mxu3 }
 0x444   :  { %v2542_v11 = vadd.f32 %v2541_v4, %v2469_v27  ;;  %v2397_v28 = vpop.f32.mrf.mxu0  ;;  %v2470_v19 = vpop.f32.mrf.mxu1 }
 0x445   :  { %v2398_v55 = vadd.f32 %v2397_v28, %v5482_v8 }
 0x446   :  { %v2615_v20 = vadd.f32 %v2614_v36, %v2542_v11 }
 0x447   :  { %v2471_v40 = vadd.f32 %v2470_v19, %v2398_v55 }
 0x448   :  { %2676 = vst.msk [vmem:[#allocation2 + $0x88] sm:$0xff] %vm2659_vm9, %v2615_v20 }
 0x44b   :  { %v2543_v61 = vpop.f32.mrf.mxu2  ;;  %v2616_v62 = vpop.f32.mrf.mxu3 }
 0x44c   :  { %v2544_v0 = vadd.f32 %v2543_v61, %v2471_v40  ;;  %v2400_v59 = vpop.f32.mrf.mxu0  ;;  %v2473_v17 = vpop.f32.mrf.mxu1 }
 0x44d   :  { %v2401_v16 = vadd.f32 %v2400_v59, %v5490_v22 }
 0x44e   :  { %v2617_v58 = vadd.f32 %v2616_v62, %v2544_v0 }
 0x44f   :  { %v2474_v13 = vadd.f32 %v2473_v17, %v2401_v16 }
 0x450   :  { %2678 = vst.msk [vmem:[#allocation2 + $0x98] sm:$0xff] %vm2659_vm9, %v2617_v58 }
 0x453   :  { %v2546_v6 = vpop.f32.mrf.mxu2  ;;  %v2619_v26 = vpop.f32.mrf.mxu3 }
 0x454   :  { %v2547_v3 = vadd.f32 %v2546_v6, %v2474_v13  ;;  %v2402_v48 = vpop.f32.mrf.mxu0  ;;  %v2475_v25 = vpop.f32.mrf.mxu1 }
 0x455   :  { %v2403_v34 = vadd.f32 %v2402_v48, %v5493_v9 }
 0x456   :  { %v2620_v8 = vadd.f32 %v2619_v26, %v2547_v3 }
 0x457   :  { %v2476_v49 = vadd.f32 %v2475_v25, %v2403_v34 }
 0x458   :  { %2680 = vst.msk [vmem:[#allocation2 + $0xa8] sm:$0xff] %vm2659_vm9, %v2620_v8 }
 0x45b   :  { %v2548_v14 = vpop.f32.mrf.mxu2  ;;  %v2621_v38 = vpop.f32.mrf.mxu3 }
 0x45c   :  { %v2549_v50 = vadd.f32 %v2548_v14, %v2476_v49  ;;  %v2405_v2 = vpop.f32.mrf.mxu0  ;;  %v2478_v51 = vpop.f32.mrf.mxu1 }
 0x45d   :  { %v2406_v43 = vadd.f32 %v2405_v2, %v5501_v30 }
 0x45e   :  { %v2622_v22 = vadd.f32 %v2621_v38, %v2549_v50 }
 0x45f   :  { %v2479_v56 = vadd.f32 %v2478_v51, %v2406_v43 }
 0x460   :  { %2682 = vst.msk [vmem:[#allocation2 + $0xb8] sm:$0xff] %vm2659_vm9, %v2622_v22 }
 0x463   :  { %v2551_v33 = vpop.f32.mrf.mxu2  ;;  %v2624_v44 = vpop.f32.mrf.mxu3 }
 0x464   :  { %v2552_v29 = vadd.f32 %v2551_v33, %v2479_v56  ;;  %v2407_v5 = vpop.f32.mrf.mxu0  ;;  %v2480_v42 = vpop.f32.mrf.mxu1 }
 0x465   :  { %v2408_v47 = vadd.f32 %v2407_v5, %v5504_v1 }
 0x466   :  { %v2625_v9 = vadd.f32 %v2624_v44, %v2552_v29 }
 0x467   :  { %v2481_v39 = vadd.f32 %v2480_v42, %v2408_v47 }
 0x468   :  { %2684 = vst.msk [vmem:[#allocation2 + $0xc8] sm:$0xff] %vm2659_vm9, %v2625_v9 }
 0x46b   :  { %v2553_v18 = vpop.f32.mrf.mxu2  ;;  %v2626_v7 = vpop.f32.mrf.mxu3 }
 0x46c   :  { %v2554_v15 = vadd.f32 %v2553_v18, %v2481_v39  ;;  %v2410_v32 = vpop.f32.mrf.mxu0  ;;  %v2483_v21 = vpop.f32.mrf.mxu1 }
 0x46d   :  { %v2411_v12 = vadd.f32 %v2410_v32, %v5512_v54 }
 0x46e   :  { %v2627_v30 = vadd.f32 %v2626_v7, %v2554_v15 }
 0x46f   :  { %v2484_v60 = vadd.f32 %v2483_v21, %v2411_v12 }
 0x470   :  { %2686 = vst.msk [vmem:[#allocation2 + $0xd8] sm:$0xff] %vm2659_vm9, %v2627_v30 }
 0x473   :  { %v2556_v24 = vpop.f32.mrf.mxu2  ;;  %v2629_v53 = vpop.f32.mrf.mxu3 }
 0x474   :  { %v2557_v37 = vadd.f32 %v2556_v24, %v2484_v60  ;;  %v2412_v27 = vpop.f32.mrf.mxu0  ;;  %v2485_v4 = vpop.f32.mrf.mxu1 }
 0x475   :  { %v2413_v36 = vadd.f32 %v2412_v27, %v5515_v10 }
 0x476   :  { %v2630_v1 = vadd.f32 %v2629_v53, %v2557_v37 }
 0x477   :  { %v2486_v11 = vadd.f32 %v2485_v4, %v2413_v36 }
 0x478   :  { %2688 = vst.msk [vmem:[#allocation2 + $0xe8] sm:$0xff] %vm2659_vm9, %v2630_v1 }
 0x47b   :  { %v2558_v28 = vpop.f32.mrf.mxu2  ;;  %v2631_v19 = vpop.f32.mrf.mxu3 }
 0x47c   :  { %v2559_v20 = vadd.f32 %v2558_v28, %v2486_v11  ;;  %v2415_v55 = vpop.f32.mrf.mxu0  ;;  %v2488_v40 = vpop.f32.mrf.mxu1 }
 0x47d   :  { %v2416_v61 = vadd.f32 %v2415_v55, %v5523_v23 }
 0x47e   :  { %v2632_v54 = vadd.f32 %v2631_v19, %v2559_v20 }
 0x47f   :  { %v2489_v62 = vadd.f32 %v2488_v40, %v2416_v61 }
 0x480   :  { %2690 = vst.msk [vmem:[#allocation2 + $0xf8] sm:$0xff] %vm2659_vm9, %v2632_v54 }
 0x483   :  { %v2561_v0 = vpop.f32.mrf.mxu2  ;;  %v2634_v59 = vpop.f32.mrf.mxu3 }
 0x484   :  { %v2562_v17 = vadd.f32 %v2561_v0, %v2489_v62  ;;  %v2417_v58 = vpop.f32.mrf.mxu0  ;;  %v2490_v16 = vpop.f32.mrf.mxu1 }
 0x485   :  { %v2418_v13 = vadd.f32 %v2417_v58, %v5526_v41 }
 0x486   :  { %v2635_v10 = vadd.f32 %v2634_v59, %v2562_v17 }
 0x487   :  { %v2491_v6 = vadd.f32 %v2490_v16, %v2418_v13 }
 0x488   :  { %2692 = vst.msk [vmem:[#allocation2 + $0x108] sm:$0xff] %vm2659_vm9, %v2635_v10 }
 0x48b   :  { %v2563_v26 = vpop.f32.mrf.mxu2  ;;  %v2636_v3 = vpop.f32.mrf.mxu3 }
 0x48c   :  { %v2564_v48 = vadd.f32 %v2563_v26, %v2491_v6  ;;  %v2420_v25 = vpop.f32.mrf.mxu0  ;;  %v2493_v8 = vpop.f32.mrf.mxu1 }
 0x48d   :  { %v2421_v34 = vadd.f32 %v2420_v25, %v5534_v35 }
 0x48e   :  { %v2637_v23 = vadd.f32 %v2636_v3, %v2564_v48 }
 0x48f   :  { %v2494_v49 = vadd.f32 %v2493_v8, %v2421_v34 }
 0x490   :  { %2694 = vst.msk [vmem:[#allocation2 + $0x118] sm:$0xff] %vm2659_vm9, %v2637_v23 }
 0x493   :  { %v2566_v14 = vpop.f32.mrf.mxu2  ;;  %v2639_v38 = vpop.f32.mrf.mxu3 }
 0x494   :  { %v2567_v50 = vadd.f32 %v2566_v14, %v2494_v49  ;;  %v2422_v2 = vpop.f32.mrf.mxu0  ;;  %v2495_v51 = vpop.f32.mrf.mxu1 }
 0x495   :  { %v2423_v22 = vadd.f32 %v2422_v2, %v5537_v46 }
 0x496   :  { %v2640_v41 = vadd.f32 %v2639_v38, %v2567_v50 }
 0x497   :  { %v2496_v43 = vadd.f32 %v2495_v51, %v2423_v22 }
 0x498   :  { %2696 = vst.msk [vmem:[#allocation2 + $0x128] sm:$0xff] %vm2659_vm9, %v2640_v41 }
 0x49b   :  { %v2568_v56 = vpop.f32.mrf.mxu2  ;;  %v2641_v33 = vpop.f32.mrf.mxu3 }
 0x49c   :  { %v2569_v44 = vadd.f32 %v2568_v56, %v2496_v43  ;;  %v2425_v29 = vpop.f32.mrf.mxu0  ;;  %v2498_v5 = vpop.f32.mrf.mxu1 }
 0x49d   :  { %v2426_v42 = vadd.f32 %v2425_v29, %v5545_v52 }
 0x49e   :  { %v2642_v35 = vadd.f32 %v2641_v33, %v2569_v44 }
 0x49f   :  { %v2499_v9 = vadd.f32 %v2498_v5, %v2426_v42 }
 0x4a0   :  { %2698 = vst.msk [vmem:[#allocation2 + $0x138] sm:$0xff] %vm2659_vm9, %v2642_v35 }
 0x4a3   :  { %v2571_v47 = vpop.f32.mrf.mxu2  ;;  %v2644_v39 = vpop.f32.mrf.mxu3 }
 0x4a4   :  { %v2572_v18 = vadd.f32 %v2571_v47, %v2499_v9  ;;  %v2427_v7 = vpop.f32.mrf.mxu0  ;;  %v2500_v15 = vpop.f32.mrf.mxu1 }
 0x4a5   :  { %v2428_v32 = vadd.f32 %v2427_v7, %v5548_v31 }
 0x4a6   :  { %v2645_v46 = vadd.f32 %v2644_v39, %v2572_v18 }
 0x4a7   :  { %v2501_v21 = vadd.f32 %v2500_v15, %v2428_v32 }
 0x4a8   :  { %2700 = vst.msk [vmem:[#allocation2 + $0x148] sm:$0xff] %vm2659_vm9, %v2645_v46 }
 0x4ab   :  { %v2573_v30 = vpop.f32.mrf.mxu2  ;;  %v2646_v12 = vpop.f32.mrf.mxu3 }
 0x4ac   :  { %v2574_v60 = vadd.f32 %v2573_v30, %v2501_v21  ;;  %v2430_v24 = vpop.f32.mrf.mxu0  ;;  %v2503_v53 = vpop.f32.mrf.mxu1 }
 0x4ad   :  { %v2431_v37 = vadd.f32 %v2430_v24, %v5556_v45 }
 0x4ae   :  { %v2647_v52 = vadd.f32 %v2646_v12, %v2574_v60 }
 0x4af   :  { %v2504_v27 = vadd.f32 %v2503_v53, %v2431_v37 }
 0x4b0   :  { %2702 = vst.msk [vmem:[#allocation2 + $0x158] sm:$0xff] %vm2659_vm9, %v2647_v52 }
 0x4b3   :  { %v2576_v4 = vpop.f32.mrf.mxu2  ;;  %v2649_v1 = vpop.f32.mrf.mxu3 }
 0x4b4   :  { %v2577_v36 = vadd.f32 %v2576_v4, %v2504_v27  ;;  %v2432_v11 = vpop.f32.mrf.mxu0  ;;  %v2505_v28 = vpop.f32.mrf.mxu1 }
 0x4b5   :  { %v2433_v19 = vadd.f32 %v2432_v11, %v5559_v63 }
 0x4b6   :  { %v2650_v31 = vadd.f32 %v2649_v1, %v2577_v36 }
 0x4b7   :  { %v2506_v20 = vadd.f32 %v2505_v28, %v2433_v19 }
 0x4b8   :  { %2704 = vst.msk [vmem:[#allocation2 + $0x168] sm:$0xff] %vm2659_vm9, %v2650_v31 }
 0x4bb   :  { %v2578_v55 = vpop.f32.mrf.mxu2  ;;  %v2651_v40 = vpop.f32.mrf.mxu3 }
 0x4bc   :  { %v2579_v54 = vadd.f32 %v2578_v55, %v2506_v20  ;;  %v2435_v61 = vpop.f32.mrf.mxu0  ;;  %v2508_v62 = vpop.f32.mrf.mxu1 }
 0x4bd   :  { %v2436_v0 = vadd.f32 %v2435_v61, %v5566_v57 }
 0x4be   :  { %v2652_v45 = vadd.f32 %v2651_v40, %v2579_v54 }
 0x4bf   :  { %v2509_v59 = vadd.f32 %v2508_v62, %v2436_v0 }
 0x4c0   :  { %2706 = vst.msk [vmem:[#allocation2 + $0x178] sm:$0xff] %vm2659_vm9, %v2652_v45 }
 0x4c3   :  { %v2581_v63 = vpop.f32.mrf.mxu2  ;;  %v2654_v17 = vpop.f32.mrf.mxu3 }
 0x4c4   :  { %v2582_v58 = vadd.f32 %v2581_v63, %v2509_v59  ;;  %v2437_v16 = vpop.f32.mrf.mxu0  ;;  %v2510_v10 = vpop.f32.mrf.mxu1 }
 0x4c6   :  { %v2655_v13 = vadd.f32 %v2654_v17, %v2582_v58 }
 0x4c8   :  { %2708 = vst.msk [vmem:[#allocation2 + $0x188] sm:$0xff] %vm2659_vm9, %v2655_v13 }
 0x4c9   :  { %2721 = dma.vmem_to_hbm [thread:$0]  %s2714_s18, 6400, %s2716_s21, [#allocation3], %s2793_s22, %s2793_s22, %s2794_s23  }
 0x4cb   :  { %v2583_v57 = vpop.f32.mrf.mxu2  ;;  %v2656_v6 = vpop.f32.mrf.mxu3 }
 0x4cc   :  { %2790 = dma.done.wait [#allocation3], 6400  }
 0x4cd   :  { %2791 = vsyncadd [#allocation3], 4294960896 }
 0x4ce   :  { %2726 = vsyncpa [#allocation3], 1 }

</bundles_post_ra>
